<compile_context>
chip_gen: v5e
topology: v5e:2x2
jax: 0.10.0
libtpu: 0.0.40
codegen_flags: <defaults>
</compile_context>

<pallas_src>
import functools
import math

import jax
import jax.numpy as jnp
from jax.experimental import pallas as pl
from jax.experimental.pallas import tpu as pltpu

# Modest explicit scoped-VMEM request so the same tiles fit every generation
# (v7x: 64 MiB physical / 32 MiB default scoped VMEM; v5e/v6e have headroom).
_VMEM_LIMIT_BYTES = 32 * 1024 * 1024


def _pick_tile(dim, candidates):
    """Largest candidate that evenly divides `dim`, else the full dim."""
    for c in candidates:
        if dim % c == 0:
            return c
    return dim


# --------------------------------------------------------------------------- #
# Tiled linear:  Y = X @ W + b    (bf16 MXU inputs, f32 accumulation)
# --------------------------------------------------------------------------- #

def _linear_kernel(x_ref, w_ref, b_ref, o_ref, acc_ref):
    k = pl.program_id(2)

    @pl.when(k == 0)
    def _init():
        acc_ref[...] = jnp.zeros_like(acc_ref)

    acc_ref[...] += jnp.dot(x_ref[...], w_ref[...],
                            preferred_element_type=jnp.float32)

    @pl.when(k == pl.num_programs(2) - 1)
    def _finalize():
        o_ref[...] = (acc_ref[...] + b_ref[...]).astype(o_ref.dtype)


def linear(x, w, b, *, out_dtype=jnp.float32, tm=None, tn=None, tk=None):
    """x: (M, K), w: (K, N), b: (N,) -> (M, N)."""
    M, K = x.shape
    Kw, N = w.shape
    assert K == Kw
    x = x.astype(jnp.bfloat16)
    w = w.astype(jnp.bfloat16)
    b2 = b.reshape(1, N).astype(jnp.float32)

    tm = tm or _pick_tile(M, (256, 128, 64, 32, 16, 8))
    tn = tn or _pick_tile(N, (256, 128))
    tk = tk or _pick_tile(K, (512, 256, 128))
    grid = (M // tm, N // tn, K // tk)

    flops = 2 * M * N * K
    bytes_accessed = 2 * (M * K + K * N) + 4 * N + M * N * jnp.dtype(out_dtype).itemsize

    return pl.pallas_call(
        _linear_kernel,
        out_shape=jax.ShapeDtypeStruct((M, N), out_dtype),
        grid_spec=pltpu.PrefetchScalarGridSpec(
            num_scalar_prefetch=0,
            grid=grid,
            in_specs=[
                pl.BlockSpec((tm, tk), lambda i, j, k: (i, k)),
                pl.BlockSpec((tk, tn), lambda i, j, k: (k, j)),
                pl.BlockSpec((1, tn), lambda i, j, k: (0, j)),
            ],
            out_specs=pl.BlockSpec((tm, tn), lambda i, j, k: (i, j)),
            scratch_shapes=[pltpu.VMEM((tm, tn), jnp.float32)],
        ),
        compiler_params=pltpu.CompilerParams(
            dimension_semantics=("parallel", "parallel", "arbitrary"),
            vmem_limit_bytes=_VMEM_LIMIT_BYTES,
        ),
        cost_estimate=pl.CostEstimate(
            flops=int(flops), transcendentals=0,
            bytes_accessed=int(bytes_accessed)),
    )(x, w, b2)


# --------------------------------------------------------------------------- #
# Flash attention with fused interleaved rotary embedding
# --------------------------------------------------------------------------- #

def _rope(x_b, cos, sin_sgn, perm):
    # Interleaved RoPE:
    #   out[2i]   = x[2i]*cos_i - x[2i+1]*sin_i
    #   out[2i+1] = x[2i]*sin_i + x[2i+1]*cos_i
    # The pair swap x[j] -> x[j^1] is done as an exact bf16 matmul with a
    # constant permutation matrix (MXU), avoiding strided lane slicing.
    swapped = jnp.dot(x_b, perm, preferred_element_type=jnp.float32)
    return x_b.astype(jnp.float32) * cos + swapped * sin_sgn


def _flash_attn_kernel(q_ref, k_ref, v_ref, rotq_ref, rotk_ref, perm_ref,
                       o_ref, qs_ref, m_ref, l_ref, acc_ref,
                       *, tq, tk, scale):
    qi = pl.program_id(2)
    ki = pl.program_id(3)

    @pl.when(ki == 0)
    def _init():
        m_ref[...] = jnp.full_like(m_ref, -1e30)
        l_ref[...] = jnp.zeros_like(l_ref)
        acc_ref[...] = jnp.zeros_like(acc_ref)
        q_rot = _rope(q_ref[0, 0, 0], rotq_ref[0], rotq_ref[1], perm_ref[...])
        qs_ref[...] = (q_rot * scale).astype(qs_ref.dtype)

    # Skip kv tiles that lie entirely in the causal future of this q tile.
    @pl.when(ki * tk < (qi + 1) * tq)
    def _compute():
        k_rot = _rope(k_ref[0, 0, 0], rotk_ref[0], rotk_ref[1],
                      perm_ref[...]).astype(jnp.bfloat16)
        s = jax.lax.dot_general(
            qs_ref[...], k_rot, (((1,), (1,)), ((), ())),
            preferred_element_type=jnp.float32)                    # (tq, tk)

        q_pos = qi * tq + jax.lax.broadcasted_iota(jnp.int32, (tq, tk), 0)
        k_pos = ki * tk + jax.lax.broadcasted_iota(jnp.int32, (tq, tk), 1)
        causal = k_pos <= q_pos
        s = jnp.where(causal, s, -1e30)                            # finite mask

        m_prev = m_ref[...]
        m_next = jnp.maximum(m_prev, jnp.max(s, axis=-1, keepdims=True))
        alpha = jnp.exp(m_prev - m_next)
        p = jnp.exp(s - m_next)
        p = jnp.where(causal, p, 0.0)          # robust even for fully-masked rows
        l_ref[...] = alpha * l_ref[...] + jnp.sum(p, axis=-1, keepdims=True)
        acc_ref[...] = alpha * acc_ref[...] + jnp.dot(
            p.astype(jnp.bfloat16), v_ref[0, 0, 0],
            preferred_element_type=jnp.float32)
        m_ref[...] = m_next

    @pl.when(ki == pl.num_programs(3) - 1)
    def _finalize():
        o_ref[0, 0] = (acc_ref[...] *
                       pl.reciprocal(l_ref[...], approx=True)).astype(o_ref.dtype)


def flash_attention(qkv, rot, perm, *, tq=None, tk=None):
    """qkv: (3, B, H, T, D) bf16, rot: (2, T, D) f32, perm: (D, D) bf16."""
    _, B, H, T, D = qkv.shape
    tq = tq or _pick_tile(T, (128, 64, 32, 16, 8))
    tk = tk or _pick_tile(T, (128, 64, 32, 16, 8))
    grid = (B, H, T // tq, T // tk)
    scale = 1.0 / math.sqrt(D)

    kernel = functools.partial(_flash_attn_kernel, tq=tq, tk=tk, scale=scale)

    flops = 4 * B * H * T * T * D + 4 * B * H * T * D * D   # qk^T, pv, rope swaps
    bytes_accessed = qkv.size * 2 + B * H * T * D * 2 + rot.size * 4 + perm.size * 2

    return pl.pallas_call(
        kernel,
        out_shape=jax.ShapeDtypeStruct((B, H, T, D), jnp.bfloat16),
        grid_spec=pltpu.PrefetchScalarGridSpec(
            num_scalar_prefetch=0,
            grid=grid,
            in_specs=[
                pl.BlockSpec((1, 1, 1, tq, D), lambda b, h, qi, ki: (0, b, h, qi, 0)),
                pl.BlockSpec((1, 1, 1, tk, D), lambda b, h, qi, ki: (1, b, h, ki, 0)),
                pl.BlockSpec((1, 1, 1, tk, D), lambda b, h, qi, ki: (2, b, h, ki, 0)),
                pl.BlockSpec((2, tq, D), lambda b, h, qi, ki: (0, qi, 0)),
                pl.BlockSpec((2, tk, D), lambda b, h, qi, ki: (0, ki, 0)),
                pl.BlockSpec((D, D), lambda b, h, qi, ki: (0, 0)),
            ],
            out_specs=pl.BlockSpec((1, 1, tq, D), lambda b, h, qi, ki: (b, h, qi, 0)),
            scratch_shapes=[
                pltpu.VMEM((tq, D), jnp.bfloat16),   # rotated + scaled q
                pltpu.VMEM((tq, 1), jnp.float32),    # running max
                pltpu.VMEM((tq, 1), jnp.float32),    # running denominator
                pltpu.VMEM((tq, D), jnp.float32),    # output accumulator
            ],
        ),
        compiler_params=pltpu.CompilerParams(
            dimension_semantics=("parallel", "parallel", "parallel", "arbitrary"),
            vmem_limit_bytes=_VMEM_LIMIT_BYTES,
        ),
        cost_estimate=pl.CostEstimate(
            flops=int(flops), transcendentals=int(B * H * T * T),
            bytes_accessed=int(bytes_accessed)),
    )(qkv, qkv, qkv, rot, rot, perm)


# --------------------------------------------------------------------------- #
# Rotary tables / glue (trace-time JAX, tiny)
# --------------------------------------------------------------------------- #

def rope_tables(seq_len, head_dim):
    """rot[0] = cos duplicated per pair; rot[1] = interleaved (-sin, +sin)."""
    inv_freq = 10000.0 ** (-jnp.arange(0, head_dim, 2, dtype=jnp.float32) / head_dim)
    angles = jnp.arange(seq_len, dtype=jnp.float32)[:, None] * inv_freq[None, :]
    cos = jnp.cos(angles)
    sin = jnp.sin(angles)
    cos_full = jnp.repeat(cos, 2, axis=-1)
    sin_sgn = jnp.stack([-sin, sin], axis=-1).reshape(seq_len, head_dim)
    return jnp.stack([cos_full, sin_sgn], axis=0)        # (2, T, D) f32


def pair_swap_matrix(head_dim):
    """(D, D) permutation matrix: (x @ P)[..., j] == x[..., j ^ 1]."""
    idx = jnp.arange(head_dim)
    return (idx[:, None] == (idx[None, :] ^ 1)).astype(jnp.bfloat16)


def init_params(key, n_embd):
    k1, k2, k3, k4 = jax.random.split(key, 4)
    return dict(
        w_attn=0.05 * jax.random.normal(k1, (n_embd, 3 * n_embd), jnp.float32),
        b_attn=0.02 * jax.random.normal(k2, (3 * n_embd,), jnp.float32),
        w_cproj=0.02 * jax.random.normal(k3, (n_embd, n_embd), jnp.float32),
        b_cproj=0.02 * jax.random.normal(k4, (n_embd,), jnp.float32),
    )


def prepare_params(params):
    """bf16 weights for the MXU, f32 biases for the f32 epilogue."""
    return dict(
        w_attn=params["w_attn"].astype(jnp.bfloat16),
        b_attn=params["b_attn"].astype(jnp.float32),
        w_cproj=params["w_cproj"].astype(jnp.bfloat16),
        b_cproj=params["b_cproj"].astype(jnp.float32),
    )


def causal_self_attention(x, params, rot, perm, n_head):
    """Pallas forward of CausalSelfAttention (rotary nanoGPT)."""
    B, T, E = x.shape
    H = n_head
    D = E // H

    x2d = x.reshape(B * T, E)
    qkv = linear(x2d, params["w_attn"], params["b_attn"],
                 out_dtype=jnp.bfloat16)                          # (B*T, 3E)

    # (B*T, 3E) -> (3, B, H, T, D): one relayout covering q, k and v together.
    # TODO(synk): fold this transpose (and the post-attention one) into the
    # neighbouring kernels' index maps when head_dim is lane aligned (>=128).
    qkv = qkv.reshape(B, T, 3, H, D).transpose(2, 0, 3, 1, 4)

    y = flash_attention(qkv, rot[:, :T], perm)                    # (B, H, T, D)
    y2d = y.transpose(0, 2, 1, 3).reshape(B * T, E)

    out = linear(y2d, params["w_cproj"], params["b_cproj"],
                 out_dtype=jnp.float32)
    return out.reshape(B, T, E)


# --------------------------------------------------------------------------- #
# Pure-JAX reference (torch semantics, bf16 matmul inputs to match precision)
# --------------------------------------------------------------------------- #

def reference_forward(x, params, n_head):
    B, T, E = x.shape
    H = n_head
    D = E // H

    w_attn = params["w_attn"].astype(jnp.bfloat16)
    w_cproj = params["w_cproj"].astype(jnp.bfloat16)

    qkv = jnp.dot(x.astype(jnp.bfloat16), w_attn,
                  preferred_element_type=jnp.float32) + params["b_attn"]
    qkv = qkv.astype(jnp.bfloat16)
    q, k, v = jnp.split(qkv, 3, axis=-1)
    q = q.reshape(B, T, H, D).astype(jnp.float32)
    k = k.reshape(B, T, H, D).astype(jnp.float32)
    v = v.reshape(B, T, H, D).astype(jnp.float32)

    # RotaryPosEmbed.apply_rotation (interleaved even/odd pairs)
    inv_freq = 10000.0 ** (-jnp.arange(0, D, 2, dtype=jnp.float32) / D)
    ang = jnp.arange(T, dtype=jnp.float32)[:, None] * inv_freq[None, :]
    sin = jnp.sin(ang)[None, :, None, :]
    cos = jnp.cos(ang)[None, :, None, :]

    def rot(u):
        u1, u2 = u[..., 0::2], u[..., 1::2]
        return jnp.stack([u1 * cos - u2 * sin, u1 * sin + u2 * cos],
                         axis=-1).reshape(u.shape)

    scale = 1.0 / math.sqrt(D)
    qr = (rot(q) * scale).astype(jnp.bfloat16).astype(jnp.float32)
    kr = rot(k).astype(jnp.bfloat16).astype(jnp.float32)

    s = jnp.einsum("bqhd,bkhd->bhqk", qr, kr)
    mask = jnp.tril(jnp.ones((T, T), bool))[None, None]
    s = jnp.where(mask, s, -jnp.inf)
    p = jax.nn.softmax(s, axis=-1)
    y = jnp.einsum("bhqk,bkhd->bqhd",
                   p.astype(jnp.bfloat16).astype(jnp.float32), v)
    y = y.reshape(B * T, E).astype(jnp.bfloat16)

    out = jnp.dot(y, w_cproj, preferred_element_type=jnp.float32) + params["b_cproj"]
    return out.reshape(B, T, E)


# --------------------------------------------------------------------------- #
# main
# --------------------------------------------------------------------------- #

if __name__ == "__main__":
    # Small GPT-style attention block: n_embd=384, n_head=6 (head_dim=64),
    # batch=2, seq_len=256.  Exercises multi-tile M/N/K matmuls and multi-tile
    # flash attention (2 query tiles x 2 kv tiles per head, with causal skip).
    n_embd, n_head, seq_len = 384, 6, 256
    B, T = 2, 256
    head_dim = n_embd // n_head

    key = jax.random.PRNGKey(0)
    k_param, k_x = jax.random.split(key)
    params = init_params(k_param, n_embd)
    x = jax.random.normal(k_x, (B, T, n_embd), jnp.float32)

    kparams = prepare_params(params)
    rot = rope_tables(seq_len, head_dim)
    perm = pair_swap_matrix(head_dim)

    @jax.jit
    def forward(x_in, p, rot_tab, perm_mat):
        return causal_self_attention(x_in, p, rot_tab, perm_mat, n_head)

    y = jax.block_until_ready(forward(x, kparams, rot, perm))

    assert y.shape == (B, T, n_embd)
    assert bool(jnp.all(jnp.isfinite(y)))

    y_ref = reference_forward(x, params, n_head)
    max_err = float(jnp.max(jnp.abs(y - y_ref)))
    ref_scale = float(jnp.max(jnp.abs(y_ref)))
    assert max_err <= 5e-3 + 2e-2 * ref_scale, (max_err, ref_scale)

    print("KERNEL_OK")
</pallas_src>

<mosaic_0001>
module attributes {stable_mosaic.version = 11 : i64} {
  func.func @_linear_kernel(%arg0: i32, %arg1: i32, %arg2: i32, %arg3: memref<256x128xbf16, #tpu.memory_space<vmem>>, %arg4: memref<128x128xbf16, #tpu.memory_space<vmem>>, %arg5: memref<1x128xf32, #tpu.memory_space<vmem>>, %arg6: memref<256x128xbf16, #tpu.memory_space<vmem>>, %arg7: memref<256x128xf32, #tpu.memory_space<vmem>>) attributes {dimension_semantics = [#tpu.dimension_semantics<parallel>, #tpu.dimension_semantics<parallel>, #tpu.dimension_semantics<arbitrary>], iteration_bounds = array<i64: 2, 9, 3>, scalar_prefetch = 0 : i64, scratch_operands = 1 : i64, tpu.core_type = #tpu.core_type<tc>, window_params = [{transform_indices = @transform_0, window_bounds = array<i64: 256, 128>}, {transform_indices = @transform_1, window_bounds = array<i64: 128, 128>}, {transform_indices = @transform_2, window_bounds = array<i64: 1, 128>}, {transform_indices = @transform_3, window_bounds = array<i64: 256, 128>}]} {
    %c0_i32 = arith.constant 0 : i32
    %0 = arith.cmpi eq, %arg2, %c0_i32 : i32
    %1 = arith.extui %0 : i1 to i32
    %c0_i32_0 = arith.constant 0 : i32
    %2 = arith.cmpi ne, %1, %c0_i32_0 : i32
    scf.if %2 {
      %cst_9 = arith.constant 0.000000e+00 : f32
      %12 = vector.broadcast %cst_9 : f32 to vector<256x128xf32>
      %c0_10 = arith.constant 0 : index
      %c0_11 = arith.constant 0 : index
      %13 = vector.load %arg7[%c0_10, %c0_11] : memref<256x128xf32, #tpu.memory_space<vmem>>, vector<256x128xf32>
      tpu.vector_store %arg7[%c0_10, %c0_11], %12 {strides = array<i32>} : memref<256x128xf32, #tpu.memory_space<vmem>>, vector<256x128xf32>,
    } else {
    }
    %c0 = arith.constant 0 : index
    %c0_1 = arith.constant 0 : index
    %3 = vector.load %arg7[%c0, %c0_1] : memref<256x128xf32, #tpu.memory_space<vmem>>, vector<256x128xf32>
    %c0_2 = arith.constant 0 : index
    %c0_3 = arith.constant 0 : index
    %4 = vector.load %arg3[%c0_2, %c0_3] : memref<256x128xbf16, #tpu.memory_space<vmem>>, vector<256x128xbf16>
    %c0_4 = arith.constant 0 : index
    %c0_5 = arith.constant 0 : index
    %5 = vector.load %arg4[%c0_4, %c0_5] : memref<128x128xbf16, #tpu.memory_space<vmem>>, vector<128x128xbf16>
    %cst = arith.constant dense<0.000000e+00> : vector<256x128xf32>
    %6 = tpu.matmul %4, %5, %cst {dimension_numbers = #tpu.dot_dimension_numbers<[1], [0], [0], [1], [0, 0, 1, 1], [], []>} : vector<256x128xbf16>, vector<128x128xbf16>, vector<256x128xf32> -> vector<256x128xf32>
    %7 = arith.addf %3, %6 : vector<256x128xf32>
    %c0_6 = arith.constant 0 : index
    %c0_7 = arith.constant 0 : index
    %8 = vector.load %arg7[%c0_6, %c0_7] : memref<256x128xf32, #tpu.memory_space<vmem>>, vector<256x128xf32>
    tpu.vector_store %arg7[%c0_6, %c0_7], %7 {strides = array<i32>} : memref<256x128xf32, #tpu.memory_space<vmem>>, vector<256x128xf32>,
    %c2_i32 = arith.constant 2 : i32
    %9 = arith.cmpi eq, %arg2, %c2_i32 : i32
    %10 = arith.extui %9 : i1 to i32
    %c0_i32_8 = arith.constant 0 : i32
    %11 = arith.cmpi ne, %10, %c0_i32_8 : i32
    scf.if %11 {
      %c0_9 = arith.constant 0 : index
      %c0_10 = arith.constant 0 : index
      %12 = vector.load %arg7[%c0_9, %c0_10] : memref<256x128xf32, #tpu.memory_space<vmem>>, vector<256x128xf32>
      %c0_11 = arith.constant 0 : index
      %c0_12 = arith.constant 0 : index
      %13 = vector.load %arg5[%c0_11, %c0_12] : memref<1x128xf32, #tpu.memory_space<vmem>>, vector<1x128xf32>
      %14 = vector.broadcast %13 : vector<1x128xf32> to vector<256x128xf32>
      %15 = arith.addf %12, %14 : vector<256x128xf32>
      %16 = arith.truncf %15 : vector<256x128xf32> to vector<256x128xbf16>
      %c0_13 = arith.constant 0 : index
      %c0_14 = arith.constant 0 : index
      %17 = vector.load %arg6[%c0_13, %c0_14] : memref<256x128xbf16, #tpu.memory_space<vmem>>, vector<256x128xbf16>
      tpu.vector_store %arg6[%c0_13, %c0_14], %16 {strides = array<i32>} : memref<256x128xbf16, #tpu.memory_space<vmem>>, vector<256x128xbf16>,
    } else {
    }
    return
  }
  func.func @transform_0(%arg0: i32, %arg1: i32, %arg2: i32) -> (i32, i32) {
    %c0_i32 = arith.constant 0 : i32
    return %arg0, %arg2 : i32, i32
  }
  func.func @transform_1(%arg0: i32, %arg1: i32, %arg2: i32) -> (i32, i32) {
    %c0_i32 = arith.constant 0 : i32
    return %arg2, %arg1 : i32, i32
  }
  func.func @transform_2(%arg0: i32, %arg1: i32, %arg2: i32) -> (i32, i32) {
    %c0_i32 = arith.constant 0 : i32
    %c0_i32_0 = arith.constant 0 : i32
    return %c0_i32, %arg1 : i32, i32
  }
  func.func @transform_3(%arg0: i32, %arg1: i32, %arg2: i32) -> (i32, i32) {
    %c0_i32 = arith.constant 0 : i32
    return %arg0, %arg1 : i32, i32
  }
}

module attributes {stable_mosaic.version = 11 : i64} {
  func.func @_flash_attn_kernel(%arg0: i32, %arg1: i32, %arg2: i32, %arg3: i32, %arg4: memref<1x1x1x128x64xbf16, #tpu.memory_space<vmem>>, %arg5: memref<1x1x1x128x64xbf16, #tpu.memory_space<vmem>>, %arg6: memref<1x1x1x128x64xbf16, #tpu.memory_space<vmem>>, %arg7: memref<2x128x64xf32, #tpu.memory_space<vmem>>, %arg8: memref<2x128x64xf32, #tpu.memory_space<vmem>>, %arg9: memref<64x64xbf16, #tpu.memory_space<vmem>>, %arg10: memref<1x1x128x64xbf16, #tpu.memory_space<vmem>>, %arg11: memref<128x64xbf16, #tpu.memory_space<vmem>>, %arg12: memref<128x1xf32, #tpu.memory_space<vmem>>, %arg13: memref<128x1xf32, #tpu.memory_space<vmem>>, %arg14: memref<128x64xf32, #tpu.memory_space<vmem>>) attributes {dimension_semantics = [#tpu.dimension_semantics<parallel>, #tpu.dimension_semantics<parallel>, #tpu.dimension_semantics<parallel>, #tpu.dimension_semantics<arbitrary>], iteration_bounds = array<i64: 2, 6, 2, 2>, scalar_prefetch = 0 : i64, scratch_operands = 4 : i64, tpu.core_type = #tpu.core_type<tc>, window_params = [{transform_indices = @transform_0, window_bounds = array<i64: 1, 1, 1, 128, 64>}, {transform_indices = @transform_1, window_bounds = array<i64: 1, 1, 1, 128, 64>}, {transform_indices = @transform_2, window_bounds = array<i64: 1, 1, 1, 128, 64>}, {transform_indices = @transform_3, window_bounds = array<i64: 2, 128, 64>}, {transform_indices = @transform_4, window_bounds = array<i64: 2, 128, 64>}, {pipeline_mode = #tpu.pipeline_mode<synchronous>, transform_indices = @transform_5, window_bounds = array<i64: 64, 64>}, {transform_indices = @transform_6, window_bounds = array<i64: 1, 1, 128, 64>}]} {
    %c0_i32 = arith.constant 0 : i32
    %0 = arith.cmpi eq, %arg3, %c0_i32 : i32
    %1 = arith.extui %0 : i1 to i32
    %c0_i32_0 = arith.constant 0 : i32
    %2 = arith.cmpi ne, %1, %c0_i32_0 : i32
    scf.if %2 {
      %cst = arith.constant -1.000000e+30 : f32
      %12 = vector.broadcast %cst : f32 to vector<128x1xf32>
      %c0 = arith.constant 0 : index
      %c0_5 = arith.constant 0 : index
      %13 = vector.load %arg12[%c0, %c0_5] : memref<128x1xf32, #tpu.memory_space<vmem>>, vector<128x1xf32>
      tpu.vector_store %arg12[%c0, %c0_5], %12 {strides = array<i32>} : memref<128x1xf32, #tpu.memory_space<vmem>>, vector<128x1xf32>,
      %cst_6 = arith.constant 0.000000e+00 : f32
      %14 = vector.broadcast %cst_6 : f32 to vector<128x1xf32>
      %c0_7 = arith.constant 0 : index
      %c0_8 = arith.constant 0 : index
      %15 = vector.load %arg13[%c0_7, %c0_8] : memref<128x1xf32, #tpu.memory_space<vmem>>, vector<128x1xf32>
      tpu.vector_store %arg13[%c0_7, %c0_8], %14 {strides = array<i32>} : memref<128x1xf32, #tpu.memory_space<vmem>>, vector<128x1xf32>,
      %cst_9 = arith.constant 0.000000e+00 : f32
      %16 = vector.broadcast %cst_9 : f32 to vector<128x64xf32>
      %c0_10 = arith.constant 0 : index
      %c0_11 = arith.constant 0 : index
      %17 = vector.load %arg14[%c0_10, %c0_11] : memref<128x64xf32, #tpu.memory_space<vmem>>, vector<128x64xf32>
      tpu.vector_store %arg14[%c0_10, %c0_11], %16 {strides = array<i32>} : memref<128x64xf32, #tpu.memory_space<vmem>>, vector<128x64xf32>,
      %c0_12 = arith.constant 0 : index
      %c0_13 = arith.constant 0 : index
      %c0_14 = arith.constant 0 : index
      %c0_15 = arith.constant 0 : index
      %c0_16 = arith.constant 0 : index
      %18 = vector.load %arg4[%c0_12, %c0_13, %c0_14, %c0_15, %c0_16] : memref<1x1x1x128x64xbf16, #tpu.memory_space<vmem>>, vector<1x1x1x128x64xbf16>
      %19 = vector.shape_cast %18 : vector<1x1x1x128x64xbf16> to vector<128x64xbf16>
      %c0_17 = arith.constant 0 : index
      %c0_18 = arith.constant 0 : index
      %c0_19 = arith.constant 0 : index
      %20 = vector.load %arg7[%c0_17, %c0_18, %c0_19] : memref<2x128x64xf32, #tpu.memory_space<vmem>>, vector<1x128x64xf32>
      %21 = vector.shape_cast %20 : vector<1x128x64xf32> to vector<128x64xf32>
      %c1 = arith.constant 1 : index
      %c0_20 = arith.constant 0 : index
      %c0_21 = arith.constant 0 : index
      %22 = vector.load %arg7[%c1, %c0_20, %c0_21] : memref<2x128x64xf32, #tpu.memory_space<vmem>>, vector<1x128x64xf32>
      %23 = vector.shape_cast %22 : vector<1x128x64xf32> to vector<128x64xf32>
      %c0_22 = arith.constant 0 : index
      %c0_23 = arith.constant 0 : index
      %24 = vector.load %arg9[%c0_22, %c0_23] : memref<64x64xbf16, #tpu.memory_space<vmem>>, vector<64x64xbf16>
      %cst_24 = arith.constant dense<0.000000e+00> : vector<128x64xf32>
      %25 = tpu.matmul %19, %24, %cst_24 {dimension_numbers = #tpu.dot_dimension_numbers<[1], [0], [0], [1], [0, 0, 1, 1], [], []>} : vector<128x64xbf16>, vector<64x64xbf16>, vector<128x64xf32> -> vector<128x64xf32>
      %26 = arith.extf %19 : vector<128x64xbf16> to vector<128x64xf32>
      %27 = arith.mulf %26, %21 : vector<128x64xf32>
      %28 = arith.mulf %25, %23 : vector<128x64xf32>
      %29 = arith.addf %27, %28 : vector<128x64xf32>
      %cst_25 = arith.constant 1.250000e-01 : f32
      %30 = vector.broadcast %cst_25 : f32 to vector<128x64xf32>
      %31 = arith.mulf %29, %30 : vector<128x64xf32>
      %32 = arith.truncf %31 : vector<128x64xf32> to vector<128x64xbf16>
      %c0_26 = arith.constant 0 : index
      %c0_27 = arith.constant 0 : index
      %33 = vector.load %arg11[%c0_26, %c0_27] : memref<128x64xbf16, #tpu.memory_space<vmem>>, vector<128x64xbf16>
      tpu.vector_store %arg11[%c0_26, %c0_27], %32 {strides = array<i32>} : memref<128x64xbf16, #tpu.memory_space<vmem>>, vector<128x64xbf16>,
    } else {
    }
    %c128_i32 = arith.constant 128 : i32
    %3 = arith.muli %arg3, %c128_i32 : i32
    %c1_i32 = arith.constant 1 : i32
    %4 = arith.addi %arg2, %c1_i32 : i32
    %c128_i32_1 = arith.constant 128 : i32
    %5 = arith.muli %4, %c128_i32_1 : i32
    %6 = arith.cmpi slt, %3, %5 : i32
    %7 = arith.extui %6 : i1 to i32
    %c0_i32_2 = arith.constant 0 : i32
    %8 = arith.cmpi ne, %7, %c0_i32_2 : i32
    scf.if %8 {
      %c0 = arith.constant 0 : index
      %c0_5 = arith.constant 0 : index
      %c0_6 = arith.constant 0 : index
      %c0_7 = arith.constant 0 : index
      %c0_8 = arith.constant 0 : index
      %12 = vector.load %arg5[%c0, %c0_5, %c0_6, %c0_7, %c0_8] : memref<1x1x1x128x64xbf16, #tpu.memory_space<vmem>>, vector<1x1x1x128x64xbf16>
      %13 = vector.shape_cast %12 : vector<1x1x1x128x64xbf16> to vector<128x64xbf16>
      %c0_9 = arith.constant 0 : index
      %c0_10 = arith.constant 0 : index
      %c0_11 = arith.constant 0 : index
      %14 = vector.load %arg8[%c0_9, %c0_10, %c0_11] : memref<2x128x64xf32, #tpu.memory_space<vmem>>, vector<1x128x64xf32>
      %15 = vector.shape_cast %14 : vector<1x128x64xf32> to vector<128x64xf32>
      %c1 = arith.constant 1 : index
      %c0_12 = arith.constant 0 : index
      %c0_13 = arith.constant 0 : index
      %16 = vector.load %arg8[%c1, %c0_12, %c0_13] : memref<2x128x64xf32, #tpu.memory_space<vmem>>, vector<1x128x64xf32>
      %17 = vector.shape_cast %16 : vector<1x128x64xf32> to vector<128x64xf32>
      %c0_14 = arith.constant 0 : index
      %c0_15 = arith.constant 0 : index
      %18 = vector.load %arg9[%c0_14, %c0_15] : memref<64x64xbf16, #tpu.memory_space<vmem>>, vector<64x64xbf16>
      %cst = arith.constant dense<0.000000e+00> : vector<128x64xf32>
      %19 = tpu.matmul %13, %18, %cst {dimension_numbers = #tpu.dot_dimension_numbers<[1], [0], [0], [1], [0, 0, 1, 1], [], []>} : vector<128x64xbf16>, vector<64x64xbf16>, vector<128x64xf32> -> vector<128x64xf32>
      %20 = arith.extf %13 : vector<128x64xbf16> to vector<128x64xf32>
      %21 = arith.mulf %20, %15 : vector<128x64xf32>
      %22 = arith.mulf %19, %17 : vector<128x64xf32>
      %23 = arith.addf %21, %22 : vector<128x64xf32>
      %24 = arith.truncf %23 : vector<128x64xf32> to vector<128x64xbf16>
      %c0_16 = arith.constant 0 : index
      %c0_17 = arith.constant 0 : index
      %25 = vector.load %arg11[%c0_16, %c0_17] : memref<128x64xbf16, #tpu.memory_space<vmem>>, vector<128x64xbf16>
      %cst_18 = arith.constant dense<0.000000e+00> : vector<128x128xf32>
      %26 = tpu.matmul %25, %24, %cst_18 {dimension_numbers = #tpu.dot_dimension_numbers<[1], [1], [0], [0], [0, 0, 1, 0], [], []>} : vector<128x64xbf16>, vector<128x64xbf16>, vector<128x128xf32> -> vector<128x128xf32>
      %c128_i32_19 = arith.constant 128 : i32
      %27 = arith.muli %arg2, %c128_i32_19 : i32
      %28 = tpu.iota {dimensions = array<i32: 0>} : vector<128x128xi32>
      %29 = vector.broadcast %27 : i32 to vector<128x128xi32>
      %30 = arith.addi %29, %28 : vector<128x128xi32>
      %c128_i32_20 = arith.constant 128 : i32
      %31 = arith.muli %arg3, %c128_i32_20 : i32
      %32 = tpu.iota {dimensions = array<i32: 1>} : vector<128x128xi32>
      %33 = vector.broadcast %31 : i32 to vector<128x128xi32>
      %34 = arith.addi %33, %32 : vector<128x128xi32>
      %35 = arith.cmpi sle, %34, %30 : vector<128x128xi32>
      %cst_21 = arith.constant -1.000000e+30 : f32
      %36 = vector.broadcast %cst_21 : f32 to vector<128x128xf32>
      %37 = arith.select %35, %26, %36 : vector<128x128xi1>, vector<128x128xf32>
      %c0_22 = arith.constant 0 : index
      %c0_23 = arith.constant 0 : index
      %38 = vector.load %arg12[%c0_22, %c0_23] : memref<128x1xf32, #tpu.memory_space<vmem>>, vector<128x1xf32>
      %cst_24 = arith.constant dense<0xFF800000> : vector<128xf32>
      %39 = vector.multi_reduction <maximumf>, %37, %cst_24 [1] : vector<128x128xf32> to vector<128xf32>
      %40 = vector.shape_cast %39 : vector<128xf32> to vector<128x1xf32>
      %41 = arith.maximumf %38, %40 : vector<128x1xf32>
      %42 = arith.subf %38, %41 : vector<128x1xf32>
      %43 = math.exp %42 : vector<128x1xf32>
      %44 = vector.broadcast %41 : vector<128x1xf32> to vector<128x128xf32>
      %45 = arith.subf %37, %44 : vector<128x128xf32>
      %46 = math.exp %45 : vector<128x128xf32>
      %cst_25 = arith.constant 0.000000e+00 : f32
      %47 = vector.broadcast %cst_25 : f32 to vector<128x128xf32>
      %48 = arith.select %35, %46, %47 : vector<128x128xi1>, vector<128x128xf32>
      %c0_26 = arith.constant 0 : index
      %c0_27 = arith.constant 0 : index
      %49 = vector.load %arg13[%c0_26, %c0_27] : memref<128x1xf32, #tpu.memory_space<vmem>>, vector<128x1xf32>
      %50 = arith.mulf %43, %49 : vector<128x1xf32>
      %cst_28 = arith.constant dense<0.000000e+00> : vector<128xf32>
      %51 = vector.multi_reduction <add>, %48, %cst_28 [1] : vector<128x128xf32> to vector<128xf32>
      %52 = vector.shape_cast %51 : vector<128xf32> to vector<128x1xf32>
      %53 = arith.addf %50, %52 : vector<128x1xf32>
      %c0_29 = arith.constant 0 : index
      %c0_30 = arith.constant 0 : index
      %54 = vector.load %arg13[%c0_29, %c0_30] : memref<128x1xf32, #tpu.memory_space<vmem>>, vector<128x1xf32>
      tpu.vector_store %arg13[%c0_29, %c0_30], %53 {strides = array<i32>} : memref<128x1xf32, #tpu.memory_space<vmem>>, vector<128x1xf32>,
      %c0_31 = arith.constant 0 : index
      %c0_32 = arith.constant 0 : index
      %55 = vector.load %arg14[%c0_31, %c0_32] : memref<128x64xf32, #tpu.memory_space<vmem>>, vector<128x64xf32>
      %56 = vector.broadcast %43 : vector<128x1xf32> to vector<128x64xf32>
      %57 = arith.mulf %56, %55 : vector<128x64xf32>
      %58 = arith.truncf %48 : vector<128x128xf32> to vector<128x128xbf16>
      %c0_33 = arith.constant 0 : index
      %c0_34 = arith.constant 0 : index
      %c0_35 = arith.constant 0 : index
      %c0_36 = arith.constant 0 : index
      %c0_37 = arith.constant 0 : index
      %59 = vector.load %arg6[%c0_33, %c0_34, %c0_35, %c0_36, %c0_37] : memref<1x1x1x128x64xbf16, #tpu.memory_space<vmem>>, vector<1x1x1x128x64xbf16>
      %60 = vector.shape_cast %59 : vector<1x1x1x128x64xbf16> to vector<128x64xbf16>
      %cst_38 = arith.constant dense<0.000000e+00> : vector<128x64xf32>
      %61 = tpu.matmul %58, %60, %cst_38 {dimension_numbers = #tpu.dot_dimension_numbers<[1], [0], [0], [1], [0, 0, 1, 1], [], []>} : vector<128x128xbf16>, vector<128x64xbf16>, vector<128x64xf32> -> vector<128x64xf32>
      %62 = arith.addf %57, %61 : vector<128x64xf32>
      %c0_39 = arith.constant 0 : index
      %c0_40 = arith.constant 0 : index
      %63 = vector.load %arg14[%c0_39, %c0_40] : memref<128x64xf32, #tpu.memory_space<vmem>>, vector<128x64xf32>
      tpu.vector_store %arg14[%c0_39, %c0_40], %62 {strides = array<i32>} : memref<128x64xf32, #tpu.memory_space<vmem>>, vector<128x64xf32>,
      %c0_41 = arith.constant 0 : index
      %c0_42 = arith.constant 0 : index
      %64 = vector.load %arg12[%c0_41, %c0_42] : memref<128x1xf32, #tpu.memory_space<vmem>>, vector<128x1xf32>
      tpu.vector_store %arg12[%c0_41, %c0_42], %41 {strides = array<i32>} : memref<128x1xf32, #tpu.memory_space<vmem>>, vector<128x1xf32>,
    } else {
    }
    %c1_i32_3 = arith.constant 1 : i32
    %9 = arith.cmpi eq, %arg3, %c1_i32_3 : i32
    %10 = arith.extui %9 : i1 to i32
    %c0_i32_4 = arith.constant 0 : i32
    %11 = arith.cmpi ne, %10, %c0_i32_4 : i32
    scf.if %11 {
      %c0 = arith.constant 0 : index
      %c0_5 = arith.constant 0 : index
      %12 = vector.load %arg14[%c0, %c0_5] : memref<128x64xf32, #tpu.memory_space<vmem>>, vector<128x64xf32>
      %c0_6 = arith.constant 0 : index
      %c0_7 = arith.constant 0 : index
      %13 = vector.load %arg13[%c0_6, %c0_7] : memref<128x1xf32, #tpu.memory_space<vmem>>, vector<128x1xf32>
      %14 = tpu.reciprocal %13 {approx = true} : vector<128x1xf32> -> vector<128x1xf32>
      %15 = vector.broadcast %14 : vector<128x1xf32> to vector<128x64xf32>
      %16 = arith.mulf %12, %15 : vector<128x64xf32>
      %17 = arith.truncf %16 : vector<128x64xf32> to vector<128x64xbf16>
      %c0_8 = arith.constant 0 : index
      %c0_9 = arith.constant 0 : index
      %c0_10 = arith.constant 0 : index
      %c0_11 = arith.constant 0 : index
      %18 = vector.load %arg10[%c0_8, %c0_9, %c0_10, %c0_11] : memref<1x1x128x64xbf16, #tpu.memory_space<vmem>>, vector<1x1x128x64xbf16>
      %19 = vector.shape_cast %18 : vector<1x1x128x64xbf16> to vector<128x64xbf16>
      %20 = vector.shape_cast %17 : vector<128x64xbf16> to vector<1x1x128x64xbf16>
      tpu.vector_store %arg10[%c0_8, %c0_9, %c0_10, %c0_11], %20 {strides = array<i32>} : memref<1x1x128x64xbf16, #tpu.memory_space<vmem>>, vector<1x1x128x64xbf16>,
    } else {
    }
    return
  }
  func.func @transform_0(%arg0: i32, %arg1: i32, %arg2: i32, %arg3: i32) -> (i32, i32, i32, i32, i32) {
    %c0_i32 = arith.constant 0 : i32
    %c0_i32_0 = arith.constant 0 : i32
    %c0_i32_1 = arith.constant 0 : i32
    return %c0_i32, %arg0, %arg1, %arg2, %c0_i32_0 : i32, i32, i32, i32, i32
  }
  func.func @transform_1(%arg0: i32, %arg1: i32, %arg2: i32, %arg3: i32) -> (i32, i32, i32, i32, i32) {
    %c1_i32 = arith.constant 1 : i32
    %c0_i32 = arith.constant 0 : i32
    %c0_i32_0 = arith.constant 0 : i32
    return %c1_i32, %arg0, %arg1, %arg3, %c0_i32 : i32, i32, i32, i32, i32
  }
  func.func @transform_2(%arg0: i32, %arg1: i32, %arg2: i32, %arg3: i32) -> (i32, i32, i32, i32, i32) {
    %c2_i32 = arith.constant 2 : i32
    %c0_i32 = arith.constant 0 : i32
    %c0_i32_0 = arith.constant 0 : i32
    return %c2_i32, %arg0, %arg1, %arg3, %c0_i32 : i32, i32, i32, i32, i32
  }
  func.func @transform_3(%arg0: i32, %arg1: i32, %arg2: i32, %arg3: i32) -> (i32, i32, i32) {
    %c0_i32 = arith.constant 0 : i32
    %c0_i32_0 = arith.constant 0 : i32
    %c0_i32_1 = arith.constant 0 : i32
    return %c0_i32, %arg2, %c0_i32_0 : i32, i32, i32
  }
  func.func @transform_4(%arg0: i32, %arg1: i32, %arg2: i32, %arg3: i32) -> (i32, i32, i32) {
    %c0_i32 = arith.constant 0 : i32
    %c0_i32_0 = arith.constant 0 : i32
    %c0_i32_1 = arith.constant 0 : i32
    return %c0_i32, %arg3, %c0_i32_0 : i32, i32, i32
  }
  func.func @transform_5(%arg0: i32, %arg1: i32, %arg2: i32, %arg3: i32) -> (i32, i32) {
    %c0_i32 = arith.constant 0 : i32
    %c0_i32_0 = arith.constant 0 : i32
    %c0_i32_1 = arith.constant 0 : i32
    return %c0_i32, %c0_i32_0 : i32, i32
  }
  func.func @transform_6(%arg0: i32, %arg1: i32, %arg2: i32, %arg3: i32) -> (i32, i32, i32, i32) {
    %c0_i32 = arith.constant 0 : i32
    %c0_i32_0 = arith.constant 0 : i32
    return %arg0, %arg1, %arg2, %c0_i32 : i32, i32, i32, i32
  }
}

module attributes {stable_mosaic.version = 11 : i64} {
  func.func @_linear_kernel(%arg0: i32, %arg1: i32, %arg2: i32, %arg3: memref<256x128xbf16, #tpu.memory_space<vmem>>, %arg4: memref<128x128xbf16, #tpu.memory_space<vmem>>, %arg5: memref<1x128xf32, #tpu.memory_space<vmem>>, %arg6: memref<256x128xf32, #tpu.memory_space<vmem>>, %arg7: memref<256x128xf32, #tpu.memory_space<vmem>>) attributes {dimension_semantics = [#tpu.dimension_semantics<parallel>, #tpu.dimension_semantics<parallel>, #tpu.dimension_semantics<arbitrary>], iteration_bounds = array<i64: 2, 3, 3>, scalar_prefetch = 0 : i64, scratch_operands = 1 : i64, tpu.core_type = #tpu.core_type<tc>, window_params = [{transform_indices = @transform_0, window_bounds = array<i64: 256, 128>}, {transform_indices = @transform_1, window_bounds = array<i64: 128, 128>}, {transform_indices = @transform_2, window_bounds = array<i64: 1, 128>}, {transform_indices = @transform_3, window_bounds = array<i64: 256, 128>}]} {
    %c0_i32 = arith.constant 0 : i32
    %0 = arith.cmpi eq, %arg2, %c0_i32 : i32
    %1 = arith.extui %0 : i1 to i32
    %c0_i32_0 = arith.constant 0 : i32
    %2 = arith.cmpi ne, %1, %c0_i32_0 : i32
    scf.if %2 {
      %cst_9 = arith.constant 0.000000e+00 : f32
      %12 = vector.broadcast %cst_9 : f32 to vector<256x128xf32>
      %c0_10 = arith.constant 0 : index
      %c0_11 = arith.constant 0 : index
      %13 = vector.load %arg7[%c0_10, %c0_11] : memref<256x128xf32, #tpu.memory_space<vmem>>, vector<256x128xf32>
      tpu.vector_store %arg7[%c0_10, %c0_11], %12 {strides = array<i32>} : memref<256x128xf32, #tpu.memory_space<vmem>>, vector<256x128xf32>,
    } else {
    }
    %c0 = arith.constant 0 : index
    %c0_1 = arith.constant 0 : index
    %3 = vector.load %arg7[%c0, %c0_1] : memref<256x128xf32, #tpu.memory_space<vmem>>, vector<256x128xf32>
    %c0_2 = arith.constant 0 : index
    %c0_3 = arith.constant 0 : index
    %4 = vector.load %arg3[%c0_2, %c0_3] : memref<256x128xbf16, #tpu.memory_space<vmem>>, vector<256x128xbf16>
    %c0_4 = arith.constant 0 : index
    %c0_5 = arith.constant 0 : index
    %5 = vector.load %arg4[%c0_4, %c0_5] : memref<128x128xbf16, #tpu.memory_space<vmem>>, vector<128x128xbf16>
    %cst = arith.constant dense<0.000000e+00> : vector<256x128xf32>
    %6 = tpu.matmul %4, %5, %cst {dimension_numbers = #tpu.dot_dimension_numbers<[1], [0], [0], [1], [0, 0, 1, 1], [], []>} : vector<256x128xbf16>, vector<128x128xbf16>, vector<256x128xf32> -> vector<256x128xf32>
    %7 = arith.addf %3, %6 : vector<256x128xf32>
    %c0_6 = arith.constant 0 : index
    %c0_7 = arith.constant 0 : index
    %8 = vector.load %arg7[%c0_6, %c0_7] : memref<256x128xf32, #tpu.memory_space<vmem>>, vector<256x128xf32>
    tpu.vector_store %arg7[%c0_6, %c0_7], %7 {strides = array<i32>} : memref<256x128xf32, #tpu.memory_space<vmem>>, vector<256x128xf32>,
    %c2_i32 = arith.constant 2 : i32
    %9 = arith.cmpi eq, %arg2, %c2_i32 : i32
    %10 = arith.extui %9 : i1 to i32
    %c0_i32_8 = arith.constant 0 : i32
    %11 = arith.cmpi ne, %10, %c0_i32_8 : i32
    scf.if %11 {
      %c0_9 = arith.constant 0 : index
      %c0_10 = arith.constant 0 : index
      %12 = vector.load %arg7[%c0_9, %c0_10] : memref<256x128xf32, #tpu.memory_space<vmem>>, vector<256x128xf32>
      %c0_11 = arith.constant 0 : index
      %c0_12 = arith.constant 0 : index
      %13 = vector.load %arg5[%c0_11, %c0_12] : memref<1x128xf32, #tpu.memory_space<vmem>>, vector<1x128xf32>
      %14 = vector.broadcast %13 : vector<1x128xf32> to vector<256x128xf32>
      %15 = arith.addf %12, %14 : vector<256x128xf32>
      %c0_13 = arith.constant 0 : index
      %c0_14 = arith.constant 0 : index
      %16 = vector.load %arg6[%c0_13, %c0_14] : memref<256x128xf32, #tpu.memory_space<vmem>>, vector<256x128xf32>
      tpu.vector_store %arg6[%c0_13, %c0_14], %15 {strides = array<i32>} : memref<256x128xf32, #tpu.memory_space<vmem>>, vector<256x128xf32>,
    } else {
    }
    return
  }
  func.func @transform_0(%arg0: i32, %arg1: i32, %arg2: i32) -> (i32, i32) {
    %c0_i32 = arith.constant 0 : i32
    return %arg0, %arg2 : i32, i32
  }
  func.func @transform_1(%arg0: i32, %arg1: i32, %arg2: i32) -> (i32, i32) {
    %c0_i32 = arith.constant 0 : i32
    return %arg2, %arg1 : i32, i32
  }
  func.func @transform_2(%arg0: i32, %arg1: i32, %arg2: i32) -> (i32, i32) {
    %c0_i32 = arith.constant 0 : i32
    %c0_i32_0 = arith.constant 0 : i32
    return %c0_i32, %arg1 : i32, i32
  }
  func.func @transform_3(%arg0: i32, %arg1: i32, %arg2: i32) -> (i32, i32) {
    %c0_i32 = arith.constant 0 : i32
    return %arg0, %arg1 : i32, i32
  }
}

</mosaic_0001>

<bundles_post_ra>
// kernel: forward.3
= control target key start
LH: loop header
LB: loop body
LE: loop exit
PB: predicated region body
PF: predicated region fallthrough
CT: control target
= control target key end

     0   :  { %s2270_s0 = inlined_call_operand.vmem [shape: bf16[512,384], index: 0, kind: input, shape index: {}]   ;;  %s2271_s1 = inlined_call_operand.vmem [shape: bf16[384,1152], index: 1, kind: input, shape index: {}]   ;;  %s2272_s2 = inlined_call_operand.vmem [shape: f32[1,1152], index: 2, kind: input, shape index: {}]   ;;  %s2273_s3 = inlined_call_operand.vmem [shape: bf16[512,1152], index: 3, kind: output, shape index: {}]  }
   0x1   :  { %2276 = sst [smem:[#allocation9_spill]] %s2270_s0 }
   0x2   :  { %2277 = sst [smem:[#allocation10_spill]] %s2271_s1 }
   0x3   :  { %2278 = sst [smem:[#allocation11_spill]] %s2273_s3 }
   0x4   :  { %s1833_s12 = smov 0   ;;  %s1835_s13 = smov 0  }
   0x5   :  { %s1837_s14 = smov 0   ;;  %s1839_s15 = smov 0  }
   0x6   :  { %s1841_s16 = smov 0   ;;  %s1843_s17 = smov 0  }
   0x7   :  { %s1845_s18 = smov 0   ;;  %s1847_s19 = smov 0  }
   0x8   :  { %s1849_s20 = smov 0   ;;  %s1851_s21 = smov 0  }
   0x9   :  { %s1853_s22 = smov 0   ;;  %s1855_s23 = smov 0  }
   0xa   :  { %s1857_s24 = smov 0  }
   0xb LB: > { %2279 = sst [smem:[#allocation6_spill]] %s1794_s20  ;;  %s25_s26 = sadd.s32 1, %s1798_s21  ;;  %s1810_s24 = sphi %s1857_s24, %s13_s24   ;;  %s1806_s23 = sphi %s1855_s23, %s2305_s23   ;;  %s1802_s22 = sphi %s1853_s22, %s2304_s22   ;;  %s1798_s21 = sphi %s1851_s21, %s2303_s21   ;;  %s1794_s20 = sphi %s1849_s20, %s2302_s20   ;;  %s1790_s19 = sphi %s1847_s19, %s2301_s19   ;;  %s1786_s18 = sphi %s1845_s18, %s2300_s18   ;;  %s1782_s17 = sphi %s1843_s17, %s2299_s17   ;;  %s1778_s16 = sphi %s1841_s16, %s2298_s16   ;;  %s1774_s15 = sphi %s1839_s15, %s2297_s15   ;;  %s1770_s14 = sphi %s1837_s14, %s2296_s14   ;;  %s1766_s13 = sphi %s1835_s13, %s2295_s13   ;;  %s1762_s12 = sphi %s1833_s12, %s2294_s12  }
   0xc   : > { %p26_p0 = scmp.ge.s32.totalorder %s25_s26, 3  ;;  %s28_s27 = sadd.s32 1, %s1802_s22 }
   0xd   : > { %s32_s28 = sadd.s32 1, %s1806_s23  ;;  %s41_s29 = sadd.s32 1, %s1782_s17 }
   0xe   : > { %s2307_s26 = smov (%p26_p0, %s25_s26), 0  ;;  %s2309_s27 = smov (!%p26_p0, %s28_s27), %s1802_s22 }
   0xf   : > { %2280 = sst [smem:[#allocation7_spill]] %s2307_s26  ;;  %s37_s30 = ssub.s32 %s1798_s21, %s2307_s26 }
  0x10   : > { %p48_p1 = scmp.ne.s32.totalorder %s1782_s17, %s1778_s16  ;;  %p30_p2 = scmp.ge.s32.totalorder %s2309_s27, 9 }
  0x11   : > { %p49_p3 = scmp.eq.s32.totalorder %s1810_s24, 0  ;;  %s69_s4 = sadd.s32 1, %s1774_s15 }
  0x12   : > { %p76_p4 = scmp.ne.s32.totalorder %s1774_s15, %s1770_s14  ;;  %s2311_s27 = smov (%p30_p2, %s2309_s27), 0 }
  0x13   : > { %2281 = sst [smem:[#allocation8_spill]] %s2311_s27  ;;  %s2313_s28 = smov (!%p30_p2, %s32_s28), %s1806_s23 }
  0x14   : > { %p1917_p5 = por %p49_p3, %p48_p1  ;;  %s65_s6 = ssub.s32 %s1802_s22, %s2311_s27 }
  0x15   : > { %p34_p6 = scmp.ge.s32.totalorder %s2313_s28, 2  ;;  %s66_s7 = sor.u32 %s65_s6, %s37_s30 }
  0x16   : > { %p67_p7 = scmp.eq.s32.totalorder %s66_s7, 0  ;;  %p1923_p8 = por %p76_p4, %p49_p3 }
  0x17   : > { %s2315_s28 = smov (%p34_p6, %s2313_s28), 0  ;;  %s123_s11 = sadd.s32 1, %s1766_s13 }
  0x18   : > { %s1930_s9 = scalar_select %p67_p7, %s1774_s15, %s69_s4  }
  0x19   : > { %s36_s10 = ssub.s32 %s1806_s23, %s2315_s28  ;;  %p133_p11 = scmp.ne.s32.totalorder %s1766_s13, %s1762_s12 }
  0x1a   : > { %s38_s25 = sor.u32 %s37_s30, %s36_s10  ;;  %s120_s26 = sor.u32 %s65_s6, %s36_s10 }
  0x1b   : > { %p39_p9 = scmp.eq.s32.totalorder %s38_s25, 0  ;;  %p121_p10 = scmp.eq.s32.totalorder %s120_s26, 0 }
  0x1c   : > { %s2284_s27 = sadd.s32 4294967295, %s1810_s24   ;;  %p1339_p0 = scmp.ge.s32.totalorder %s1810_s24, 54 }
  0x1d   : > { %p134_p12 = scmp.eq.s32.totalorder %s2284_s27, 53 }
  0x1e   : > { %s1940_s3 = scalar_select %p39_p9, %s1782_s17, %s41_s29  }
  0x1f   : > { %s1943_s7 = scalar_select %p121_p10, %s1766_s13, %s123_s11  }
  0x20   : > { %p1945_p13 = por %p134_p12, %p133_p11  ;;  %156 = sbr.rel (%p1339_p0) target bundleno = 105 (0x69), region = 16 }
  0x25   : > { %159 = sbr.rel (!%p1917_p5) target bundleno = 79 (0x4f), region = 20  ;;  %s161_s25 = sand.u32 (%p1917_p5), 1, %s1782_s17  }
  0x26   : > { %s1599_s26 = smul.u32 (%p1917_p5), 96, %s1806_s23  ;;  %s1340_s27 = sshll.u32 (%p1917_p5), %s161_s25, 7 }
  0x27   : > { %s2286_s0 = sld [smem:[#allocation9_spill]] (%p1917_p5)  ;;  %s1963_s5 = scalar_lea.vmem (%p1917_p5), [#allocation3], %s1340_s27 }
  0x28   : > { %s166_s29 = sadd.s32 (%p1917_p5), %s1798_s21, %s1599_s26 }
  0x29   : > { %s1343_s30 = sshll.u32 (%p1917_p5), %s166_s29, 2 }
  0x2d   : > { %s1958_s10 = scalar_lea.vmem %s2286_s0, %s1343_s30 }
  0x2e   : > { %v185_v0 = vld [vmem:[%s1958_s10] sm:$0xf]  ;;  %v187_v1 = vld [vmem:[%s1958_s10 + $0xc] sm:$0xf]  ;;  %v189_v2 = vld [vmem:[%s1958_s10 + $0x18] sm:$0xf] }
  0x2f   : > { %186 = vst [vmem:[%s1963_s5] sm:$0xf] %v185_v0  ;;  %v191_v3 = vld [vmem:[%s1958_s10 + $0x24] sm:$0xf]  ;;  %v193_v4 = vld [vmem:[%s1958_s10 + $0x30] sm:$0xf] }
  0x30   : > { %188 = vst [vmem:[%s1963_s5 + $0x4] sm:$0xf] %v187_v1  ;;  %v195_v5 = vld [vmem:[%s1958_s10 + $0x3c] sm:$0xf]  ;;  %v197_v6 = vld [vmem:[%s1958_s10 + $0x48] sm:$0xf] }
  0x31   : > { %190 = vst [vmem:[%s1963_s5 + $0x8] sm:$0xf] %v189_v2  ;;  %v199_v7 = vld [vmem:[%s1958_s10 + $0x54] sm:$0xf]  ;;  %v201_v8 = vld [vmem:[%s1958_s10 + $0x60] sm:$0xf] }
  0x32   : > { %192 = vst [vmem:[%s1963_s5 + $0xc] sm:$0xf] %v191_v3  ;;  %v203_v9 = vld [vmem:[%s1958_s10 + $0x6c] sm:$0xf]  ;;  %v205_v10 = vld [vmem:[%s1958_s10 + $0x78] sm:$0xf] }
  0x33   : > { %194 = vst [vmem:[%s1963_s5 + $0x10] sm:$0xf] %v193_v4  ;;  %v207_v11 = vld [vmem:[%s1958_s10 + $0x84] sm:$0xf]  ;;  %v209_v12 = vld [vmem:[%s1958_s10 + $0x90] sm:$0xf] }
  0x34   : > { %196 = vst [vmem:[%s1963_s5 + $0x14] sm:$0xf] %v195_v5  ;;  %v211_v13 = vld [vmem:[%s1958_s10 + $0x9c] sm:$0xf]  ;;  %v213_v14 = vld [vmem:[%s1958_s10 + $0xa8] sm:$0xf] }
  0x35   : > { %198 = vst [vmem:[%s1963_s5 + $0x18] sm:$0xf] %v197_v6  ;;  %v215_v15 = vld [vmem:[%s1958_s10 + $0xb4] sm:$0xf]  ;;  %v217_v16 = vld [vmem:[%s1958_s10 + $0xc0] sm:$0xf] }
  0x36   : > { %200 = vst [vmem:[%s1963_s5 + $0x1c] sm:$0xf] %v199_v7  ;;  %v219_v17 = vld [vmem:[%s1958_s10 + $0xcc] sm:$0xf]  ;;  %v221_v18 = vld [vmem:[%s1958_s10 + $0xd8] sm:$0xf] }
  0x37   : > { %202 = vst [vmem:[%s1963_s5 + $0x20] sm:$0xf] %v201_v8  ;;  %v223_v19 = vld [vmem:[%s1958_s10 + $0xe4] sm:$0xf]  ;;  %v225_v20 = vld [vmem:[%s1958_s10 + $0xf0] sm:$0xf] }
  0x38   : > { %204 = vst [vmem:[%s1963_s5 + $0x24] sm:$0xf] %v203_v9  ;;  %v227_v21 = vld [vmem:[%s1958_s10 + $0xfc] sm:$0xf]  ;;  %v229_v22 = vld [vmem:[%s1958_s10 + $0x108] sm:$0xf] }
  0x39   : > { %206 = vst [vmem:[%s1963_s5 + $0x28] sm:$0xf] %v205_v10  ;;  %v231_v23 = vld [vmem:[%s1958_s10 + $0x114] sm:$0xf]  ;;  %v233_v24 = vld [vmem:[%s1958_s10 + $0x120] sm:$0xf] }
  0x3a   : > { %208 = vst [vmem:[%s1963_s5 + $0x2c] sm:$0xf] %v207_v11  ;;  %v235_v25 = vld [vmem:[%s1958_s10 + $0x12c] sm:$0xf]  ;;  %v237_v26 = vld [vmem:[%s1958_s10 + $0x138] sm:$0xf] }
  0x3b   : > { %210 = vst [vmem:[%s1963_s5 + $0x30] sm:$0xf] %v209_v12  ;;  %v239_v27 = vld [vmem:[%s1958_s10 + $0x144] sm:$0xf]  ;;  %v241_v28 = vld [vmem:[%s1958_s10 + $0x150] sm:$0xf] }
  0x3c   : > { %212 = vst [vmem:[%s1963_s5 + $0x34] sm:$0xf] %v211_v13  ;;  %v243_v29 = vld [vmem:[%s1958_s10 + $0x15c] sm:$0xf]  ;;  %v245_v30 = vld [vmem:[%s1958_s10 + $0x168] sm:$0xf] }
  0x3d   : > { %214 = vst [vmem:[%s1963_s5 + $0x38] sm:$0xf] %v213_v14  ;;  %v247_v31 = vld [vmem:[%s1958_s10 + $0x174] sm:$0xf] }
  0x3e   : > { %216 = vst [vmem:[%s1963_s5 + $0x3c] sm:$0xf] %v215_v15 }
  0x3f   : > { %218 = vst [vmem:[%s1963_s5 + $0x40] sm:$0xf] %v217_v16 }
  0x40   : > { %220 = vst [vmem:[%s1963_s5 + $0x44] sm:$0xf] %v219_v17 }
  0x41   : > { %222 = vst [vmem:[%s1963_s5 + $0x48] sm:$0xf] %v221_v18 }
  0x42   : > { %224 = vst [vmem:[%s1963_s5 + $0x4c] sm:$0xf] %v223_v19 }
  0x43   : > { %226 = vst [vmem:[%s1963_s5 + $0x50] sm:$0xf] %v225_v20 }
  0x44   : > { %228 = vst [vmem:[%s1963_s5 + $0x54] sm:$0xf] %v227_v21 }
  0x45   : > { %230 = vst [vmem:[%s1963_s5 + $0x58] sm:$0xf] %v229_v22 }
  0x46   : > { %232 = vst [vmem:[%s1963_s5 + $0x5c] sm:$0xf] %v231_v23 }
  0x47   : > { %234 = vst [vmem:[%s1963_s5 + $0x60] sm:$0xf] %v233_v24 }
  0x48   : > { %236 = vst [vmem:[%s1963_s5 + $0x64] sm:$0xf] %v235_v25 }
  0x49   : > { %238 = vst [vmem:[%s1963_s5 + $0x68] sm:$0xf] %v237_v26 }
  0x4a   : > { %240 = vst [vmem:[%s1963_s5 + $0x6c] sm:$0xf] %v239_v27 }
  0x4b   : > { %242 = vst [vmem:[%s1963_s5 + $0x70] sm:$0xf] %v241_v28 }
  0x4c   : > { %244 = vst [vmem:[%s1963_s5 + $0x74] sm:$0xf] %v243_v29 }
  0x4d   : > { %246 = vst [vmem:[%s1963_s5 + $0x78] sm:$0xf] %v245_v30 }
  0x4e   : > { %248 = vst [vmem:[%s1963_s5 + $0x7c] sm:$0xf] %v247_v31 }
  0x4f PF: > { %336 = sbr.rel (!%p1923_p8) target bundleno = 105 (0x69), region = 61  ;;  %s338_s11 = sand.u32 (%p1923_p8), 1, %s1774_s15  }
  0x50   : > { %s1600_s25 = smul.u32 (%p1923_p8), 144, %s1798_s21  ;;  %s1344_s26 = sshll.u32 (%p1923_p8), %s338_s11, 6 }
  0x51   : > { %s2287_s1 = sld [smem:[#allocation10_spill]] (%p1923_p8)  ;;  %s340_s8 = scalar_lea.vmem (%p1923_p8), [#allocation4], %s1344_s26 }
  0x52   : > { %s343_s27 = sadd.s32 (%p1923_p8), %s1802_s22, %s1600_s25 }
  0x53   : > { %s1347_s29 = sshll.u32 (%p1923_p8), %s343_s27, 2 }
  0x57   : > { %s2034_s6 = scalar_lea.vmem %s2287_s1, %s1347_s29 }
  0x58   : > { %v362_v32 = vld [vmem:[%s2034_s6] sm:$0xf]  ;;  %v364_v33 = vld [vmem:[%s2034_s6 + $0x24] sm:$0xf]  ;;  %v366_v34 = vld [vmem:[%s2034_s6 + $0x48] sm:$0xf] }
  0x59   : > { %363 = vst [vmem:[%s340_s8] sm:$0xf] %v362_v32  ;;  %v368_v35 = vld [vmem:[%s2034_s6 + $0x6c] sm:$0xf]  ;;  %v370_v36 = vld [vmem:[%s2034_s6 + $0x90] sm:$0xf] }
  0x5a   : > { %365 = vst [vmem:[%s340_s8 + $0x4] sm:$0xf] %v364_v33  ;;  %v372_v37 = vld [vmem:[%s2034_s6 + $0xb4] sm:$0xf]  ;;  %v374_v38 = vld [vmem:[%s2034_s6 + $0xd8] sm:$0xf] }
  0x5b   : > { %367 = vst [vmem:[%s340_s8 + $0x8] sm:$0xf] %v366_v34  ;;  %v376_v39 = vld [vmem:[%s2034_s6 + $0xfc] sm:$0xf]  ;;  %v378_v40 = vld [vmem:[%s2034_s6 + $0x120] sm:$0xf] }
  0x5c   : > { %369 = vst [vmem:[%s340_s8 + $0xc] sm:$0xf] %v368_v35  ;;  %v380_v41 = vld [vmem:[%s2034_s6 + $0x144] sm:$0xf]  ;;  %v382_v42 = vld [vmem:[%s2034_s6 + $0x168] sm:$0xf] }
  0x5d   : > { %371 = vst [vmem:[%s340_s8 + $0x10] sm:$0xf] %v370_v36  ;;  %v384_v43 = vld [vmem:[%s2034_s6 + $0x18c] sm:$0xf]  ;;  %v386_v44 = vld [vmem:[%s2034_s6 + $0x1b0] sm:$0xf] }
  0x5e   : > { %373 = vst [vmem:[%s340_s8 + $0x14] sm:$0xf] %v372_v37  ;;  %v388_v45 = vld [vmem:[%s2034_s6 + $0x1d4] sm:$0xf]  ;;  %v390_v46 = vld [vmem:[%s2034_s6 + $0x1f8] sm:$0xf] }
  0x5f   : > { %375 = vst [vmem:[%s340_s8 + $0x18] sm:$0xf] %v374_v38  ;;  %v392_v47 = vld [vmem:[%s2034_s6 + $0x21c] sm:$0xf] }
  0x60   : > { %377 = vst [vmem:[%s340_s8 + $0x1c] sm:$0xf] %v376_v39 }
  0x61   : > { %379 = vst [vmem:[%s340_s8 + $0x20] sm:$0xf] %v378_v40 }
  0x62   : > { %381 = vst [vmem:[%s340_s8 + $0x24] sm:$0xf] %v380_v41 }
  0x63   : > { %383 = vst [vmem:[%s340_s8 + $0x28] sm:$0xf] %v382_v42 }
  0x64   : > { %385 = vst [vmem:[%s340_s8 + $0x2c] sm:$0xf] %v384_v43 }
  0x65   : > { %387 = vst [vmem:[%s340_s8 + $0x30] sm:$0xf] %v386_v44 }
  0x66   : > { %389 = vst [vmem:[%s340_s8 + $0x34] sm:$0xf] %v388_v45 }
  0x67   : > { %391 = vst [vmem:[%s340_s8 + $0x38] sm:$0xf] %v390_v46 }
  0x68   : > { %393 = vst [vmem:[%s340_s8 + $0x3c] sm:$0xf] %v392_v47 }
  0x69 PF: > { %p1348_p1 = scmp.ge.s32.totalorder %s1810_s24, 1  ;;  %p454_p2 = scmp.lt.s32.totalorder %s1810_s24, 55 }
  0x6b   : > { %p455_p3 = pnand %p1348_p1, %p454_p2 }
  0x6c   : > { %s461_s10 = sand.u32 (!%p455_p3), 1, %s1778_s16   ;;  %s468_s5 = sand.u32 (!%p455_p3), 1, %s1770_s14  }
  0x6d   : > { %458 = sbr.rel (%p455_p3) target bundleno = 443 (0x1bb), region = 106  ;;  %s1349_s11 = sshll.u32 (!%p455_p3), %s461_s10, 7 }
  0x6e   : > { %s1350_s25 = sshll.u32 (!%p455_p3), %s468_s5, 6  ;;  %s494_s26 = sand.u32 (!%p455_p3), 1, %s1762_s12  }
  0x6f   : > { %p499_p4 = scmp.lt.s32.totalorder (!%p455_p3), %s1790_s19, 8  ;;  %s1351_s27 = sshll.u32 (!%p455_p3), %s494_s26, 7 }
  0x70   : > { %s2065_s8 = scalar_lea.vmem (!%p455_p3), [#allocation3], %s1349_s11  ;;  %s2067_s0 = scalar_lea.vmem (!%p455_p3), [#allocation4], %s1350_s25 }
  0x71   : > { %s2069_s1 = scalar_lea.vmem (!%p455_p3), [#allocation5], %s1351_s27  ;;  %p1352_p5 = scmp.ne.s32.totalorder (!%p455_p3), %s1786_s18, 0 }
  0x72   : > { %s2059_s29 = scalar_select %p499_p4, %s1790_s19, 8 }
  0x73   : > { %506 = sbr.rel (%p1352_p5) target bundleno = 153 (0x99), region = 118 }
  0x74   : > { %s501_s6 = scalar_lea.vmem %s2272_s2, %s2059_s29 }
  0x78   : > { %v1812_v48 = vmov 0.0  }
  0x79   : > { %507 = vst [vmem:[#allocation2 + $0xb0] sm:$0xff] %v1812_v48 }
  0x7a   : > { %508 = vst [vmem:[#allocation2] sm:$0xff] %v1812_v48 }
  0x7b   : > { %509 = vst [vmem:[#allocation2 + $0xd8] sm:$0xff] %v1812_v48 }
  0x7c   : > { %510 = vst [vmem:[#allocation2 + $0x18] sm:$0xff] %v1812_v48 }
  0x7d   : > { %511 = vst [vmem:[#allocation2 + $0x50] sm:$0xff] %v1812_v48 }
  0x7e   : > { %512 = vst [vmem:[#allocation2 + $0x68] sm:$0xff] %v1812_v48 }
  0x7f   : > { %513 = vst [vmem:[#allocation2 + $0x30] sm:$0xff] %v1812_v48 }
  0x80   : > { %514 = vst [vmem:[#allocation2 + $0x48] sm:$0xff] %v1812_v48 }
  0x81   : > { %515 = vst [vmem:[#allocation2 + $0x80] sm:$0xff] %v1812_v48 }
  0x82   : > { %516 = vst [vmem:[#allocation2 + $0x88] sm:$0xff] %v1812_v48 }
  0x83   : > { %517 = vst [vmem:[#allocation2 + $0xe8] sm:$0xff] %v1812_v48 }
  0x84   : > { %518 = vst [vmem:[#allocation2 + $0xb8] sm:$0xff] %v1812_v48 }
  0x85   : > { %519 = vst [vmem:[#allocation2 + $0x60] sm:$0xff] %v1812_v48 }
  0x86   : > { %520 = vst [vmem:[#allocation2 + $0xf0] sm:$0xff] %v1812_v48 }
  0x87   : > { %521 = vst [vmem:[#allocation2 + $0x8] sm:$0xff] %v1812_v48 }
  0x88   : > { %522 = vst [vmem:[#allocation2 + $0x78] sm:$0xff] %v1812_v48 }
  0x89   : > { %523 = vst [vmem:[#allocation2 + $0x38] sm:$0xff] %v1812_v48 }
  0x8a   : > { %524 = vst [vmem:[#allocation2 + $0x58] sm:$0xff] %v1812_v48 }
  0x8b   : > { %525 = vst [vmem:[#allocation2 + $0x40] sm:$0xff] %v1812_v48 }
  0x8c   : > { %526 = vst [vmem:[#allocation2 + $0xc8] sm:$0xff] %v1812_v48 }
  0x8d   : > { %527 = vst [vmem:[#allocation2 + $0xe0] sm:$0xff] %v1812_v48 }
  0x8e   : > { %528 = vst [vmem:[#allocation2 + $0x90] sm:$0xff] %v1812_v48 }
  0x8f   : > { %529 = vst [vmem:[#allocation2 + $0x70] sm:$0xff] %v1812_v48 }
  0x90   : > { %530 = vst [vmem:[#allocation2 + $0xc0] sm:$0xff] %v1812_v48 }
  0x91   : > { %531 = vst [vmem:[#allocation2 + $0xa8] sm:$0xff] %v1812_v48 }
  0x92   : > { %532 = vst [vmem:[#allocation2 + $0xd0] sm:$0xff] %v1812_v48 }
  0x93   : > { %533 = vst [vmem:[#allocation2 + $0x10] sm:$0xff] %v1812_v48 }
  0x94   : > { %534 = vst [vmem:[#allocation2 + $0x28] sm:$0xff] %v1812_v48 }
  0x95   : > { %535 = vst [vmem:[#allocation2 + $0xa0] sm:$0xff] %v1812_v48 }
  0x96   : > { %536 = vst [vmem:[#allocation2 + $0xf8] sm:$0xff] %v1812_v48 }
  0x97   : > { %537 = vst [vmem:[#allocation2 + $0x20] sm:$0xff] %v1812_v48 }
  0x98   : > { %538 = vst [vmem:[#allocation2 + $0x98] sm:$0xff] %v1812_v48 }
  0x99 PF: > { %v1479_v49 = vld [vmem:[%s2067_s0 + $0x38] sm:$0xff]  ;;  %v1478_v50 = vld [vmem:[%s2067_s0 + $0x30] sm:$0xff]  ;;  %v1477_v51 = vld [vmem:[%s2067_s0 + $0x28] sm:$0xff]  ;;  %p1449_p6 = scmp.ne.s32.totalorder %s1786_s18, 2 }
  0x9a   : > { %763 = vmatpush.bf16.msra.mxu0 %v1479_v49  ;;  %1575 = vmatpush.bf16.msra.mxu1 %v1479_v49  ;;  %v1476_v52 = vld [vmem:[%s2067_s0 + $0x20] sm:$0xff]  ;;  %v1475_v53 = vld [vmem:[%s2067_s0 + $0x18] sm:$0xff]  ;;  %v1474_v54 = vld [vmem:[%s2067_s0 + $0x10] sm:$0xff] }
  0x9b   : > { %1576 = vmatpush.bf16.msra.mxu2 %v1479_v49  ;;  %1577 = vmatpush.bf16.msra.mxu3 %v1479_v49  ;;  %v1473_v55 = vld [vmem:[%s2067_s0 + $0x8] sm:$0xff]  ;;  %v1472_v56 = vld [vmem:[%s2067_s0] sm:$0xff]  ;;  %v1458_v1 = vld [vmem:[%s2065_s8 + $0x10] sm:$0xff] }
  0x9c   : > { %v1456_v57 = vld [vmem:[%s2065_s8] sm:$0xff]  ;;  %v1457_v61 = vld [vmem:[%s2065_s8 + $0x8] sm:$0xff]  ;;  %v1462_v2 = vld [vmem:[%s2065_s8 + $0x30] sm:$0xff] }
  0x9d   : > { %v1460_v58 = vld [vmem:[%s2065_s8 + $0x20] sm:$0xff]  ;;  %v1461_v62 = vld [vmem:[%s2065_s8 + $0x28] sm:$0xff]  ;;  %v1466_v3 = vld [vmem:[%s2065_s8 + $0x50] sm:$0xff] }
  0x9e   : > { %764 = vmatpush.bf16.msra.mxu0 %v1478_v50  ;;  %1578 = vmatpush.bf16.msra.mxu1 %v1478_v50  ;;  %v1464_v59 = vld [vmem:[%s2065_s8 + $0x40] sm:$0xff]  ;;  %v1465_v63 = vld [vmem:[%s2065_s8 + $0x48] sm:$0xff]  ;;  %v1470_v4 = vld [vmem:[%s2065_s8 + $0x70] sm:$0xff] }
  0x9f   : > { %1579 = vmatpush.bf16.msra.mxu2 %v1478_v50  ;;  %1580 = vmatpush.bf16.msra.mxu3 %v1478_v50  ;;  %v1468_v60 = vld [vmem:[%s2065_s8 + $0x60] sm:$0xff]  ;;  %v1469_v0 = vld [vmem:[%s2065_s8 + $0x68] sm:$0xff]  ;;  %v1459_v5 = vld [vmem:[%s2065_s8 + $0x18] sm:$0xff] }
  0xa0   : > { %v1463_v6 = vld [vmem:[%s2065_s8 + $0x38] sm:$0xff]  ;;  %v539_v9 = vld [vmem:[#allocation2 + $0xb0] sm:$0xff]  ;;  %v547_v10 = vld [vmem:[#allocation2 + $0x80] sm:$0xff] }
  0xa1   : > { %v1467_v7 = vld [vmem:[%s2065_s8 + $0x58] sm:$0xff]  ;;  %v563_v16 = vld [vmem:[#allocation2 + $0xa8] sm:$0xff]  ;;  %v540_v17 = vld [vmem:[#allocation2] sm:$0xff] }
  0xa2   : > { %765 = vmatpush.bf16.msra.mxu0 %v1477_v51  ;;  %1581 = vmatpush.bf16.msra.mxu1 %v1477_v51  ;;  %v1471_v8 = vld [vmem:[%s2065_s8 + $0x78] sm:$0xff]  ;;  %v548_v18 = vld [vmem:[#allocation2 + $0x88] sm:$0xff]  ;;  %v564_v28 = vld [vmem:[#allocation2 + $0xd0] sm:$0xff] }
  0xa3   : > { %1582 = vmatpush.bf16.msra.mxu2 %v1477_v51  ;;  %1583 = vmatpush.bf16.msra.mxu3 %v1477_v51  ;;  %v555_v15 = vld [vmem:[#allocation2 + $0x38] sm:$0xff]  ;;  %v549_v30 = vld [vmem:[#allocation2 + $0xe8] sm:$0xff]  ;;  %v557_v39 = vld [vmem:[#allocation2 + $0x40] sm:$0xff] }
  0xa4   : > { %v556_v27 = vld [vmem:[#allocation2 + $0x58] sm:$0xff]  ;;  %v565_v40 = vld [vmem:[#allocation2 + $0x10] sm:$0xff]  ;;  %v558_v51 = vld [vmem:[#allocation2 + $0xc8] sm:$0xff] }
  0xa5   : > { %v541_v29 = vld [vmem:[#allocation2 + $0xd8] sm:$0xff] }
  0xa6   : > { %766 = vmatpush.bf16.msra.mxu0 %v1476_v52  ;;  %1584 = vmatpush.bf16.msra.mxu1 %v1476_v52  ;;  %v542_v41 = vld [vmem:[#allocation2 + $0x18] sm:$0xff] }
  0xa7   : > { %1585 = vmatpush.bf16.msra.mxu2 %v1476_v52  ;;  %1586 = vmatpush.bf16.msra.mxu3 %v1476_v52  ;;  %v550_v42 = vld [vmem:[#allocation2 + $0xb8] sm:$0xff]  ;;  %v566_v52 = vld [vmem:[#allocation2 + $0x28] sm:$0xff] }
  0xaa   : > { %767 = vmatpush.bf16.msra.mxu0 %v1475_v53  ;;  %1587 = vmatpush.bf16.msra.mxu1 %v1475_v53 }
  0xab   : > { %1588 = vmatpush.bf16.msra.mxu2 %v1475_v53  ;;  %1589 = vmatpush.bf16.msra.mxu3 %v1475_v53  ;;  %v543_v53 = vld [vmem:[#allocation2 + $0x50] sm:$0xff] }
  0xae   : > { %768 = vmatpush.bf16.msra.mxu0 %v1474_v54  ;;  %1590 = vmatpush.bf16.msra.mxu1 %v1474_v54 }
  0xaf   : > { %1591 = vmatpush.bf16.msra.mxu2 %v1474_v54  ;;  %1592 = vmatpush.bf16.msra.mxu3 %v1474_v54  ;;  %v551_v54 = vld [vmem:[#allocation2 + $0x60] sm:$0xff] }
  0xb2   : > { %769 = vmatpush.bf16.msra.mxu0 %v1473_v55  ;;  %1593 = vmatpush.bf16.msra.mxu1 %v1473_v55 }
  0xb3   : > { %1594 = vmatpush.bf16.msra.mxu2 %v1473_v55  ;;  %1595 = vmatpush.bf16.msra.mxu3 %v1473_v55 }
  0xb6   : > { %770 = vmatpush.bf16.msra.mxu0 %v1472_v56  ;;  %1596 = vmatpush.bf16.msra.mxu1 %v1472_v56 }
  0xb7   : > { %1597 = vmatpush.bf16.msra.mxu2 %v1472_v56  ;;  %1598 = vmatpush.bf16.msra.mxu3 %v1472_v56 }
  0xb9   : > { %771 = vmatmul.bf16.vlgmr.msra.gmra.mxu0 %v1456_v57  ;;  %791 = vmatmul.bf16.vlgmr.msra.gmra.mxu1 %v1460_v58 }
  0xba   : > { %811 = vmatmul.bf16.vlgmr.msra.gmra.mxu2 %v1464_v59  ;;  %831 = vmatmul.bf16.vlgmr.msra.gmra.mxu3 %v1468_v60 }
  0xc9   : > { %776 = vmatmul.bf16.gmra.mxu0 %v1457_v61  ;;  %796 = vmatmul.bf16.gmra.mxu1 %v1461_v62 }
  0xca   : > { %816 = vmatmul.bf16.gmra.mxu2 %v1465_v63  ;;  %836 = vmatmul.bf16.gmra.mxu3 %v1469_v0  ;;  %v559_v63 = vld [vmem:[#allocation2 + $0xe0] sm:$0xff] }
  0xcb   : > { %v567_v0 = vld [vmem:[#allocation2 + $0xa0] sm:$0xff] }
  0xd9   : > { %781 = vmatmul.bf16.gmra.mxu0 %v1458_v1  ;;  %801 = vmatmul.bf16.gmra.mxu1 %v1462_v2  ;;  %v544_v1 = vld [vmem:[#allocation2 + $0x68] sm:$0xff]  ;;  %v552_v2 = vld [vmem:[#allocation2 + $0xf0] sm:$0xff] }
  0xda   : > { %821 = vmatmul.bf16.gmra.mxu2 %v1466_v3  ;;  %841 = vmatmul.bf16.gmra.mxu3 %v1470_v4 }
  0xe9   : > { %786 = vmatmul.bf16.gmra.mxu0 %v1459_v5  ;;  %806 = vmatmul.bf16.gmra.mxu1 %v1463_v6 }
  0xea   : > { %826 = vmatmul.bf16.gmra.mxu2 %v1467_v7  ;;  %846 = vmatmul.bf16.gmra.mxu3 %v1471_v8 }
 0x136   : > { %v772_v11 = vpop.f32.mrf.mxu0  ;;  %v792_v12 = vpop.f32.mrf.mxu1 }
 0x137   : > { %v852_v13 = vadd.f32 %v772_v11, %v539_v9  ;;  %v860_v14 = vadd.f32 %v792_v12, %v547_v10  ;;  %v560_v11 = vld [vmem:[#allocation2 + $0x90] sm:$0xff]  ;;  %v568_v12 = vld [vmem:[#allocation2 + $0xf8] sm:$0xff] }
 0x139   : > { %884 = vst [vmem:[#allocation2 + $0xb0] sm:$0xff] %v852_v13  ;;  %v545_v13 = vld [vmem:[#allocation2 + $0x30] sm:$0xff] }
 0x13a   : > { %892 = vst [vmem:[#allocation2 + $0x80] sm:$0xff] %v860_v14  ;;  %v553_v14 = vld [vmem:[#allocation2 + $0x8] sm:$0xff] }
 0x13d   : > { %v812_v19 = vpop.f32.mrf.mxu2  ;;  %v832_v20 = vpop.f32.mrf.mxu3 }
 0x13e   : > { %v868_v21 = vadd.f32 %v812_v19, %v555_v15  ;;  %v876_v22 = vadd.f32 %v832_v20, %v563_v16  ;;  %v774_v23 = vpop.f32.mrf.mxu0  ;;  %v794_v24 = vpop.f32.mrf.mxu1 }
 0x13f   : > { %v853_v25 = vadd.f32 %v774_v23, %v540_v17  ;;  %v861_v26 = vadd.f32 %v794_v24, %v548_v18  ;;  %v561_v23 = vld [vmem:[#allocation2 + $0x70] sm:$0xff]  ;;  %v569_v24 = vld [vmem:[#allocation2 + $0x20] sm:$0xff] }
 0x140   : > { %900 = vst [vmem:[#allocation2 + $0x38] sm:$0xff] %v868_v21 }
 0x141   : > { %908 = vst [vmem:[#allocation2 + $0xa8] sm:$0xff] %v876_v22 }
 0x142   : > { %885 = vst [vmem:[#allocation2] sm:$0xff] %v853_v25  ;;  %v546_v25 = vld [vmem:[#allocation2 + $0x48] sm:$0xff] }
 0x143   : > { %893 = vst [vmem:[#allocation2 + $0x88] sm:$0xff] %v861_v26  ;;  %v554_v26 = vld [vmem:[#allocation2 + $0x78] sm:$0xff] }
 0x145   : > { %v814_v31 = vpop.f32.mrf.mxu2  ;;  %v834_v32 = vpop.f32.mrf.mxu3 }
 0x146   : > { %v869_v33 = vadd.f32 %v814_v31, %v556_v27  ;;  %v877_v34 = vadd.f32 %v834_v32, %v564_v28  ;;  %v777_v35 = vpop.f32.mrf.mxu0  ;;  %v797_v36 = vpop.f32.mrf.mxu1 }
 0x147   : > { %v854_v37 = vadd.f32 %v777_v35, %v541_v29  ;;  %v862_v38 = vadd.f32 %v797_v36, %v549_v30  ;;  %v562_v35 = vld [vmem:[#allocation2 + $0xc0] sm:$0xff]  ;;  %v570_v36 = vld [vmem:[#allocation2 + $0x98] sm:$0xff] }
 0x148   : > { %901 = vst [vmem:[#allocation2 + $0x58] sm:$0xff] %v869_v33 }
 0x149   : > { %909 = vst [vmem:[#allocation2 + $0xd0] sm:$0xff] %v877_v34 }
 0x14a   : > { %886 = vst [vmem:[#allocation2 + $0xd8] sm:$0xff] %v854_v37 }
 0x14b   : > { %894 = vst [vmem:[#allocation2 + $0xe8] sm:$0xff] %v862_v38 }
 0x14d   : > { %v817_v43 = vpop.f32.mrf.mxu2  ;;  %v837_v44 = vpop.f32.mrf.mxu3 }
 0x14e   : > { %v870_v45 = vadd.f32 %v817_v43, %v557_v39  ;;  %v878_v46 = vadd.f32 %v837_v44, %v565_v40  ;;  %v779_v47 = vpop.f32.mrf.mxu0  ;;  %v799_v48 = vpop.f32.mrf.mxu1 }
 0x14f   : > { %v855_v49 = vadd.f32 %v779_v47, %v542_v41  ;;  %v863_v50 = vadd.f32 %v799_v48, %v550_v42 }
 0x150   : > { %902 = vst [vmem:[#allocation2 + $0x40] sm:$0xff] %v870_v45 }
 0x151   : > { %910 = vst [vmem:[#allocation2 + $0x10] sm:$0xff] %v878_v46 }
 0x152   : > { %887 = vst [vmem:[#allocation2 + $0x18] sm:$0xff] %v855_v49 }
 0x153   : > { %895 = vst [vmem:[#allocation2 + $0xb8] sm:$0xff] %v863_v50 }
 0x155   : > { %v819_v55 = vpop.f32.mrf.mxu2  ;;  %v839_v56 = vpop.f32.mrf.mxu3 }
 0x156   : > { %v871_v57 = vadd.f32 %v819_v55, %v558_v51  ;;  %v879_v58 = vadd.f32 %v839_v56, %v566_v52  ;;  %v782_v59 = vpop.f32.mrf.mxu0  ;;  %v802_v60 = vpop.f32.mrf.mxu1 }
 0x157   : > { %v856_v61 = vadd.f32 %v782_v59, %v543_v53  ;;  %v864_v62 = vadd.f32 %v802_v60, %v551_v54 }
 0x158   : > { %903 = vst [vmem:[#allocation2 + $0xc8] sm:$0xff] %v871_v57 }
 0x159   : > { %911 = vst [vmem:[#allocation2 + $0x28] sm:$0xff] %v879_v58 }
 0x15a   : > { %888 = vst [vmem:[#allocation2 + $0x50] sm:$0xff] %v856_v61 }
 0x15b   : > { %896 = vst [vmem:[#allocation2 + $0x60] sm:$0xff] %v864_v62 }
 0x15d   : > { %v822_v3 = vpop.f32.mrf.mxu2  ;;  %v842_v4 = vpop.f32.mrf.mxu3 }
 0x15e   : > { %v872_v5 = vadd.f32 %v822_v3, %v559_v63  ;;  %v880_v6 = vadd.f32 %v842_v4, %v567_v0  ;;  %v784_v7 = vpop.f32.mrf.mxu0  ;;  %v804_v8 = vpop.f32.mrf.mxu1 }
 0x15f   : > { %v857_v9 = vadd.f32 %v784_v7, %v544_v1  ;;  %v865_v10 = vadd.f32 %v804_v8, %v552_v2 }
 0x160   : > { %904 = vst [vmem:[#allocation2 + $0xe0] sm:$0xff] %v872_v5 }
 0x161   : > { %912 = vst [vmem:[#allocation2 + $0xa0] sm:$0xff] %v880_v6 }
 0x162   : > { %889 = vst [vmem:[#allocation2 + $0x68] sm:$0xff] %v857_v9 }
 0x163   : > { %897 = vst [vmem:[#allocation2 + $0xf0] sm:$0xff] %v865_v10 }
 0x165   : > { %v824_v15 = vpop.f32.mrf.mxu2  ;;  %v844_v16 = vpop.f32.mrf.mxu3 }
 0x166   : > { %v873_v17 = vadd.f32 %v824_v15, %v560_v11  ;;  %v881_v18 = vadd.f32 %v844_v16, %v568_v12  ;;  %v787_v19 = vpop.f32.mrf.mxu0  ;;  %v807_v20 = vpop.f32.mrf.mxu1 }
 0x167   : > { %v858_v21 = vadd.f32 %v787_v19, %v545_v13  ;;  %v866_v22 = vadd.f32 %v807_v20, %v553_v14 }
 0x168   : > { %905 = vst [vmem:[#allocation2 + $0x90] sm:$0xff] %v873_v17 }
 0x169   : > { %913 = vst [vmem:[#allocation2 + $0xf8] sm:$0xff] %v881_v18 }
 0x16a   : > { %890 = vst [vmem:[#allocation2 + $0x30] sm:$0xff] %v858_v21 }
 0x16b   : > { %898 = vst [vmem:[#allocation2 + $0x8] sm:$0xff] %v866_v22 }
 0x16d   : > { %v827_v27 = vpop.f32.mrf.mxu2  ;;  %v847_v28 = vpop.f32.mrf.mxu3 }
 0x16e   : > { %v874_v29 = vadd.f32 %v827_v27, %v561_v23  ;;  %v882_v30 = vadd.f32 %v847_v28, %v569_v24  ;;  %v789_v31 = vpop.f32.mrf.mxu0  ;;  %v809_v32 = vpop.f32.mrf.mxu1 }
 0x16f   : > { %v859_v33 = vadd.f32 %v789_v31, %v546_v25  ;;  %v867_v34 = vadd.f32 %v809_v32, %v554_v26 }
 0x170   : > { %906 = vst [vmem:[#allocation2 + $0x70] sm:$0xff] %v874_v29 }
 0x171   : > { %914 = vst [vmem:[#allocation2 + $0x20] sm:$0xff] %v882_v30 }
 0x172   : > { %891 = vst [vmem:[#allocation2 + $0x48] sm:$0xff] %v859_v33 }
 0x173   : > { %899 = vst [vmem:[#allocation2 + $0x78] sm:$0xff] %v867_v34 }
 0x175   : > { %v829_v37 = vpop.f32.mrf.mxu2  ;;  %v849_v38 = vpop.f32.mrf.mxu3  ;;  %919 = sbr.rel (%p1449_p6) target bundleno = 400 (0x190), region = 122 }
 0x176   : > { %v875_v39 = vadd.f32 %v829_v37, %v562_v35  ;;  %v883_v40 = vadd.f32 %v849_v38, %v570_v36 }
 0x178   : > { %907 = vst [vmem:[#allocation2 + $0xc0] sm:$0xff] %v875_v39 }
 0x179   : > { %915 = vst [vmem:[#allocation2 + $0x98] sm:$0xff] %v883_v40 }
 0x17a   : > { %v920_v41 = vld [vmem:[#allocation2 + $0xb0] sm:$0xff]  ;;  %v921_v42 = vld [vmem:[#allocation2] sm:$0xff]  ;;  %v922_v44 = vld [vmem:[#allocation2 + $0xd8] sm:$0xff] }
 0x17b   : > { %v2102_v43 = vld [vmem:[%s501_s6] ss:$0 sm:$0xff]  ;;  %v923_v45 = vld [vmem:[#allocation2 + $0x18] sm:$0xff]  ;;  %v924_v46 = vld [vmem:[#allocation2 + $0x50] sm:$0xff] }
 0x17c   : > { %v925_v47 = vld [vmem:[#allocation2 + $0x68] sm:$0xff]  ;;  %v926_v48 = vld [vmem:[#allocation2 + $0x30] sm:$0xff]  ;;  %v956_v49 = vadd.f32 %v2102_v43, %v920_v41  ;;  %v957_v50 = vadd.f32 %v2102_v43, %v921_v42  ;;  %v958_v51 = vadd.f32 %v2102_v43, %v922_v44  ;;  %v959_v52 = vadd.f32 %v2102_v43, %v923_v45  ;;  %v928_v54 = vld [vmem:[#allocation2 + $0x80] sm:$0xff] }
 0x17d   : > { %v927_v53 = vld [vmem:[#allocation2 + $0x48] sm:$0xff]  ;;  %v960_v56 = vadd.f32 %v2102_v43, %v924_v46  ;;  %v961_v57 = vadd.f32 %v2102_v43, %v925_v47  ;;  %v962_v58 = vadd.f32 %v2102_v43, %v926_v48  ;;  %v931_v61 = vld [vmem:[#allocation2 + $0xb8] sm:$0xff]  ;;  %v932_v62 = vld [vmem:[#allocation2 + $0x60] sm:$0xff]  ;;  %v964_v1 = vadd.f32 %v2102_v43, %v928_v54 }
 0x17e   : > { %v929_v55 = vld [vmem:[#allocation2 + $0x88] sm:$0xff]  ;;  %v963_v59 = vadd.f32 %v2102_v43, %v927_v53  ;;  %v1483_v63 = vpack.c.bf16 %v957_v50, %v956_v49  ;;  %v1488_v0 = vpack.c.bf16 %v959_v52, %v958_v51  ;;  %v933_v3 = vld [vmem:[#allocation2 + $0xf0] sm:$0xff]  ;;  %v935_v5 = vld [vmem:[#allocation2 + $0x78] sm:$0xff]  ;;  %v967_v9 = vadd.f32 %v2102_v43, %v931_v61 }
 0x17f   : > { %v930_v60 = vld [vmem:[#allocation2 + $0xe8] sm:$0xff]  ;;  %v965_v2 = vadd.f32 %v2102_v43, %v929_v55  ;;  %v1493_v6 = vpack.c.bf16 %v961_v57, %v960_v56  ;;  %v936_v10 = vld [vmem:[#allocation2 + $0x38] sm:$0xff]  ;;  %v938_v12 = vld [vmem:[#allocation2 + $0x40] sm:$0xff]  ;;  %v968_v14 = vadd.f32 %v2102_v43, %v932_v62  ;;  %v969_v15 = vadd.f32 %v2102_v43, %v933_v3 }
 0x180   : > { %v934_v4 = vld [vmem:[#allocation2 + $0x8] sm:$0xff]  ;;  %v1498_v7 = vpack.c.bf16 %v963_v59, %v962_v58  ;;  %v966_v8 = vadd.f32 %v2102_v43, %v930_v60  ;;  %v937_v11 = vld [vmem:[#allocation2 + $0x58] sm:$0xff]  ;;  %1484 = vst [vmem:[%s2069_s1] sm:$0xff] %v1483_v63   ;;  %v940_v18 = vld [vmem:[#allocation2 + $0xe0] sm:$0xff]  ;;  %v971_v21 = vadd.f32 %v2102_v43, %v935_v5  ;;  %v972_v22 = vadd.f32 %v2102_v43, %v936_v10 }
 0x181   : > { %v1503_v13 = vpack.c.bf16 %v965_v2, %v964_v1  ;;  %v970_v16 = vadd.f32 %v2102_v43, %v934_v4  ;;  %v939_v17 = vld [vmem:[#allocation2 + $0xc8] sm:$0xff]  ;;  %v941_v19 = vld [vmem:[#allocation2 + $0x90] sm:$0xff]  ;;  %1560 = vst [vmem:[%s2069_s1 + $0x8] sm:$0xff] %v1488_v0   ;;  %v973_v23 = vadd.f32 %v2102_v43, %v937_v11  ;;  %v943_v25 = vld [vmem:[#allocation2 + $0xc0] sm:$0xff]  ;;  %v1513_v27 = vpack.c.bf16 %v969_v15, %v968_v14 }
 0x182   : > { %v1508_v20 = vpack.c.bf16 %v967_v9, %v966_v8  ;;  %v942_v24 = vld [vmem:[#allocation2 + $0x70] sm:$0xff]  ;;  %v944_v26 = vld [vmem:[#allocation2 + $0xa8] sm:$0xff]  ;;  %1561 = vst [vmem:[%s2069_s1 + $0x10] sm:$0xff] %v1493_v6   ;;  %v974_v28 = vadd.f32 %v2102_v43, %v938_v12  ;;  %v975_v29 = vadd.f32 %v2102_v43, %v939_v17  ;;  %v976_v30 = vadd.f32 %v2102_v43, %v940_v18  ;;  %v948_v37 = vld [vmem:[#allocation2 + $0xa0] sm:$0xff] }
 0x183   : > { %v945_v31 = vld [vmem:[#allocation2 + $0xd0] sm:$0xff]  ;;  %v947_v33 = vld [vmem:[#allocation2 + $0x28] sm:$0xff]  ;;  %1562 = vst [vmem:[%s2069_s1 + $0x18] sm:$0xff] %v1498_v7   ;;  %v1518_v34 = vpack.c.bf16 %v971_v21, %v970_v16  ;;  %v977_v35 = vadd.f32 %v2102_v43, %v941_v19  ;;  %v978_v36 = vadd.f32 %v2102_v43, %v942_v24  ;;  %v949_v38 = vld [vmem:[#allocation2 + $0xf8] sm:$0xff]  ;;  %v1523_v39 = vpack.c.bf16 %v973_v23, %v972_v22 }
 0x184   : > { %v946_v32 = vld [vmem:[#allocation2 + $0x10] sm:$0xff]  ;;  %1563 = vst [vmem:[%s2069_s1 + $0x20] sm:$0xff] %v1503_v13   ;;  %v979_v40 = vadd.f32 %v2102_v43, %v943_v25  ;;  %v980_v41 = vadd.f32 %v2102_v43, %v944_v26  ;;  %v981_v42 = vadd.f32 %v2102_v43, %v945_v31  ;;  %v950_v44 = vld [vmem:[#allocation2 + $0x20] sm:$0xff]  ;;  %v951_v45 = vld [vmem:[#allocation2 + $0x98] sm:$0xff]  ;;  %v1528_v46 = vpack.c.bf16 %v975_v29, %v974_v28 }
 0x185   : > { %1564 = vst [vmem:[%s2069_s1 + $0x28] sm:$0xff] %v1508_v20   ;;  %v982_v47 = vadd.f32 %v2102_v43, %v946_v32  ;;  %v983_v48 = vadd.f32 %v2102_v43, %v947_v33  ;;  %v1533_v49 = vpack.c.bf16 %v977_v35, %v976_v30  ;;  %v984_v50 = vadd.f32 %v2102_v43, %v948_v37 }
 0x186   : > { %1565 = vst [vmem:[%s2069_s1 + $0x30] sm:$0xff] %v1513_v27   ;;  %v985_v51 = vadd.f32 %v2102_v43, %v949_v38  ;;  %v1538_v52 = vpack.c.bf16 %v979_v40, %v978_v36  ;;  %v986_v53 = vadd.f32 %v2102_v43, %v950_v44  ;;  %v987_v54 = vadd.f32 %v2102_v43, %v951_v45 }
 0x187   : > { %1566 = vst [vmem:[%s2069_s1 + $0x38] sm:$0xff] %v1518_v34   ;;  %v1543_v55 = vpack.c.bf16 %v981_v42, %v980_v41  ;;  %v1548_v56 = vpack.c.bf16 %v983_v48, %v982_v47 }
 0x188   : > { %1567 = vst [vmem:[%s2069_s1 + $0x40] sm:$0xff] %v1523_v39   ;;  %v1553_v57 = vpack.c.bf16 %v985_v51, %v984_v50  ;;  %v1558_v58 = vpack.c.bf16 %v987_v54, %v986_v53 }
 0x189   : > { %1568 = vst [vmem:[%s2069_s1 + $0x48] sm:$0xff] %v1528_v46  }
 0x18a   : > { %1569 = vst [vmem:[%s2069_s1 + $0x50] sm:$0xff] %v1533_v49  }
 0x18b   : > { %1570 = vst [vmem:[%s2069_s1 + $0x58] sm:$0xff] %v1538_v52  }
 0x18c   : > { %1571 = vst [vmem:[%s2069_s1 + $0x60] sm:$0xff] %v1543_v55  }
 0x18d   : > { %1572 = vst [vmem:[%s2069_s1 + $0x68] sm:$0xff] %v1548_v56  }
 0x18e   : > { %1573 = vst [vmem:[%s2069_s1 + $0x70] sm:$0xff] %v1553_v57  }
 0x18f   : > { %1574 = vst [vmem:[%s2069_s1 + $0x78] sm:$0xff] %v1558_v58  }
 0x190 PF: > { %1058 = sbr.rel (!%p1945_p13) target bundleno = 443 (0x1bb), region = 126  ;;  %s2288_s14 = sld [smem:[#allocation6_spill]] (%p1945_p13)  ;;  %v1080_v43 = vld [vmem:[%s2069_s1] sm:$0xf] (%p1945_p13)  ;;  %v1082_v59 = vld [vmem:[%s2069_s1 + $0x4] sm:$0xf] (%p1945_p13) }
 0x191   : > { %s2289_s20 = sld [smem:[#allocation11_spill]] (%p1945_p13)  ;;  %v1084_v60 = vld [vmem:[%s2069_s1 + $0x8] sm:$0xf] (%p1945_p13)  ;;  %v1086_v61 = vld [vmem:[%s2069_s1 + $0xc] sm:$0xf] (%p1945_p13) }
 0x192   : > { %v1088_v62 = vld [vmem:[%s2069_s1 + $0x10] sm:$0xf] (%p1945_p13)  ;;  %v1090_v63 = vld [vmem:[%s2069_s1 + $0x14] sm:$0xf] (%p1945_p13)  ;;  %v1092_v0 = vld [vmem:[%s2069_s1 + $0x18] sm:$0xf] (%p1945_p13) }
 0x193   : > { %v1094_v1 = vld [vmem:[%s2069_s1 + $0x1c] sm:$0xf] (%p1945_p13)  ;;  %v1096_v2 = vld [vmem:[%s2069_s1 + $0x20] sm:$0xf] (%p1945_p13)  ;;  %v1098_v3 = vld [vmem:[%s2069_s1 + $0x24] sm:$0xf] (%p1945_p13) }
 0x194   : > { %v1100_v4 = vld [vmem:[%s2069_s1 + $0x28] sm:$0xf] (%p1945_p13)  ;;  %v1102_v5 = vld [vmem:[%s2069_s1 + $0x2c] sm:$0xf] (%p1945_p13)  ;;  %v1104_v6 = vld [vmem:[%s2069_s1 + $0x30] sm:$0xf] (%p1945_p13) }
 0x195   : > { %v1106_v7 = vld [vmem:[%s2069_s1 + $0x34] sm:$0xf]  ;;  %v1108_v8 = vld [vmem:[%s2069_s1 + $0x38] sm:$0xf]  ;;  %v1110_v9 = vld [vmem:[%s2069_s1 + $0x3c] sm:$0xf] }
 0x196   : > { %s1601_s16 = smul.u32 288, %s2288_s14  ;;  %v1112_v10 = vld [vmem:[%s2069_s1 + $0x40] sm:$0xf]  ;;  %v1114_v11 = vld [vmem:[%s2069_s1 + $0x44] sm:$0xf] }
 0x197   : > { %v1116_v12 = vld [vmem:[%s2069_s1 + $0x48] sm:$0xf]  ;;  %v1118_v13 = vld [vmem:[%s2069_s1 + $0x4c] sm:$0xf]  ;;  %v1120_v14 = vld [vmem:[%s2069_s1 + $0x50] sm:$0xf] }
 0x198   : > { %s1061_s18 = sadd.s32 %s1790_s19, %s1601_s16  ;;  %v1122_v15 = vld [vmem:[%s2069_s1 + $0x54] sm:$0xf]  ;;  %v1124_v16 = vld [vmem:[%s2069_s1 + $0x58] sm:$0xf]  ;;  %v1126_v17 = vld [vmem:[%s2069_s1 + $0x5c] sm:$0xf] }
 0x199   : > { %s1453_s10 = sshll.u32 %s1061_s18, 2  ;;  %v1128_v18 = vld [vmem:[%s2069_s1 + $0x60] sm:$0xf]  ;;  %v1130_v19 = vld [vmem:[%s2069_s1 + $0x64] sm:$0xf] }
 0x19a   : > { %s2161_s25 = scalar_lea.vmem %s2289_s20, %s1453_s10  ;;  %v1132_v20 = vld [vmem:[%s2069_s1 + $0x68] sm:$0xf]  ;;  %v1134_v21 = vld [vmem:[%s2069_s1 + $0x6c] sm:$0xf]  ;;  %v1136_v22 = vld [vmem:[%s2069_s1 + $0x70] sm:$0xf] }
 0x19b   : > { %1081 = vst [vmem:[%s2161_s25] sm:$0xf] %v1080_v43  ;;  %v1138_v23 = vld [vmem:[%s2069_s1 + $0x74] sm:$0xf]  ;;  %v1140_v24 = vld [vmem:[%s2069_s1 + $0x78] sm:$0xf] }
 0x19c   : > { %1083 = vst [vmem:[%s2161_s25 + $0x24] sm:$0xf] %v1082_v59  ;;  %v1142_v25 = vld [vmem:[%s2069_s1 + $0x7c] sm:$0xf] }
 0x19d   : > { %1085 = vst [vmem:[%s2161_s25 + $0x48] sm:$0xf] %v1084_v60 }
 0x19e   : > { %1087 = vst [vmem:[%s2161_s25 + $0x6c] sm:$0xf] %v1086_v61 }
 0x19f   : > { %1089 = vst [vmem:[%s2161_s25 + $0x90] sm:$0xf] %v1088_v62 }
 0x1a0   : > { %1091 = vst [vmem:[%s2161_s25 + $0xb4] sm:$0xf] %v1090_v63 }
 0x1a1   : > { %1093 = vst [vmem:[%s2161_s25 + $0xd8] sm:$0xf] %v1092_v0 }
 0x1a2   : > { %1095 = vst [vmem:[%s2161_s25 + $0xfc] sm:$0xf] %v1094_v1 }
 0x1a3   : > { %1097 = vst [vmem:[%s2161_s25 + $0x120] sm:$0xf] %v1096_v2 }
 0x1a4   : > { %1099 = vst [vmem:[%s2161_s25 + $0x144] sm:$0xf] %v1098_v3 }
 0x1a5   : > { %1101 = vst [vmem:[%s2161_s25 + $0x168] sm:$0xf] %v1100_v4 }
 0x1a6   : > { %1103 = vst [vmem:[%s2161_s25 + $0x18c] sm:$0xf] %v1102_v5 }
 0x1a7   : > { %1105 = vst [vmem:[%s2161_s25 + $0x1b0] sm:$0xf] %v1104_v6 }
 0x1a8   : > { %1107 = vst [vmem:[%s2161_s25 + $0x1d4] sm:$0xf] %v1106_v7 }
 0x1a9   : > { %1109 = vst [vmem:[%s2161_s25 + $0x1f8] sm:$0xf] %v1108_v8 }
 0x1aa   : > { %1111 = vst [vmem:[%s2161_s25 + $0x21c] sm:$0xf] %v1110_v9 }
 0x1ab   : > { %1113 = vst [vmem:[%s2161_s25 + $0x240] sm:$0xf] %v1112_v10 }
 0x1ac   : > { %1115 = vst [vmem:[%s2161_s25 + $0x264] sm:$0xf] %v1114_v11 }
 0x1ad   : > { %1117 = vst [vmem:[%s2161_s25 + $0x288] sm:$0xf] %v1116_v12 }
 0x1ae   : > { %1119 = vst [vmem:[%s2161_s25 + $0x2ac] sm:$0xf] %v1118_v13 }
 0x1af   : > { %1121 = vst [vmem:[%s2161_s25 + $0x2d0] sm:$0xf] %v1120_v14 }
 0x1b0   : > { %1123 = vst [vmem:[%s2161_s25 + $0x2f4] sm:$0xf] %v1122_v15 }
 0x1b1   : > { %1125 = vst [vmem:[%s2161_s25 + $0x318] sm:$0xf] %v1124_v16 }
 0x1b2   : > { %1127 = vst [vmem:[%s2161_s25 + $0x33c] sm:$0xf] %v1126_v17 }
 0x1b3   : > { %1129 = vst [vmem:[%s2161_s25 + $0x360] sm:$0xf] %v1128_v18 }
 0x1b4   : > { %1131 = vst [vmem:[%s2161_s25 + $0x384] sm:$0xf] %v1130_v19 }
 0x1b5   : > { %1133 = vst [vmem:[%s2161_s25 + $0x3a8] sm:$0xf] %v1132_v20 }
 0x1b6   : > { %1135 = vst [vmem:[%s2161_s25 + $0x3cc] sm:$0xf] %v1134_v21 }
 0x1b7   : > { %1137 = vst [vmem:[%s2161_s25 + $0x3f0] sm:$0xf] %v1136_v22 }
 0x1b8   : > { %1139 = vst [vmem:[%s2161_s25 + $0x414] sm:$0xf] %v1138_v23 }
 0x1b9   : > { %1141 = vst [vmem:[%s2161_s25 + $0x438] sm:$0xf] %v1140_v24 }
 0x1ba   : > { %1143 = vst [vmem:[%s2161_s25 + $0x45c] sm:$0xf] %v1142_v25 }
 0x1bb PF: > { %s13_s24 = sadd.s32 1, %s1810_s24   ;;  %s2291_s1 = sld [smem:[#allocation7_spill]] }
 0x1bc   : > { %p2226_p7 = scmp.ge.s32.totalorder %s13_s24, 56   ;;  %s2292_s26 = sld [smem:[#allocation8_spill]] }
 0x1bd   : > { %s2294_s12 = smov %s1766_s13  ;;  %s2295_s13 = smov %s1943_s7 }
 0x1be   : > { %s2296_s14 = smov %s1774_s15  ;;  %s2297_s15 = smov %s1930_s9 }
 0x1bf   : > { %s2298_s16 = smov %s1782_s17  ;;  %s2299_s17 = smov %s1940_s3 }
 0x1c0   : > { %s2300_s18 = smov %s1798_s21  ;;  %s2301_s19 = smov %s1802_s22 }
 0x1c1   : > { %s2302_s20 = smov %s1806_s23  ;;  %s2303_s21 = smov %s2291_s1 }
 0x1c2   : > { %s2304_s22 = smov %s2292_s26  ;;  %s2305_s23 = smov %s2315_s28 }
 0x1c3   :  { %12 = sbr.rel (!%p2226_p7) target bundleno = 11 (0xb), region = 209 }

// kernel: forward.4
= control target key start
LH: loop header
LB: loop body
LE: loop exit
PB: predicated region body
PF: predicated region fallthrough
CT: control target
= control target key end

     0   :  { %s4732_s0 = inlined_call_operand.vmem [shape: bf16[3,2,6,256,64], index: 0, kind: input, shape index: {}, may-alias: {0,1,2}]   ;;  %s4733_s1 = inlined_call_operand.vmem [shape: bf16[3,2,6,256,64], index: 1, kind: input, shape index: {}, may-alias: {0,1,2}]   ;;  %s4734_s2 = inlined_call_operand.vmem [shape: bf16[3,2,6,256,64], index: 2, kind: input, shape index: {}, may-alias: {0,1,2}]   ;;  %s4735_s3 = inlined_call_operand.vmem [shape: f32[2,256,64], index: 3, kind: input, shape index: {}, may-alias: {3,4}]   ;;  %s4736_s4 = inlined_call_operand.vmem [shape: f32[2,256,64], index: 4, kind: input, shape index: {}, may-alias: {3,4}]   ;;  %s4737_s5 = inlined_call_operand.vmem [shape: bf16[64,64], index: 5, kind: input, shape index: {}]   ;;  %s4738_s6 = inlined_call_operand.vmem [shape: bf16[2,6,256,64], index: 6, kind: output, shape index: {}]  }
   0x1   :  { %4755 = sst [smem:[#allocation21_spill]] %s4732_s0 }
   0x2   :  { %4756 = sst [smem:[#allocation22_spill]] %s4735_s3 }
   0x3   :  { %4757 = sst [smem:[#allocation23_spill]] %s4736_s4 }
   0x4   :  { %s3417_s21 = smov 0   ;;  %s3419_s22 = smov 0  }
   0x5   :  { %s3421_s23 = smov 0   ;;  %s3423_s24 = smov 0  }
   0x6   :  { %s3425_s25 = smov 0   ;;  %s3427_s26 = smov 0  }
   0x7   :  { %s3429_s27 = smov 0   ;;  %s3431_s28 = smov 0  }
   0x8   :  { %s3433_s29 = smov 0   ;;  %s3435_s30 = smov 0  }
   0x9   :  { %s3437_s7 = smov 0   ;;  %s3439_s8 = smov 0  }
   0xa   :  { %s3441_s9 = smov 0  }
   0xb LB: > { %4758 = sst [smem:[#allocation8_spill]] %s3360_s29  ;;  %s31_s10 = sadd.s32 1, %s3360_s29  ;;  %s3376_s9 = sphi %s3441_s9, %s16_s9   ;;  %s3372_s8 = sphi %s3439_s8, %s4805_s8   ;;  %s3368_s7 = sphi %s3437_s7, %s4804_s7   ;;  %s3364_s30 = sphi %s3435_s30, %s4803_s30   ;;  %s3360_s29 = sphi %s3433_s29, %s4802_s29   ;;  %s3356_s28 = sphi %s3431_s28, %s4801_s28   ;;  %s3352_s27 = sphi %s3429_s27, %s4800_s27   ;;  %s3348_s26 = sphi %s3427_s26, %s4811_s26   ;;  %s3344_s25 = sphi %s3425_s25, %s4810_s25   ;;  %s3340_s24 = sphi %s3423_s24, %s4809_s24   ;;  %s3336_s23 = sphi %s3421_s23, %s4808_s23   ;;  %s3332_s22 = sphi %s3419_s22, %s4807_s22   ;;  %s3328_s21 = sphi %s3417_s21, %s4806_s21  }
   0xc   : > { %4759 = sst [smem:[#allocation9_spill]] %s3364_s30  ;;  %s34_s11 = sadd.s32 1, %s3364_s30 }
   0xd   : > { %4760 = sst [smem:[#allocation10_spill]] %s3368_s7  ;;  %p32_p0 = scmp.ge.s32.totalorder %s31_s10, 2 }
   0xe   : > { %4761 = sst [smem:[#allocation11_spill]] %s3372_s8  ;;  %s38_s12 = sadd.s32 1, %s3368_s7 }
   0xf   : > { %s42_s13 = sadd.s32 1, %s3372_s8  ;;  %s139_s14 = sadd.s32 1, %s3340_s24 }
  0x10   : > { %s4813_s10 = smov (%p32_p0, %s31_s10), 0  ;;  %s4815_s11 = smov (!%p32_p0, %s34_s11), %s3364_s30 }
  0x11   : > { %4762 = sst [smem:[#allocation12_spill]] %s4813_s10  ;;  %p146_p1 = scmp.ne.s32.totalorder %s3340_s24, %s3336_s23 }
  0x12   : > { %p147_p2 = scmp.eq.s32.totalorder %s3376_s9, 0  ;;  %p36_p3 = scmp.ge.s32.totalorder %s4815_s11, 2 }
  0x13   : > { %s162_s15 = ssub.s32 %s3360_s29, %s4813_s10  ;;  %s165_s18 = sadd.s32 1, %s3332_s22 }
  0x14   : > { %p3497_p4 = por %p147_p2, %p146_p1  ;;  %p163_p5 = scmp.eq.s32.totalorder %s162_s15, 0 }
  0x15   : > { %s4817_s11 = smov (%p36_p3, %s4815_s11), 0  ;;  %s4819_s12 = smov (!%p36_p3, %s38_s12), %s3368_s7 }
  0x16   : > { %4764 = sst [smem:[#allocation13_spill]] %s4817_s11  ;;  %s136_s17 = ssub.s32 %s3364_s30, %s4817_s11 }
  0x17   : > { %p40_p6 = scmp.ge.s32.totalorder %s4819_s12, 6  ;;  %p137_p7 = scmp.eq.s32.totalorder %s136_s17, 0 }
  0x18   : > { %s3508_s19 = scalar_select %p163_p5, %s3332_s22, %s165_s18  }
  0x19   : > { %s4821_s12 = smov (%p40_p6, %s4819_s12), 0  ;;  %s4823_s13 = smov (!%p40_p6, %s42_s13), %s3372_s8 }
  0x1a   : > { %4765 = sst [smem:[#allocation14_spill]] %s4821_s12  ;;  %p44_p8 = scmp.ge.s32.totalorder %s4823_s13, 2 }
  0x1b   : > { %s3514_s20 = scalar_select %p137_p7, %s3340_s24, %s139_s14  }
  0x1c   : > { %p172_p9 = scmp.ne.s32.totalorder %s3332_s22, %s3328_s21  ;;  %s4825_s13 = smov (%p44_p8, %s4823_s13), 0 }
  0x1d   : > { %4766 = sst [smem:[#allocation15_spill]] %s3514_s20  ;;  %p2689_p11 = scmp.ge.s32.totalorder %s3376_s9, 48 }
  0x1e   : > { %4767 = sst [smem:[#allocation16_spill]] %s4825_s13  ;;  %p3522_p10 = por %p172_p9, %p147_p2 }
  0x1f   : > { %252 = sbr.rel (%p2689_p11) target bundleno = 120 (0x78), region = 20 }
  0x24   : > { %308 = sbr.rel (!%p3497_p4) target bundleno = 78 (0x4e), region = 36  ;;  %s310_s17 = sand.u32 (%p3497_p4), 1, %s3340_s24  }
  0x25   : > { %s2991_s14 = sshll.u32 (%p3497_p4), %s3364_s30, 7  ;;  %s2690_s18 = sshll.u32 (%p3497_p4), %s310_s17, 8 }
  0x26   : > { %s4769_s3 = sld [smem:[#allocation22_spill]] (%p3497_p4)  ;;  %s3539_s16 = scalar_lea.vmem (%p3497_p4), [#allocation6], %s2690_s18 }
  0x2c   : > { %s3534_s13 = scalar_lea.vmem %s4769_s3, %s2991_s14 }
  0x2d   : > { %v406_v0 = vld [vmem:[%s3534_s13] sm:$0xff]  ;;  %v408_v1 = vld [vmem:[%s3534_s13 + $0x8] sm:$0xff]  ;;  %v410_v2 = vld [vmem:[%s3534_s13 + $0x10] sm:$0xff] }
  0x2e   : > { %407 = vst [vmem:[%s3539_s16] sm:$0xff] %v406_v0  ;;  %v412_v3 = vld [vmem:[%s3534_s13 + $0x18] sm:$0xff]  ;;  %v414_v4 = vld [vmem:[%s3534_s13 + $0x20] sm:$0xff]  ;;  %v416_v5 = vld [vmem:[%s3534_s13 + $0x28] sm:$0xff] }
  0x2f   : > { %409 = vst [vmem:[%s3539_s16 + $0x8] sm:$0xff] %v408_v1  ;;  %v418_v6 = vld [vmem:[%s3534_s13 + $0x30] sm:$0xff]  ;;  %v420_v7 = vld [vmem:[%s3534_s13 + $0x38] sm:$0xff]  ;;  %v422_v8 = vld [vmem:[%s3534_s13 + $0x40] sm:$0xff] }
  0x30   : > { %411 = vst [vmem:[%s3539_s16 + $0x10] sm:$0xff] %v410_v2  ;;  %v424_v9 = vld [vmem:[%s3534_s13 + $0x48] sm:$0xff]  ;;  %v426_v10 = vld [vmem:[%s3534_s13 + $0x50] sm:$0xff]  ;;  %v428_v11 = vld [vmem:[%s3534_s13 + $0x58] sm:$0xff] }
  0x31   : > { %413 = vst [vmem:[%s3539_s16 + $0x18] sm:$0xff] %v412_v3  ;;  %v430_v12 = vld [vmem:[%s3534_s13 + $0x60] sm:$0xff]  ;;  %v432_v13 = vld [vmem:[%s3534_s13 + $0x68] sm:$0xff]  ;;  %v434_v14 = vld [vmem:[%s3534_s13 + $0x70] sm:$0xff] }
  0x32   : > { %415 = vst [vmem:[%s3539_s16 + $0x20] sm:$0xff] %v414_v4  ;;  %v436_v15 = vld [vmem:[%s3534_s13 + $0x78] sm:$0xff]  ;;  %v438_v16 = vld [vmem:[%s3534_s13 + $0x100] sm:$0xff]  ;;  %v440_v17 = vld [vmem:[%s3534_s13 + $0x108] sm:$0xff] }
  0x33   : > { %417 = vst [vmem:[%s3539_s16 + $0x28] sm:$0xff] %v416_v5  ;;  %v442_v18 = vld [vmem:[%s3534_s13 + $0x110] sm:$0xff]  ;;  %v444_v19 = vld [vmem:[%s3534_s13 + $0x118] sm:$0xff]  ;;  %v446_v20 = vld [vmem:[%s3534_s13 + $0x120] sm:$0xff] }
  0x34   : > { %419 = vst [vmem:[%s3539_s16 + $0x30] sm:$0xff] %v418_v6  ;;  %v448_v21 = vld [vmem:[%s3534_s13 + $0x128] sm:$0xff]  ;;  %v450_v22 = vld [vmem:[%s3534_s13 + $0x130] sm:$0xff]  ;;  %v452_v23 = vld [vmem:[%s3534_s13 + $0x138] sm:$0xff] }
  0x35   : > { %421 = vst [vmem:[%s3539_s16 + $0x38] sm:$0xff] %v420_v7  ;;  %v454_v24 = vld [vmem:[%s3534_s13 + $0x140] sm:$0xff]  ;;  %v456_v25 = vld [vmem:[%s3534_s13 + $0x148] sm:$0xff]  ;;  %v458_v26 = vld [vmem:[%s3534_s13 + $0x150] sm:$0xff] }
  0x36   : > { %423 = vst [vmem:[%s3539_s16 + $0x40] sm:$0xff] %v422_v8  ;;  %v460_v27 = vld [vmem:[%s3534_s13 + $0x158] sm:$0xff]  ;;  %v462_v28 = vld [vmem:[%s3534_s13 + $0x160] sm:$0xff]  ;;  %v464_v29 = vld [vmem:[%s3534_s13 + $0x168] sm:$0xff] }
  0x37   : > { %425 = vst [vmem:[%s3539_s16 + $0x48] sm:$0xff] %v424_v9  ;;  %v466_v30 = vld [vmem:[%s3534_s13 + $0x170] sm:$0xff]  ;;  %v468_v31 = vld [vmem:[%s3534_s13 + $0x178] sm:$0xff] }
  0x38   : > { %427 = vst [vmem:[%s3539_s16 + $0x50] sm:$0xff] %v426_v10 }
  0x39   : > { %429 = vst [vmem:[%s3539_s16 + $0x58] sm:$0xff] %v428_v11 }
  0x3a   : > { %431 = vst [vmem:[%s3539_s16 + $0x60] sm:$0xff] %v430_v12 }
  0x3b   : > { %433 = vst [vmem:[%s3539_s16 + $0x68] sm:$0xff] %v432_v13 }
  0x3c   : > { %435 = vst [vmem:[%s3539_s16 + $0x70] sm:$0xff] %v434_v14 }
  0x3d   : > { %437 = vst [vmem:[%s3539_s16 + $0x78] sm:$0xff] %v436_v15 }
  0x3e   : > { %439 = vst [vmem:[%s3539_s16 + $0x80] sm:$0xff] %v438_v16 }
  0x3f   : > { %441 = vst [vmem:[%s3539_s16 + $0x88] sm:$0xff] %v440_v17 }
  0x40   : > { %443 = vst [vmem:[%s3539_s16 + $0x90] sm:$0xff] %v442_v18 }
  0x41   : > { %445 = vst [vmem:[%s3539_s16 + $0x98] sm:$0xff] %v444_v19 }
  0x42   : > { %447 = vst [vmem:[%s3539_s16 + $0xa0] sm:$0xff] %v446_v20 }
  0x43   : > { %449 = vst [vmem:[%s3539_s16 + $0xa8] sm:$0xff] %v448_v21 }
  0x44   : > { %451 = vst [vmem:[%s3539_s16 + $0xb0] sm:$0xff] %v450_v22 }
  0x45   : > { %453 = vst [vmem:[%s3539_s16 + $0xb8] sm:$0xff] %v452_v23 }
  0x46   : > { %455 = vst [vmem:[%s3539_s16 + $0xc0] sm:$0xff] %v454_v24 }
  0x47   : > { %457 = vst [vmem:[%s3539_s16 + $0xc8] sm:$0xff] %v456_v25 }
  0x48   : > { %459 = vst [vmem:[%s3539_s16 + $0xd0] sm:$0xff] %v458_v26 }
  0x49   : > { %461 = vst [vmem:[%s3539_s16 + $0xd8] sm:$0xff] %v460_v27 }
  0x4a   : > { %463 = vst [vmem:[%s3539_s16 + $0xe0] sm:$0xff] %v462_v28 }
  0x4b   : > { %465 = vst [vmem:[%s3539_s16 + $0xe8] sm:$0xff] %v464_v29 }
  0x4c   : > { %467 = vst [vmem:[%s3539_s16 + $0xf0] sm:$0xff] %v466_v30 }
  0x4d   : > { %469 = vst [vmem:[%s3539_s16 + $0xf8] sm:$0xff] %v468_v31 }
  0x4e PF: > { %475 = sbr.rel (!%p3522_p10) target bundleno = 120 (0x78), region = 74  ;;  %s477_s11 = sand.u32 (%p3522_p10), 1, %s3332_s22  }
  0x4f   : > { %s2992_s12 = sshll.u32 (%p3522_p10), %s3360_s29, 7  ;;  %s2693_s17 = sshll.u32 (%p3522_p10), %s477_s11, 8 }
  0x50   : > { %s4770_s4 = sld [smem:[#allocation23_spill]] (%p3522_p10)  ;;  %s3614_s13 = scalar_lea.vmem (%p3522_p10), [#allocation7], %s2693_s17 }
  0x56   : > { %s3609_s3 = scalar_lea.vmem %s4770_s4, %s2992_s12 }
  0x57   : > { %v573_v32 = vld [vmem:[%s3609_s3] sm:$0xff]  ;;  %v575_v33 = vld [vmem:[%s3609_s3 + $0x8] sm:$0xff]  ;;  %v577_v34 = vld [vmem:[%s3609_s3 + $0x10] sm:$0xff] }
  0x58   : > { %574 = vst [vmem:[%s3614_s13] sm:$0xff] %v573_v32  ;;  %v579_v35 = vld [vmem:[%s3609_s3 + $0x18] sm:$0xff]  ;;  %v581_v36 = vld [vmem:[%s3609_s3 + $0x20] sm:$0xff]  ;;  %v583_v37 = vld [vmem:[%s3609_s3 + $0x28] sm:$0xff] }
  0x59   : > { %576 = vst [vmem:[%s3614_s13 + $0x8] sm:$0xff] %v575_v33  ;;  %v585_v38 = vld [vmem:[%s3609_s3 + $0x30] sm:$0xff]  ;;  %v587_v39 = vld [vmem:[%s3609_s3 + $0x38] sm:$0xff]  ;;  %v589_v40 = vld [vmem:[%s3609_s3 + $0x40] sm:$0xff] }
  0x5a   : > { %578 = vst [vmem:[%s3614_s13 + $0x10] sm:$0xff] %v577_v34  ;;  %v591_v41 = vld [vmem:[%s3609_s3 + $0x48] sm:$0xff]  ;;  %v593_v42 = vld [vmem:[%s3609_s3 + $0x50] sm:$0xff]  ;;  %v595_v43 = vld [vmem:[%s3609_s3 + $0x58] sm:$0xff] }
  0x5b   : > { %580 = vst [vmem:[%s3614_s13 + $0x18] sm:$0xff] %v579_v35  ;;  %v597_v44 = vld [vmem:[%s3609_s3 + $0x60] sm:$0xff]  ;;  %v599_v45 = vld [vmem:[%s3609_s3 + $0x68] sm:$0xff]  ;;  %v601_v46 = vld [vmem:[%s3609_s3 + $0x70] sm:$0xff] }
  0x5c   : > { %582 = vst [vmem:[%s3614_s13 + $0x20] sm:$0xff] %v581_v36  ;;  %v603_v47 = vld [vmem:[%s3609_s3 + $0x78] sm:$0xff]  ;;  %v605_v48 = vld [vmem:[%s3609_s3 + $0x100] sm:$0xff]  ;;  %v607_v49 = vld [vmem:[%s3609_s3 + $0x108] sm:$0xff] }
  0x5d   : > { %584 = vst [vmem:[%s3614_s13 + $0x28] sm:$0xff] %v583_v37  ;;  %v609_v50 = vld [vmem:[%s3609_s3 + $0x110] sm:$0xff]  ;;  %v611_v51 = vld [vmem:[%s3609_s3 + $0x118] sm:$0xff]  ;;  %v613_v52 = vld [vmem:[%s3609_s3 + $0x120] sm:$0xff] }
  0x5e   : > { %586 = vst [vmem:[%s3614_s13 + $0x30] sm:$0xff] %v585_v38  ;;  %v615_v53 = vld [vmem:[%s3609_s3 + $0x128] sm:$0xff]  ;;  %v617_v54 = vld [vmem:[%s3609_s3 + $0x130] sm:$0xff]  ;;  %v619_v55 = vld [vmem:[%s3609_s3 + $0x138] sm:$0xff] }
  0x5f   : > { %588 = vst [vmem:[%s3614_s13 + $0x38] sm:$0xff] %v587_v39  ;;  %v621_v56 = vld [vmem:[%s3609_s3 + $0x140] sm:$0xff]  ;;  %v623_v57 = vld [vmem:[%s3609_s3 + $0x148] sm:$0xff]  ;;  %v625_v58 = vld [vmem:[%s3609_s3 + $0x150] sm:$0xff] }
  0x60   : > { %590 = vst [vmem:[%s3614_s13 + $0x40] sm:$0xff] %v589_v40  ;;  %v627_v59 = vld [vmem:[%s3609_s3 + $0x158] sm:$0xff]  ;;  %v629_v60 = vld [vmem:[%s3609_s3 + $0x160] sm:$0xff]  ;;  %v631_v61 = vld [vmem:[%s3609_s3 + $0x168] sm:$0xff] }
  0x61   : > { %592 = vst [vmem:[%s3614_s13 + $0x48] sm:$0xff] %v591_v41  ;;  %v633_v62 = vld [vmem:[%s3609_s3 + $0x170] sm:$0xff]  ;;  %v635_v63 = vld [vmem:[%s3609_s3 + $0x178] sm:$0xff] }
  0x62   : > { %594 = vst [vmem:[%s3614_s13 + $0x50] sm:$0xff] %v593_v42 }
  0x63   : > { %596 = vst [vmem:[%s3614_s13 + $0x58] sm:$0xff] %v595_v43 }
  0x64   : > { %598 = vst [vmem:[%s3614_s13 + $0x60] sm:$0xff] %v597_v44 }
  0x65   : > { %600 = vst [vmem:[%s3614_s13 + $0x68] sm:$0xff] %v599_v45 }
  0x66   : > { %602 = vst [vmem:[%s3614_s13 + $0x70] sm:$0xff] %v601_v46 }
  0x67   : > { %604 = vst [vmem:[%s3614_s13 + $0x78] sm:$0xff] %v603_v47 }
  0x68   : > { %606 = vst [vmem:[%s3614_s13 + $0x80] sm:$0xff] %v605_v48 }
  0x69   : > { %608 = vst [vmem:[%s3614_s13 + $0x88] sm:$0xff] %v607_v49 }
  0x6a   : > { %610 = vst [vmem:[%s3614_s13 + $0x90] sm:$0xff] %v609_v50 }
  0x6b   : > { %612 = vst [vmem:[%s3614_s13 + $0x98] sm:$0xff] %v611_v51 }
  0x6c   : > { %614 = vst [vmem:[%s3614_s13 + $0xa0] sm:$0xff] %v613_v52 }
  0x6d   : > { %616 = vst [vmem:[%s3614_s13 + $0xa8] sm:$0xff] %v615_v53 }
  0x6e   : > { %618 = vst [vmem:[%s3614_s13 + $0xb0] sm:$0xff] %v617_v54 }
  0x6f   : > { %620 = vst [vmem:[%s3614_s13 + $0xb8] sm:$0xff] %v619_v55 }
  0x70   : > { %622 = vst [vmem:[%s3614_s13 + $0xc0] sm:$0xff] %v621_v56 }
  0x71   : > { %624 = vst [vmem:[%s3614_s13 + $0xc8] sm:$0xff] %v623_v57 }
  0x72   : > { %626 = vst [vmem:[%s3614_s13 + $0xd0] sm:$0xff] %v625_v58 }
  0x73   : > { %628 = vst [vmem:[%s3614_s13 + $0xd8] sm:$0xff] %v627_v59 }
  0x74   : > { %630 = vst [vmem:[%s3614_s13 + $0xe0] sm:$0xff] %v629_v60 }
  0x75   : > { %632 = vst [vmem:[%s3614_s13 + $0xe8] sm:$0xff] %v631_v61 }
  0x76   : > { %634 = vst [vmem:[%s3614_s13 + $0xf0] sm:$0xff] %v633_v62 }
  0x77   : > { %636 = vst [vmem:[%s3614_s13 + $0xf8] sm:$0xff] %v635_v63 }
  0x78 PF: > { %p2696_p12 = scmp.ge.s32.totalorder %s3376_s9, 1  ;;  %p641_p13 = scmp.lt.s32.totalorder %s3376_s9, 49 }
  0x7a   : > { %p642_p0 = pnand %p2696_p12, %p641_p13 }
  0x7b   : > { %s648_s3 = sand.u32 (!%p642_p0), 1, %s3336_s23   ;;  %s655_s15 = sand.u32 (!%p642_p0), 1, %s3328_s21  }
  0x7c   : > { %645 = sbr.rel (%p642_p0) target bundleno = 1585 (0x631), region = 112  ;;  %s2697_s16 = sshll.u32 (!%p642_p0), %s648_s3, 8 }
  0x7d   : > { %s2698_s11 = sshll.u32 (!%p642_p0), %s655_s15, 8  ;;  %s2699_s12 = sshll.u32 (!%p642_p0), %s3348_s26, 4 }
  0x7e   : > { %p738_p1 = scmp.lt.s32.totalorder (!%p642_p0), %s3356_s28, 1  ;;  %p740_p2 = scmp.lt.s32.totalorder (!%p642_p0), %s3352_s27, 5 }
  0x7f   : > { %p742_p3 = scmp.lt.s32.totalorder (!%p642_p0), %s2699_s12, 31  ;;  %s2702_s13 = sshll.u32 (!%p642_p0), %s3344_s25, 4 }
  0x80   : > { %p756_p4 = scmp.lt.s32.totalorder (!%p642_p0), %s2702_s13, 31  ;;  %s4771_s0 = sld [smem:[#allocation21_spill]] (!%p642_p0) }
  0x81   : > { %s4827_s28 = smov (!%p738_p1, %s3356_s28), 1  ;;  %s4829_s27 = smov (!%p740_p2, %s3352_s27), 5 }
  0x82   : > { %s4831_s12 = smov (!%p742_p3, %s2699_s12), 31  ;;  %s2700_s17 = sshll.u32 %s4829_s27, 5 }
  0x83   : > { %s3063_s14 = smul.u32 192, %s4827_s28  ;;  %s745_s18 = sadd.s32 %s2700_s17, %s4831_s12 }
  0x84   : > { %s4833_s13 = smov (!%p756_p4, %s2702_s13), 31  ;;  %s3707_s8 = scalar_lea.vmem [#allocation6], %s2697_s16 }
  0x85   : > { %s747_s4 = sadd.s32 %s3063_s14, %s745_s18  ;;  %s2579_s30 = sadd.s32 %s2700_s17, %s4833_s13 }
  0x86   : > { %s2701_s10 = sshll.u32 %s747_s4, 2  ;;  %s2581_s29 = sadd.s32 %s3063_s14, %s2579_s30 }
  0x87   : > { %s3690_s21 = scalar_lea.vmem %s4771_s0, %s2701_s10  ;;  %s3695_s15 = scalar_lea.vmem %s4738_s6, %s2701_s10 }
  0x88   : > { %s2704_s27 = sshll.u32 %s2581_s29, 2  ;;  %s3709_s0 = scalar_lea.vmem [#allocation7], %s2698_s11 }
  0x89   : > { %s3700_s18 = scalar_lea.vmem %s4733_s1, %s2704_s27  ;;  %s3705_s7 = scalar_lea.vmem %s4734_s2, %s2704_s27 }
  0x8a   : > { %p2711_p5 = scmp.ne.s32.totalorder %s3344_s25, 0 }
  0x8c   : > { %801 = sbr.rel (%p2711_p5) target bundleno = 328 (0x148), region = 124 }
  0x91   : > { %v3004_v0 = vld [vmem:[%s4737_s5 + $0x18] sm:$0xff]  ;;  %vm802_vm0 = vcmask 7168   ;;  %v3378_v1 = vmov -1e+30   ;;  %v3003_v2 = vld [vmem:[%s4737_s5 + $0x10] sm:$0xff]  ;;  %v3002_v3 = vld [vmem:[%s4737_s5 + $0x8] sm:$0xff] }
  0x92   : > { %803 = vst.msk [vmem:[#allocation3] sm:$0xff] %vm802_vm0, %v3378_v1  ;;  %1001 = vmatpush.bf16.msra.mxu0 %v3004_v0  ;;  %3035 = vmatpush.bf16.msra.mxu1 %v3004_v0  ;;  %v3001_v4 = vld [vmem:[%s4737_s5] sm:$0xff]  ;;  %v2995_v6 = vld [vmem:[%s3690_s21 + $0x10] sm:$0xff]  ;;  %vm835_vm1 = vcmask 523264   ;;  %v3379_v9 = vmov 0.0   ;;  %v2994_v10 = vld [vmem:[%s3690_s21 + $0x8] sm:$0xff] }
  0x93   : > { %804 = vst.msk [vmem:[#allocation3 + $0x8] sm:$0xff] %vm802_vm0, %v3378_v1  ;;  %3036 = vmatpush.bf16.msra.mxu2 %v3004_v0  ;;  %3037 = vmatpush.bf16.msra.mxu3 %v3004_v0  ;;  %v2993_v5 = vld [vmem:[%s3690_s21] sm:$0xff]  ;;  %v2999_v8 = vld [vmem:[%s3690_s21 + $0x30] sm:$0xff]  ;;  %v2996_v11 = vld [vmem:[%s3690_s21 + $0x18] sm:$0xff]  ;;  %vm1142_vm2 = vcmask 519168  }
  0x94   : > { %805 = vst.msk [vmem:[#allocation3 + $0x10] sm:$0xff] %vm802_vm0, %v3378_v1  ;;  %v2997_v7 = vld [vmem:[%s3690_s21 + $0x20] sm:$0xff]  ;;  %v2998_v12 = vld [vmem:[%s3690_s21 + $0x28] sm:$0xff]  ;;  %v3000_v13 = vld [vmem:[%s3690_s21 + $0x38] sm:$0xff] }
  0x95   : > { %806 = vst.msk [vmem:[#allocation3 + $0x18] sm:$0xff] %vm802_vm0, %v3378_v1  ;;  %v852_v14 = vld [vmem:[%s3690_s21] sm:$0xff]   ;;  %v856_v15 = vld [vmem:[%s3690_s21 + $0x10] sm:$0xff]   ;;  %v869_v38 = vld [vmem:[%s3707_s8 + $0x8] sm:$0xff] }
  0x96   : > { %807 = vst.msk [vmem:[#allocation3 + $0x20] sm:$0xff] %vm802_vm0, %v3378_v1  ;;  %1002 = vmatpush.bf16.msra.mxu0 %v3003_v2  ;;  %3038 = vmatpush.bf16.msra.mxu1 %v3003_v2  ;;  %v1046_v16 = vunpack.c.l.bf16 %v852_v14  ;;  %v1050_v17 = vunpack.c.l.bf16 %v856_v15  ;;  %v868_v18 = vld [vmem:[%s3707_s8] sm:$0xff]  ;;  %v864_v25 = vld [vmem:[%s3690_s21 + $0x30] sm:$0xff]   ;;  %v1047_v36 = vunpack.c.h.bf16 %v852_v14  ;;  %v1051_v37 = vunpack.c.h.bf16 %v856_v15  ;;  %v873_v39 = vld [vmem:[%s3707_s8 + $0x28] sm:$0xff] }
  0x97   : > { %808 = vst.msk [vmem:[#allocation3 + $0x28] sm:$0xff] %vm802_vm0, %v3378_v1  ;;  %3039 = vmatpush.bf16.msra.mxu2 %v3003_v2  ;;  %3040 = vmatpush.bf16.msra.mxu3 %v3003_v2  ;;  %v872_v19 = vld [vmem:[%s3707_s8 + $0x20] sm:$0xff]  ;;  %v1058_v31 = vunpack.c.l.bf16 %v864_v25  ;;  %v2713_v46 = vld [vmem:[%s3707_s8 + $0x88] sm:$0xff]  ;;  %v3808_v59 = vld [vmem:[%s3690_s21 + $0x18] sm:$0xff]  }
  0x98   : > { %809 = vst.msk [vmem:[#allocation3 + $0x30] sm:$0xff] %vm802_vm0, %v3378_v1  ;;  %v2712_v20 = vld [vmem:[%s3707_s8 + $0x80] sm:$0xff]  ;;  %v1062_v22 = vmul.f32 %v1046_v16, %v868_v18  ;;  %v1066_v23 = vmul.f32 %v1050_v17, %v872_v19  ;;  %v2717_v47 = vld [vmem:[%s3707_s8 + $0xa8] sm:$0xff]  ;;  %v1063_v52 = vmul.f32 %v1047_v36, %v869_v38  ;;  %v1067_v53 = vmul.f32 %v1051_v37, %v873_v39 }
  0x99   : > { %810 = vst.msk [vmem:[#allocation3 + $0x38] sm:$0xff] %vm802_vm0, %v3378_v1  ;;  %v2716_v21 = vld [vmem:[%s3707_s8 + $0xa0] sm:$0xff]  ;;  %v3805_v58 = vld [vmem:[%s3690_s21 + $0x8] sm:$0xff]  }
  0x9a   : > { %811 = vst.msk [vmem:[#allocation3 + $0x40] sm:$0xff] %vm802_vm0, %v3378_v1  ;;  %1003 = vmatpush.bf16.msra.mxu0 %v3002_v3  ;;  %3041 = vmatpush.bf16.msra.mxu1 %v3002_v3  ;;  %v860_v24 = vld [vmem:[%s3690_s21 + $0x20] sm:$0xff]   ;;  %v2721_v14 = vld [vmem:[%s3707_s8 + $0xc8] sm:$0xff] }
  0x9b   : > { %812 = vst.msk [vmem:[#allocation3 + $0x48] sm:$0xff] %vm802_vm0, %v3378_v1  ;;  %3042 = vmatpush.bf16.msra.mxu2 %v3002_v3  ;;  %3043 = vmatpush.bf16.msra.mxu3 %v3002_v3  ;;  %v1054_v30 = vunpack.c.l.bf16 %v860_v24  ;;  %v876_v34 = vld [vmem:[%s3707_s8 + $0x40] sm:$0xff]  ;;  %v1055_v0 = vunpack.c.h.bf16 %v860_v24  ;;  %v2725_v15 = vld [vmem:[%s3707_s8 + $0xe8] sm:$0xff] }
  0x9c   : > { %813 = vst.msk [vmem:[#allocation3 + $0x50] sm:$0xff] %vm802_vm0, %v3378_v1  ;;  %v880_v35 = vld [vmem:[%s3707_s8 + $0x60] sm:$0xff] }
  0x9d   : > { %814 = vst.msk [vmem:[#allocation3 + $0x58] sm:$0xff] %vm802_vm0, %v3378_v1  ;;  %v2720_v42 = vld [vmem:[%s3707_s8 + $0xc0] sm:$0xff]  ;;  %v1070_v44 = vmul.f32 %v1054_v30, %v876_v34  ;;  %v1074_v45 = vmul.f32 %v1058_v31, %v880_v35 }
  0x9e   : > { %815 = vst.msk [vmem:[#allocation3 + $0x60] sm:$0xff] %vm802_vm0, %v3378_v1  ;;  %1004 = vmatpush.bf16.msra.mxu0 %v3001_v4  ;;  %3044 = vmatpush.bf16.msra.mxu1 %v3001_v4  ;;  %v2724_v43 = vld [vmem:[%s3707_s8 + $0xe0] sm:$0xff] }
  0x9f   : > { %816 = vst.msk [vmem:[#allocation3 + $0x68] sm:$0xff] %vm802_vm0, %v3378_v1  ;;  %3045 = vmatpush.bf16.msra.mxu2 %v3001_v4  ;;  %3046 = vmatpush.bf16.msra.mxu3 %v3001_v4  ;;  %v877_v4 = vld [vmem:[%s3707_s8 + $0x48] sm:$0xff] }
  0xa0   : > { %817 = vst.msk [vmem:[#allocation3 + $0x70] sm:$0xff] %vm802_vm0, %v3378_v1  ;;  %v1071_v18 = vmul.f32 %v1055_v0, %v877_v4 }
  0xa1   : > { %818 = vst.msk [vmem:[#allocation3 + $0x78] sm:$0xff] %vm802_vm0, %v3378_v1  ;;  %2776 = vmatmul.msk.bf16.vlgmr.msra.gmra.mxu0 %vm835_vm1, %v2993_v5  ;;  %2778 = vmatmul.msk.bf16.vlgmr.msra.gmra.mxu1 %vm835_vm1, %v2995_v6  ;;  %v1059_v1 = vunpack.c.h.bf16 %v864_v25  ;;  %v881_v5 = vld [vmem:[%s3707_s8 + $0x68] sm:$0xff]  ;;  %v1048_v6 = vunpack.c.l.bf16 %v3805_v58 }
  0xa2   : > { %819 = vst.msk [vmem:[#allocation4] sm:$0xff] %vm802_vm0, %v3379_v9  ;;  %2780 = vmatmul.msk.bf16.vlgmr.msra.gmra.mxu2 %vm835_vm1, %v2997_v7  ;;  %2782 = vmatmul.msk.bf16.vlgmr.msra.gmra.mxu3 %vm835_vm1, %v2999_v8  ;;  %v1052_v7 = vunpack.c.l.bf16 %v3808_v59 }
  0xa3   : > { %820 = vst.msk [vmem:[#allocation4 + $0x8] sm:$0xff] %vm802_vm0, %v3379_v9  ;;  %v1075_v19 = vmul.f32 %v1059_v1, %v881_v5 }
  0xa4   : > { %821 = vst.msk [vmem:[#allocation4 + $0x10] sm:$0xff] %vm802_vm0, %v3379_v9 }
  0xa5   : > { %822 = vst.msk [vmem:[#allocation4 + $0x18] sm:$0xff] %vm802_vm0, %v3379_v9 }
  0xa6   : > { %823 = vst.msk [vmem:[#allocation4 + $0x20] sm:$0xff] %vm802_vm0, %v3379_v9 }
  0xa7   : > { %824 = vst.msk [vmem:[#allocation4 + $0x28] sm:$0xff] %vm802_vm0, %v3379_v9 }
  0xa8   : > { %825 = vst.msk [vmem:[#allocation4 + $0x30] sm:$0xff] %vm802_vm0, %v3379_v9 }
  0xa9   : > { %826 = vst.msk [vmem:[#allocation4 + $0x38] sm:$0xff] %vm802_vm0, %v3379_v9 }
  0xaa   : > { %827 = vst.msk [vmem:[#allocation4 + $0x40] sm:$0xff] %vm802_vm0, %v3379_v9 }
  0xab   : > { %828 = vst.msk [vmem:[#allocation4 + $0x48] sm:$0xff] %vm802_vm0, %v3379_v9 }
  0xac   : > { %829 = vst.msk [vmem:[#allocation4 + $0x50] sm:$0xff] %vm802_vm0, %v3379_v9 }
  0xad   : > { %830 = vst.msk [vmem:[#allocation4 + $0x58] sm:$0xff] %vm802_vm0, %v3379_v9 }
  0xae   : > { %831 = vst.msk [vmem:[#allocation4 + $0x60] sm:$0xff] %vm802_vm0, %v3379_v9 }
  0xaf   : > { %832 = vst.msk [vmem:[#allocation4 + $0x68] sm:$0xff] %vm802_vm0, %v3379_v9 }
  0xb0   : > { %833 = vst.msk [vmem:[#allocation4 + $0x70] sm:$0xff] %vm802_vm0, %v3379_v9 }
  0xb1   : > { %834 = vst.msk [vmem:[#allocation4 + $0x78] sm:$0xff] %vm802_vm0, %v3379_v9  ;;  %2777 = vmatmul.msk.bf16.gmra.mxu0 %vm835_vm1, %v2994_v10  ;;  %2779 = vmatmul.msk.bf16.gmra.mxu1 %vm835_vm1, %v2996_v11  ;;  %v870_v10 = vld [vmem:[%s3707_s8 + $0x10] sm:$0xff] }
  0xb2   : > { %836 = vst.msk [vmem:[#allocation5] sm:$0xff] %vm835_vm1, %v3379_v9  ;;  %2781 = vmatmul.msk.bf16.gmra.mxu2 %vm835_vm1, %v2998_v12  ;;  %2783 = vmatmul.msk.bf16.gmra.mxu3 %vm835_vm1, %v3000_v13  ;;  %v874_v11 = vld [vmem:[%s3707_s8 + $0x30] sm:$0xff] }
  0xb3   : > { %837 = vst.msk [vmem:[#allocation5 + $0x8] sm:$0xff] %vm835_vm1, %v3379_v9 }
  0xb4   : > { %838 = vst.msk [vmem:[#allocation5 + $0x10] sm:$0xff] %vm835_vm1, %v3379_v9 }
  0xb5   : > { %839 = vst.msk [vmem:[#allocation5 + $0x18] sm:$0xff] %vm835_vm1, %v3379_v9 }
  0xb6   : > { %840 = vst.msk [vmem:[#allocation5 + $0x20] sm:$0xff] %vm835_vm1, %v3379_v9 }
  0xb7   : > { %841 = vst.msk [vmem:[#allocation5 + $0x28] sm:$0xff] %vm835_vm1, %v3379_v9 }
  0xb8   : > { %842 = vst.msk [vmem:[#allocation5 + $0x30] sm:$0xff] %vm835_vm1, %v3379_v9 }
  0xb9   : > { %843 = vst.msk [vmem:[#allocation5 + $0x38] sm:$0xff] %vm835_vm1, %v3379_v9 }
  0xba   : > { %844 = vst.msk [vmem:[#allocation5 + $0x40] sm:$0xff] %vm835_vm1, %v3379_v9 }
  0xbb   : > { %845 = vst.msk [vmem:[#allocation5 + $0x48] sm:$0xff] %vm835_vm1, %v3379_v9 }
  0xbc   : > { %846 = vst.msk [vmem:[#allocation5 + $0x50] sm:$0xff] %vm835_vm1, %v3379_v9 }
  0xbd   : > { %847 = vst.msk [vmem:[#allocation5 + $0x58] sm:$0xff] %vm835_vm1, %v3379_v9 }
  0xbe   : > { %848 = vst.msk [vmem:[#allocation5 + $0x60] sm:$0xff] %vm835_vm1, %v3379_v9 }
  0xbf   : > { %849 = vst.msk [vmem:[#allocation5 + $0x68] sm:$0xff] %vm835_vm1, %v3379_v9 }
  0xc0   : > { %850 = vst.msk [vmem:[#allocation5 + $0x70] sm:$0xff] %vm835_vm1, %v3379_v9 }
  0xc1   : > { %851 = vst.msk [vmem:[#allocation5 + $0x78] sm:$0xff] %vm835_vm1, %v3379_v9 }
 0x11e   : > { %v1006_v26 = vpop.f32.mrf.mxu0  ;;  %v1016_v27 = vpop.f32.mrf.mxu1 }
 0x11f   : > { %v1078_v28 = vmul.f32 %v2712_v20, %v1006_v26  ;;  %v1082_v29 = vmul.f32 %v2716_v21, %v1016_v27  ;;  %v2714_v20 = vld [vmem:[%s3707_s8 + $0x90] sm:$0xff]  ;;  %v1064_v26 = vmul.f32 %v1048_v6, %v870_v10  ;;  %v1068_v27 = vmul.f32 %v1052_v7, %v874_v11 }
 0x120   : > { %v2718_v21 = vld [vmem:[%s3707_s8 + $0xb0] sm:$0xff] }
 0x121   : > { %v1094_v32 = vadd.f32 %v1078_v28, %v1062_v22  ;;  %v1098_v33 = vadd.f32 %v1082_v29, %v1066_v23  ;;  %v3823_v28 = vld [vmem:[%s3690_s21 + $0x28] sm:$0xff]   ;;  %v3826_v29 = vld [vmem:[%s3690_s21 + $0x38] sm:$0xff]  }
 0x122   : > { %v1056_v38 = vunpack.c.l.bf16 %v3823_v28  ;;  %v1060_v39 = vunpack.c.l.bf16 %v3826_v29  ;;  %v1057_v10 = vunpack.c.h.bf16 %v3823_v28  ;;  %v1061_v11 = vunpack.c.h.bf16 %v3826_v29 }
 0x123   : > { %v1110_v40 = vmul.f32 0.125, %v1094_v32  ;;  %v1114_v41 = vmul.f32 0.125, %v1098_v33 }
 0x125   : > { %v1126_v48 = vpack.c.bf16 %v1110_v40, %v1110_v40  ;;  %v1130_v49 = vpack.c.bf16 %v1114_v41, %v1114_v41  ;;  %v1026_v50 = vpop.f32.mrf.mxu2  ;;  %v1036_v51 = vpop.f32.mrf.mxu3 }
 0x126   : > { %v1086_v54 = vmul.f32 %v2720_v42, %v1026_v50  ;;  %v1090_v55 = vmul.f32 %v2724_v43, %v1036_v51  ;;  %v1008_v56 = vpop.f32.mrf.mxu0  ;;  %v1018_v57 = vpop.f32.mrf.mxu1  ;;  %v878_v42 = vld [vmem:[%s3707_s8 + $0x50] sm:$0xff] }
 0x127   : > { %1143 = vst.msk [vmem:[#allocation2] sm:$0xf] %vm1142_vm2, %v1126_v48  ;;  %v1079_v60 = vmul.f32 %v2713_v46, %v1008_v56  ;;  %v1083_v61 = vmul.f32 %v2717_v47, %v1018_v57  ;;  %v882_v43 = vld [vmem:[%s3707_s8 + $0x70] sm:$0xff]  ;;  %v871_v48 = vld [vmem:[%s3707_s8 + $0x18] sm:$0xff]  ;;  %v1072_v56 = vmul.f32 %v1056_v38, %v878_v42 }
 0x128   : > { %1147 = vst.msk [vmem:[#allocation2 + $0x10] sm:$0xf] %vm1142_vm2, %v1130_v49  ;;  %v1102_v62 = vadd.f32 %v1086_v54, %v1070_v44  ;;  %v1106_v63 = vadd.f32 %v1090_v55, %v1074_v45  ;;  %v1049_v44 = vunpack.c.h.bf16 %v3805_v58  ;;  %v1053_v45 = vunpack.c.h.bf16 %v3808_v59  ;;  %v875_v49 = vld [vmem:[%s3707_s8 + $0x38] sm:$0xff] }
 0x129   : > { %v1095_v2 = vadd.f32 %v1079_v60, %v1063_v52  ;;  %v1099_v3 = vadd.f32 %v1083_v61, %v1067_v53  ;;  %v2722_v52 = vld [vmem:[%s3707_s8 + $0xd0] sm:$0xff]  ;;  %v1076_v57 = vmul.f32 %v1060_v39, %v882_v43  ;;  %v2715_v60 = vld [vmem:[%s3707_s8 + $0x98] sm:$0xff] }
 0x12a   : > { %v1118_v8 = vmul.f32 0.125, %v1102_v62  ;;  %v1122_v9 = vmul.f32 0.125, %v1106_v63  ;;  %v2726_v53 = vld [vmem:[%s3707_s8 + $0xf0] sm:$0xff]  ;;  %v2719_v61 = vld [vmem:[%s3707_s8 + $0xb8] sm:$0xff]  ;;  %v1065_v1 = vmul.f32 %v1049_v44, %v871_v48  ;;  %v1069_v59 = vmul.f32 %v1053_v45, %v875_v49 }
 0x12b   : > { %v1111_v12 = vmul.f32 0.125, %v1095_v2  ;;  %v1115_v13 = vmul.f32 0.125, %v1099_v3 }
 0x12c   : > { %v1134_v16 = vpack.c.bf16 %v1118_v8, %v1118_v8  ;;  %v1138_v17 = vpack.c.bf16 %v1122_v9, %v1122_v9 }
 0x12d   : > { %v1127_v22 = vpack.c.bf16 %v1111_v12, %v1111_v12  ;;  %v1131_v23 = vpack.c.bf16 %v1115_v13, %v1115_v13  ;;  %v1028_v24 = vpop.f32.mrf.mxu2  ;;  %v1038_v25 = vpop.f32.mrf.mxu3 }
 0x12e   : > { %1151 = vst.msk [vmem:[#allocation2 + $0x20] sm:$0xf] %vm1142_vm2, %v1134_v16  ;;  %v1087_v30 = vmul.f32 %v2721_v14, %v1028_v24  ;;  %v1091_v31 = vmul.f32 %v2725_v15, %v1038_v25  ;;  %v1011_v32 = vpop.f32.mrf.mxu0  ;;  %v1021_v33 = vpop.f32.mrf.mxu1  ;;  %v879_v14 = vld [vmem:[%s3707_s8 + $0x58] sm:$0xff] }
 0x12f   : > { %1155 = vst.msk [vmem:[#allocation2 + $0x30] sm:$0xf] %vm1142_vm2, %v1138_v17  ;;  %v1080_v34 = vmul.f32 %v2714_v20, %v1011_v32  ;;  %v1084_v35 = vmul.f32 %v2718_v21, %v1021_v33  ;;  %v883_v15 = vld [vmem:[%s3707_s8 + $0x78] sm:$0xff]  ;;  %v1073_v24 = vmul.f32 %v1057_v10, %v879_v14 }
 0x130   : > { %1144 = vst.msk [vmem:[#allocation2 + $0x4] sm:$0xf] %vm1142_vm2, %v1127_v22  ;;  %v1103_v36 = vadd.f32 %v1087_v30, %v1071_v18  ;;  %v1107_v37 = vadd.f32 %v1091_v31, %v1075_v19  ;;  %v2723_v20 = vld [vmem:[%s3707_s8 + $0xd8] sm:$0xff]  ;;  %v1077_v25 = vmul.f32 %v1061_v11, %v883_v15 }
 0x131   : > { %1148 = vst.msk [vmem:[#allocation2 + $0x14] sm:$0xf] %vm1142_vm2, %v1131_v23  ;;  %v1096_v40 = vadd.f32 %v1080_v34, %v1064_v26  ;;  %v1100_v41 = vadd.f32 %v1084_v35, %v1068_v27  ;;  %v2727_v21 = vld [vmem:[%s3707_s8 + $0xf8] sm:$0xff] }
 0x132   : > { %v1119_v46 = vmul.f32 0.125, %v1103_v36  ;;  %v1123_v47 = vmul.f32 0.125, %v1107_v37 }
 0x133   : > { %v1112_v50 = vmul.f32 0.125, %v1096_v40  ;;  %v1116_v51 = vmul.f32 0.125, %v1100_v41 }
 0x134   : > { %v1135_v54 = vpack.c.bf16 %v1119_v46, %v1119_v46  ;;  %v1139_v55 = vpack.c.bf16 %v1123_v47, %v1123_v47 }
 0x135   : > { %v1128_v62 = vpack.c.bf16 %v1112_v50, %v1112_v50  ;;  %v1132_v63 = vpack.c.bf16 %v1116_v51, %v1116_v51  ;;  %v1031_v0 = vpop.f32.mrf.mxu2  ;;  %v1041_v58 = vpop.f32.mrf.mxu3 }
 0x136   : > { %1152 = vst.msk [vmem:[#allocation2 + $0x24] sm:$0xf] %vm1142_vm2, %v1135_v54  ;;  %v1088_v2 = vmul.f32 %v2722_v52, %v1031_v0  ;;  %v1092_v3 = vmul.f32 %v2726_v53, %v1041_v58  ;;  %v1013_v4 = vpop.f32.mrf.mxu0  ;;  %v1023_v5 = vpop.f32.mrf.mxu1 }
 0x137   : > { %1156 = vst.msk [vmem:[#allocation2 + $0x34] sm:$0xf] %vm1142_vm2, %v1139_v55  ;;  %v1081_v6 = vmul.f32 %v2715_v60, %v1013_v4  ;;  %v1085_v7 = vmul.f32 %v2719_v61, %v1023_v5 }
 0x138   : > { %1145 = vst.msk [vmem:[#allocation2 + $0x8] sm:$0xf] %vm1142_vm2, %v1128_v62  ;;  %v1104_v8 = vadd.f32 %v1088_v2, %v1072_v56  ;;  %v1108_v9 = vadd.f32 %v1092_v3, %v1076_v57 }
 0x139   : > { %1149 = vst.msk [vmem:[#allocation2 + $0x18] sm:$0xf] %vm1142_vm2, %v1132_v63  ;;  %v1097_v12 = vadd.f32 %v1081_v6, %v1065_v1  ;;  %v1101_v13 = vadd.f32 %v1085_v7, %v1069_v59 }
 0x13a   : > { %v1120_v16 = vmul.f32 0.125, %v1104_v8  ;;  %v1124_v17 = vmul.f32 0.125, %v1108_v9 }
 0x13b   : > { %v1113_v18 = vmul.f32 0.125, %v1097_v12  ;;  %v1117_v19 = vmul.f32 0.125, %v1101_v13 }
 0x13c   : > { %v1136_v22 = vpack.c.bf16 %v1120_v16, %v1120_v16  ;;  %v1140_v23 = vpack.c.bf16 %v1124_v17, %v1124_v17 }
 0x13d   : > { %v1129_v26 = vpack.c.bf16 %v1113_v18, %v1113_v18  ;;  %v1133_v27 = vpack.c.bf16 %v1117_v19, %v1117_v19  ;;  %v1033_v28 = vpop.f32.mrf.mxu2  ;;  %v1043_v29 = vpop.f32.mrf.mxu3 }
 0x13e   : > { %1153 = vst.msk [vmem:[#allocation2 + $0x28] sm:$0xf] %vm1142_vm2, %v1136_v22  ;;  %v1089_v30 = vmul.f32 %v2723_v20, %v1033_v28  ;;  %v1093_v31 = vmul.f32 %v2727_v21, %v1043_v29 }
 0x13f   : > { %1157 = vst.msk [vmem:[#allocation2 + $0x38] sm:$0xf] %vm1142_vm2, %v1140_v23 }
 0x140   : > { %1146 = vst.msk [vmem:[#allocation2 + $0xc] sm:$0xf] %vm1142_vm2, %v1129_v26  ;;  %v1105_v32 = vadd.f32 %v1089_v30, %v1073_v24  ;;  %v1109_v33 = vadd.f32 %v1093_v31, %v1077_v25 }
 0x141   : > { %1150 = vst.msk [vmem:[#allocation2 + $0x1c] sm:$0xf] %vm1142_vm2, %v1133_v27 }
 0x142   : > { %v1121_v34 = vmul.f32 0.125, %v1105_v32  ;;  %v1125_v35 = vmul.f32 0.125, %v1109_v33 }
 0x144   : > { %v1137_v36 = vpack.c.bf16 %v1121_v34, %v1121_v34  ;;  %v1141_v37 = vpack.c.bf16 %v1125_v35, %v1125_v35 }
 0x146   : > { %1154 = vst.msk [vmem:[#allocation2 + $0x2c] sm:$0xf] %vm1142_vm2, %v1137_v36 }
 0x147   : > { %1158 = vst.msk [vmem:[#allocation2 + $0x3c] sm:$0xf] %vm1142_vm2, %v1141_v37 }
 0x148 PF: > { %s2784_s13 = sshll.u32 %s3344_s25, 7  ;;  %s3005_s21 = sshll.u32 %s3348_s26, 7 }
 0x149   : > { %s3006_s23 = sadd.s32 128, %s3005_s21 }
 0x14a   : > { %p2786_p6 = scmp.ge.s32.totalorder %s2784_s13, %s3006_s23 }
 0x14c   : > { %1165 = sbr.rel (%p2786_p6) target bundleno = 1408 (0x580), region = 128 }
 0x151   : > { %v3018_v38 = vld [vmem:[%s4737_s5 + $0x18] sm:$0xff]  ;;  %v3017_v39 = vld [vmem:[%s4737_s5 + $0x10] sm:$0xff]  ;;  %v3016_v40 = vld [vmem:[%s4737_s5 + $0x8] sm:$0xff]  ;;  %vm1287_vm3 = vcmask 523264   ;;  %vm1993_vm0 = vcmask 7168  }
 0x152   : > { %1316 = vmatpush.bf16.msra.mxu0 %v3018_v38  ;;  %v3015_v41 = vld [vmem:[%s4737_s5] sm:$0xff]  ;;  %v3008_v43 = vld [vmem:[%s3700_s18 + $0x608] sm:$0xff]  ;;  %v3009_v44 = vld [vmem:[%s3700_s18 + $0x610] sm:$0xff] }
 0x153   : > { %v3007_v42 = vld [vmem:[%s3700_s18 + $0x600] sm:$0xff]  ;;  %v3010_v45 = vld [vmem:[%s3700_s18 + $0x618] sm:$0xff]  ;;  %v3012_v47 = vld [vmem:[%s3700_s18 + $0x628] sm:$0xff] }
 0x154   : > { %v3011_v46 = vld [vmem:[%s3700_s18 + $0x620] sm:$0xff]  ;;  %v3013_v48 = vld [vmem:[%s3700_s18 + $0x630] sm:$0xff]  ;;  %v3014_v49 = vld [vmem:[%s3700_s18 + $0x638] sm:$0xff] }
 0x155   : > { %v2787_v50 = vld [vmem:[%s3700_s18 + $0x600] sm:$0xff]   ;;  %v1183_v56 = vld [vmem:[%s3709_s0 + $0x8] sm:$0xff]  ;;  %v1184_v6 = vld [vmem:[%s3709_s0 + $0x10] sm:$0xff] }
 0x156   : > { %1317 = vmatpush.bf16.msra.mxu0 %v3017_v39  ;;  %v1361_v52 = vunpack.c.l.bf16 %v2787_v50  ;;  %v1362_v53 = vunpack.c.h.bf16 %v2787_v50  ;;  %v1182_v54 = vld [vmem:[%s3709_s0] sm:$0xff]  ;;  %v2804_v57 = vld [vmem:[%s3709_s0 + $0x88] sm:$0xff]  ;;  %v2805_v7 = vld [vmem:[%s3709_s0 + $0x90] sm:$0xff] }
 0x157   : > { %v2803_v55 = vld [vmem:[%s3709_s0 + $0x80] sm:$0xff]  ;;  %v2789_v2 = vld [vmem:[%s3700_s18 + $0x608] sm:$0xff]   ;;  %v1185_v8 = vld [vmem:[%s3709_s0 + $0x18] sm:$0xff] }
 0x158   : > { %v1377_v60 = vmul.f32 %v1361_v52, %v1182_v54  ;;  %v1378_v62 = vmul.f32 %v1362_v53, %v1183_v56  ;;  %v1363_v4 = vunpack.c.l.bf16 %v2789_v2  ;;  %v1364_v5 = vunpack.c.h.bf16 %v2789_v2  ;;  %v2806_v9 = vld [vmem:[%s3709_s0 + $0x98] sm:$0xff]  ;;  %v2791_v18 = vld [vmem:[%s3700_s18 + $0x610] sm:$0xff]   ;;  %v1186_v22 = vld [vmem:[%s3709_s0 + $0x20] sm:$0xff] }
 0x159   : > { %v1365_v20 = vunpack.c.l.bf16 %v2791_v18  ;;  %v1366_v21 = vunpack.c.h.bf16 %v2791_v18  ;;  %v2807_v23 = vld [vmem:[%s3709_s0 + $0xa0] sm:$0xff]  ;;  %v1187_v24 = vld [vmem:[%s3709_s0 + $0x28] sm:$0xff]  ;;  %v2793_v34 = vld [vmem:[%s3700_s18 + $0x618] sm:$0xff]  }
 0x15a   : > { %1318 = vmatpush.bf16.msra.mxu0 %v3016_v40  ;;  %v1379_v10 = vmul.f32 %v1363_v4, %v1184_v6  ;;  %v1380_v12 = vmul.f32 %v1364_v5, %v1185_v8  ;;  %v2808_v25 = vld [vmem:[%s3709_s0 + $0xa8] sm:$0xff]  ;;  %v1367_v36 = vunpack.c.l.bf16 %v2793_v34  ;;  %v1368_v37 = vunpack.c.h.bf16 %v2793_v34  ;;  %v1188_v38 = vld [vmem:[%s3709_s0 + $0x30] sm:$0xff]  ;;  %v1189_v40 = vld [vmem:[%s3709_s0 + $0x38] sm:$0xff] }
 0x15b   : > { %v1381_v26 = vmul.f32 %v1365_v20, %v1186_v22  ;;  %v1382_v28 = vmul.f32 %v1366_v21, %v1187_v24  ;;  %v2809_v39 = vld [vmem:[%s3709_s0 + $0xb0] sm:$0xff]  ;;  %v2795_v50 = vld [vmem:[%s3700_s18 + $0x620] sm:$0xff]   ;;  %v1191_v56 = vld [vmem:[%s3709_s0 + $0x48] sm:$0xff] }
 0x15c   : > { %v1369_v52 = vunpack.c.l.bf16 %v2795_v50  ;;  %v1370_v53 = vunpack.c.h.bf16 %v2795_v50  ;;  %v1190_v54 = vld [vmem:[%s3709_s0 + $0x40] sm:$0xff]  ;;  %v1197_v18 = vld [vmem:[%s3709_s0 + $0x78] sm:$0xff] }
 0x15d   : > { %v2818_v20 = vld [vmem:[%s3709_s0 + $0xf8] sm:$0xff]  ;;  %v2815_v34 = vld [vmem:[%s3709_s0 + $0xe0] sm:$0xff] }
 0x15e   : > { %1319 = vmatpush.bf16.msra.mxu0 %v3015_v41  ;;  %v2810_v41 = vld [vmem:[%s3709_s0 + $0xb8] sm:$0xff] }
 0x15f   : > { %v2814_v50 = vld [vmem:[%s3709_s0 + $0xd8] sm:$0xff] }
 0x161   : > { %2867 = vmatmul.msk.bf16.vlgmr.msra.gmra.mxu0 %vm1287_vm3, %v3007_v42  ;;  %v1383_v42 = vmul.f32 %v1367_v36, %v1188_v38 }
 0x171   : > { %2868 = vmatmul.msk.bf16.gmra.mxu0 %vm1287_vm3, %v3008_v43 }
 0x181   : > { %2869 = vmatmul.msk.bf16.gmra.mxu0 %vm1287_vm3, %v3009_v44  ;;  %v1384_v44 = vmul.f32 %v1368_v37, %v1189_v40 }
 0x191   : > { %2870 = vmatmul.msk.bf16.gmra.mxu0 %vm1287_vm3, %v3010_v45 }
 0x1a1   : > { %2871 = vmatmul.msk.bf16.gmra.mxu0 %vm1287_vm3, %v3011_v46 }
 0x1b1   : > { %2872 = vmatmul.msk.bf16.gmra.mxu0 %vm1287_vm3, %v3012_v47 }
 0x1c1   : > { %2873 = vmatmul.msk.bf16.gmra.mxu0 %vm1287_vm3, %v3013_v48 }
 0x1d1   : > { %2874 = vmatmul.msk.bf16.gmra.mxu0 %vm1287_vm3, %v3014_v49 }
 0x1de   : > { %v1321_v51 = vpop.f32.mrf.mxu0 }
 0x1df   : > { %v1393_v61 = vmul.f32 %v2803_v55, %v1321_v51  ;;  %v2811_v55 = vld [vmem:[%s3709_s0 + $0xc0] sm:$0xff] }
 0x1e1   : > { %v3899_v58 = vadd.f32 %v1393_v61, %v1377_v60  ;;  %v1385_v60 = vmul.f32 %v1369_v52, %v1190_v54  ;;  %v2813_v54 = vld [vmem:[%s3709_s0 + $0xd0] sm:$0xff] }
 0x1e6   : > { %v1323_v63 = vpop.f32.mrf.mxu0 }
 0x1e7   : > { %v1394_v0 = vmul.f32 %v2804_v57, %v1323_v63  ;;  %v2812_v57 = vld [vmem:[%s3709_s0 + $0xc8] sm:$0xff] }
 0x1e9   : > { %v3901_v1 = vadd.f32 %v1394_v0, %v1378_v62  ;;  %v1386_v62 = vmul.f32 %v1370_v53, %v1191_v56  ;;  %v1192_v53 = vld [vmem:[%s3709_s0 + $0x50] sm:$0xff] }
 0x1eb   : > { %v1425_v59 = vpack.c.bf16 %v3901_v1, %v3899_v58  ;;  %v3022_v58 = vld [vmem:[#allocation2 + $0x18] sm:$0xff]  ;;  %v3023_v1 = vld [vmem:[#allocation2 + $0x20] sm:$0xff] }
 0x1ee   : > { %v1326_v3 = vpop.f32.mrf.mxu0 }
 0x1ef   : > { %v1395_v11 = vmul.f32 %v2805_v7, %v1326_v3 }
 0x1f1   : > { %v3910_v15 = vadd.f32 %v1395_v11, %v1379_v10 }
 0x1f6   : > { %v1328_v13 = vpop.f32.mrf.mxu0 }
 0x1f7   : > { %v1396_v14 = vmul.f32 %v2806_v9, %v1328_v13  ;;  %v2801_v9 = vld [vmem:[%s3700_s18 + $0x638] sm:$0xff]   ;;  %v1196_v13 = vld [vmem:[%s3709_s0 + $0x70] sm:$0xff] }
 0x1f8   : > { %v1375_v11 = vunpack.c.l.bf16 %v2801_v9 }
 0x1f9   : > { %v3912_v16 = vadd.f32 %v1396_v14, %v1380_v12  ;;  %v1376_v12 = vunpack.c.h.bf16 %v2801_v9  ;;  %v2817_v14 = vld [vmem:[%s3709_s0 + $0xf0] sm:$0xff] }
 0x1fa   : > { %v1391_v22 = vmul.f32 %v1375_v11, %v1196_v13 }
 0x1fb   : > { %v1426_v17 = vpack.c.bf16 %v3912_v16, %v3910_v15  ;;  %v1392_v24 = vmul.f32 %v1376_v12, %v1197_v18  ;;  %v3024_v15 = vld [vmem:[#allocation2 + $0x28] sm:$0xff]  ;;  %v3021_v16 = vld [vmem:[#allocation2 + $0x10] sm:$0xff] }
 0x1fe   : > { %v1331_v19 = vpop.f32.mrf.mxu0 }
 0x1ff   : > { %v1397_v27 = vmul.f32 %v2807_v23, %v1331_v19  ;;  %v2799_v19 = vld [vmem:[%s3700_s18 + $0x630] sm:$0xff]  }
 0x200   : > { %v1374_v21 = vunpack.c.h.bf16 %v2799_v19 }
 0x201   : > { %v3921_v31 = vadd.f32 %v1397_v27, %v1381_v26  ;;  %v2816_v26 = vld [vmem:[%s3709_s0 + $0xe8] sm:$0xff] }
 0x206   : > { %v1333_v29 = vpop.f32.mrf.mxu0 }
 0x207   : > { %v1398_v30 = vmul.f32 %v2808_v25, %v1333_v29  ;;  %v1195_v25 = vld [vmem:[%s3709_s0 + $0x68] sm:$0xff] }
 0x209   : > { %v3923_v32 = vadd.f32 %v1398_v30, %v1382_v28  ;;  %v1373_v28 = vunpack.c.l.bf16 %v2799_v19  ;;  %v1194_v30 = vld [vmem:[%s3709_s0 + $0x60] sm:$0xff] }
 0x20b   : > { %v1427_v33 = vpack.c.bf16 %v3923_v32, %v3921_v31  ;;  %v3020_v31 = vld [vmem:[#allocation2 + $0x8] sm:$0xff] }
 0x20e   : > { %v1336_v35 = vpop.f32.mrf.mxu0 }
 0x20f   : > { %v1399_v43 = vmul.f32 %v2809_v39, %v1336_v35  ;;  %v1390_v35 = vmul.f32 %v1374_v21, %v1195_v25  ;;  %v1389_v39 = vmul.f32 %v1373_v28, %v1194_v30  ;;  %v3026_v30 = vld [vmem:[#allocation2 + $0x38] sm:$0xff] }
 0x211   : > { %v3932_v47 = vadd.f32 %v1399_v43, %v1383_v42  ;;  %v2797_v42 = vld [vmem:[%s3700_s18 + $0x628] sm:$0xff]  }
 0x212   : > { %v1372_v43 = vunpack.c.h.bf16 %v2797_v42 }
 0x216   : > { %v1338_v45 = vpop.f32.mrf.mxu0 }
 0x217   : > { %v1400_v46 = vmul.f32 %v2810_v41, %v1338_v45 }
 0x219   : > { %v3934_v48 = vadd.f32 %v1400_v46, %v1384_v44  ;;  %v1193_v46 = vld [vmem:[%s3709_s0 + $0x58] sm:$0xff] }
 0x21b   : > { %v1428_v49 = vpack.c.bf16 %v3934_v48, %v3932_v47  ;;  %v1514_v47 = vsel %vm1287_vm3, %v1425_v59, 0  ;;  %v3019_v48 = vld [vmem:[#allocation2] sm:$0xff]  ;;  %v1587_v59 = vlaneseq }
 0x21d   : > { %v3985_v32 = vshrl.u32 %v1587_v59, 7 }
 0x21e   : > { %v1341_v51 = vpop.f32.mrf.mxu0 }
 0x21f   : > { %v1401_v61 = vmul.f32 %v2811_v55, %v1341_v51  ;;  %v1371_v51 = vunpack.c.l.bf16 %v2797_v42  ;;  %v1388_v55 = vmul.f32 %v1372_v43, %v1193_v46  ;;  %v1589_v11 = vadd.s32 8, %v3985_v32 }
 0x220   : > { %v1590_v18 = vadd.s32 16, %v3985_v32  ;;  %v1599_v43 = vadd.s32 88, %v3985_v32 }
 0x221   : > { %v1417_v2 = vadd.f32 %v1401_v61, %v1385_v60  ;;  %v1387_v60 = vmul.f32 %v1371_v51, %v1192_v53  ;;  %v1600_v53 = vadd.s32 96, %v3985_v32 }
 0x226   : > { %v1343_v63 = vpop.f32.mrf.mxu0 }
 0x227   : > { %v1402_v0 = vmul.f32 %v2812_v57, %v1343_v63 }
 0x229   : > { %v1418_v3 = vadd.f32 %v1402_v0, %v1386_v62 }
 0x22b   : > { %v1429_v4 = vpack.c.bf16 %v1418_v3, %v1417_v2 }
 0x22e   : > { %v1346_v5 = vpop.f32.mrf.mxu0 }
 0x22f   : > { %v1403_v61 = vmul.f32 %v2813_v54, %v1346_v5  ;;  %v1523_v5 = vsel %vm1287_vm3, %v1428_v49, 0  ;;  %v3989_v49 = vstv %s3005_s21  ;;  %v1596_v54 = vadd.s32 64, %v3985_v32 }
 0x230   : > { %v3995_v9 = vadd.s32 %v3989_v49, %v3985_v32  ;;  %v4021_v21 = vadd.s32 %v3989_v49, %v1590_v18  ;;  %v4077_v46 = vadd.s32 %v3989_v49, %v1599_v43  ;;  %v4204_v43 = vld [vmem:[#allocation3 + $0x30] sm:$0xff] }
 0x231   : > { %v1419_v0 = vadd.f32 %v1403_v61, %v1387_v60  ;;  %v4110_v61 = vadd.s32 %v3989_v49, %v1596_v54 }
 0x236   : > { %v1348_v6 = vpop.f32.mrf.mxu0 }
 0x237   : > { %v1404_v56 = vmul.f32 %v2814_v50, %v1348_v6  ;;  %v1520_v6 = vsel %vm1287_vm3, %v1427_v33, 0  ;;  %v1622_v33 = vand.u32 127, %v1587_v59 }
 0x239   : > { %v1420_v62 = vadd.f32 %v1404_v56, %v1388_v55 }
 0x23b   : > { %v1430_v2 = vpack.c.bf16 %v1420_v62, %v1419_v0 }
 0x23d   : > { %v1529_v3 = vsel %vm1287_vm3, %v1430_v2, 0 }
 0x23e   : > { %v1351_v7 = vpop.f32.mrf.mxu0 }
 0x23f   : > { %v1405_v40 = vmul.f32 %v2815_v34, %v1351_v7  ;;  %v1526_v7 = vsel %vm1287_vm3, %v1429_v4, 0  ;;  %v1517_v4 = vsel %vm1287_vm3, %v1426_v17, 0  ;;  %v3025_v17 = vld [vmem:[#allocation2 + $0x30] sm:$0xff]  ;;  %v1593_v34 = vadd.s32 40, %v3985_v32 }
 0x241   : > { %v1421_v52 = vadd.f32 %v1405_v40, %v1389_v39 }
 0x246   : > { %v1353_v8 = vpop.f32.mrf.mxu0 }
 0x247   : > { %v1406_v36 = vmul.f32 %v2816_v26, %v1353_v8  ;;  %v1623_v8 = vstv %s2784_s13  ;;  %v1592_v26 = vadd.s32 32, %v3985_v32 }
 0x249   : > { %v1422_v44 = vadd.f32 %v1406_v36, %v1390_v35 }
 0x24b   : > { %v1431_v57 = vpack.c.bf16 %v1422_v44, %v1421_v52  ;;  %v1595_v44 = vadd.s32 56, %v3985_v32 }
 0x24d   : > { %v1532_v63 = vsel %vm1287_vm3, %v1431_v57, 0  ;;  %v4086_v51 = vadd.s32 %v3989_v49, %v1595_v44  ;;  %v4100_v57 = vadd.s32 %v3989_v49, %v1600_v53 }
 0x24e   : > { %v1356_v10 = vpop.f32.mrf.mxu0 }
 0x24f   : > { %v1407_v23 = vmul.f32 %v2817_v14, %v1356_v10  ;;  %v3997_v10 = vadd.s32 %v1623_v8, %v1622_v33  ;;  %v4009_v14 = vadd.s32 %v3989_v49, %v1589_v11  ;;  %4772 = vst [vmem:[#allocation17_spill] sm:$0xff] %v4100_v57  ;;  %v4170_v11 = vld [vmem:[#allocation3 + $0x18] sm:$0xff] }
 0x251   : > { %v1423_v37 = vadd.f32 %v1407_v23, %v1391_v22  ;;  %vm1625_vm4 = vcmp.le.s32.totalorder %v3997_v10, %v3995_v9  ;;  %vm1626_vm5 = vcmp.le.s32.totalorder %v3997_v10, %v4009_v14  ;;  %vm1627_vm6 = vcmp.le.s32.totalorder %v3997_v10, %v4021_v21 }
 0x252   : > { %v1591_v22 = vadd.s32 24, %v3985_v32  ;;  %vm1636_vm11 = vcmp.le.s32.totalorder %v3997_v10, %v4077_v46  ;;  %vm1632_vm12 = vcmp.le.s32.totalorder %v3997_v10, %v4086_v51  ;;  %vm4746_vm13 = vcmp.le.s32.totalorder %v3997_v10, %v4100_v57 }
 0x253   : > { %vm1633_vm14 = vcmp.le.s32.totalorder %v3997_v10, %v4110_v61 }
 0x254   : > { %v4033_v25 = vadd.s32 %v3989_v49, %v1591_v22  ;;  %v4180_v22 = vld [vmem:[#allocation3 + $0x20] sm:$0xff] }
 0x256   : > { %v1358_v27 = vpop.f32.mrf.mxu0  ;;  %vm1628_vm7 = vcmp.le.s32.totalorder %v3997_v10, %v4033_v25 }
 0x257   : > { %v1408_v29 = vmul.f32 %v2818_v20, %v1358_v27 }
 0x259   : > { %v1424_v38 = vadd.f32 %v1408_v29, %v1392_v24  ;;  %v4045_v29 = vadd.s32 %v3989_v49, %v1592_v26 }
 0x25b   : > { %v1432_v41 = vpack.c.bf16 %v1424_v38, %v1423_v37  ;;  %vm1629_vm8 = vcmp.le.s32.totalorder %v3997_v10, %v4045_v29  ;;  %v4058_v37 = vadd.s32 %v3989_v49, %v1593_v34  ;;  %v1594_v38 = vadd.s32 48, %v3985_v32 }
 0x25d   : > { %v1535_v45 = vsel %vm1287_vm3, %v1432_v41, 0  ;;  %vm1630_vm9 = vcmp.le.s32.totalorder %v3997_v10, %v4058_v37  ;;  %v4070_v42 = vadd.s32 %v3989_v49, %v1594_v38  ;;  %v1597_v38 = vadd.s32 72, %v3985_v32  ;;  %v2017_v37 = vld [vmem:[#allocation5 + $0x38] sm:$0xff] }
 0x25e   : > { %1537 = vmatpush.bf16.xpose.msra.mxu1 %v1535_v45  ;;  %3047 = vmatpush.bf16.xpose.msra.mxu3 %v1535_v45 }
 0x25f   : > { %vm1631_vm10 = vcmp.le.s32.totalorder %v3997_v10, %v4070_v42 }
 0x266   : > { %1538 = vmatpush.bf16.xpose.msra.mxu1 %v1532_v63  ;;  %3048 = vmatpush.bf16.xpose.msra.mxu3 %v1532_v63  ;;  %v1598_v63 = vadd.s32 80, %v3985_v32 }
 0x26e   : > { %1539 = vmatpush.bf16.xpose.msra.mxu1 %v1529_v3  ;;  %3049 = vmatpush.bf16.xpose.msra.mxu3 %v1529_v3  ;;  %v4123_v3 = vadd.s32 %v3989_v49, %v1598_v63 }
 0x270   : > { %vm1635_vm15 = vcmp.le.s32.totalorder %v3997_v10, %v4123_v3 }
 0x276   : > { %1540 = vmatpush.bf16.xpose.msra.mxu1 %v1526_v7  ;;  %3050 = vmatpush.bf16.xpose.msra.mxu3 %v1526_v7 }
 0x27e   : > { %1541 = vmatpush.bf16.xpose.msra.mxu1 %v1523_v5  ;;  %3051 = vmatpush.bf16.xpose.msra.mxu3 %v1523_v5 }
 0x286   : > { %1542 = vmatpush.bf16.xpose.msra.mxu1 %v1520_v6  ;;  %3052 = vmatpush.bf16.xpose.msra.mxu3 %v1520_v6  ;;  %v3380_v6 = vmov 0  }
 0x287   : > { %3173 = vset.pattern.permute.xlu0 %v3380_v6  ;;  %3172 = vset.pattern.permute.xlu1 %v3380_v6 }
 0x288   : > { %3174 = vset.pattern.permute.xlu2 %v3380_v6  ;;  %v4231_v6 = vld [vmem:[#allocation3 + $0x40] sm:$0xff] }
 0x28e   : > { %1543 = vmatpush.bf16.xpose.msra.mxu1 %v1517_v4  ;;  %3053 = vmatpush.bf16.xpose.msra.mxu3 %v1517_v4  ;;  %v4140_v4 = vld [vmem:[#allocation3] sm:$0xff] }
 0x296   : > { %1544 = vmatpush.bf16.xpose.msra.mxu1 %v1514_v47  ;;  %3054 = vmatpush.bf16.xpose.msra.mxu3 %v1514_v47 }
 0x29d   : > { %2907 = vmatmul.msk.bf16.vlgmr.msra.gmra.mxu1 %vm1287_vm3, %v3019_v48  ;;  %2912 = vmatmul.msk.bf16.vlgmr.msra.gmra.mxu3 %vm1287_vm3, %v3024_v15  ;;  %v4150_v15 = vld [vmem:[#allocation3 + $0x8] sm:$0xff] }
 0x2ad   : > { %2908 = vmatmul.msk.bf16.gmra.mxu1 %vm1287_vm3, %v3020_v31  ;;  %2913 = vmatmul.msk.bf16.gmra.mxu3 %vm1287_vm3, %v3025_v17  ;;  %v1603_v31 = vadd.s32 120, %v3985_v32 }
 0x2bd   : > { %2909 = vmatmul.msk.bf16.gmra.mxu1 %vm1287_vm3, %v3021_v16  ;;  %2914 = vmatmul.msk.bf16.gmra.mxu3 %vm1287_vm3, %v3026_v30  ;;  %v4190_v30 = vld [vmem:[#allocation3 + $0x28] sm:$0xff] }
 0x2cd   : > { %2910 = vmatmul.msk.bf16.gmra.mxu1 %vm1287_vm3, %v3022_v58  ;;  %v3028_v58 = vld [vmem:[%s3705_s7 + $0xc08] sm:$0xff] }
 0x2dd   : > { %2911 = vmatmul.msk.bf16.gmra.mxu1 %vm1287_vm3, %v3023_v1  ;;  %v4160_v1 = vld [vmem:[#allocation3 + $0x10] sm:$0xff] }
 0x31a   : > { %v1546_v12 = vpop.f32.mrf.mxu1 }
 0x31b   : > { %v4005_v13 = vsel %vm1625_vm4, %v1546_v12, -1e+30 }
 0x31c   : > { %1673 = vmax.xlane.f32.xlu0 %v4005_v13 }
 0x320   : > { %v1571_v40 = vpop.f32.mrf.mxu3 }
 0x321   : > { %v4137_v5 = vsel %vm1635_vm15, %v1571_v40, -1e+30  ;;  %v4202_v40 = vadd.s32 %v3989_v49, %v1597_v38  ;;  %v4245_v38 = vld [vmem:[#allocation3 + $0x50] sm:$0xff] }
 0x322   : > { %v1548_v19 = vpop.f32.mrf.mxu1 }
 0x323   : > { %v4017_v20 = vsel %vm1626_vm5, %v1548_v19, -1e+30  ;;  %vm1634_vm1 = vcmp.le.s32.totalorder %v3997_v10, %v4202_v40  ;;  %v3031_v19 = vld [vmem:[%s3705_s7 + $0xc20] sm:$0xff] }
 0x324   : > { %1675 = vmax.xlane.f32.xlu0 %v4017_v20 }
 0x328   : > { %v1573_v52 = vpop.f32.mrf.mxu3 }
 0x329   : > { %v4097_v55 = vsel %vm1636_vm11, %v1573_v52, -1e+30 }
 0x32a   : > { %v1551_v23 = vpop.f32.mrf.mxu1 }
 0x32b   : > { %v4029_v24 = vsel %vm1627_vm6, %v1551_v23, -1e+30 }
 0x32c   : > { %1677 = vmax.xlane.f32.xlu1 %v4029_v24 }
 0x330   : > { %v1576_v62 = vpop.f32.mrf.mxu3 }
 0x331   : > { %v4120_v0 = vsel %vm4746_vm13, %v1576_v62, -1e+30 }
 0x332   : > { %v1553_v27 = vpop.f32.mrf.mxu1 }
 0x333   : > { %v4041_v28 = vsel %vm1628_vm7, %v1553_v27, -1e+30 }
 0x334   : > { %1679 = vmax.xlane.f32.xlu1 %v4041_v28 }
 0x33a   : > { %v1556_v35 = vpop.f32.mrf.mxu1 }
 0x33b   : > { %v4054_v36 = vsel %vm1629_vm8, %v1556_v35, -1e+30 }
 0x33c   : > { %1681 = vmax.xlane.f32.xlu2 %v4054_v36 }
 0x342   : > { %v1558_v39 = vpop.f32.mrf.mxu1 }
 0x343   : > { %v4066_v41 = vsel %vm1630_vm9, %v1558_v39, -1e+30  ;;  %v4254_v39 = vld [vmem:[#allocation3 + $0x60] sm:$0xff] }
 0x344   : > { %1683 = vmax.xlane.f32.xlu2 %v4066_v41 }
 0x34a   : > { %v1561_v45 = vpop.f32.mrf.mxu1 }
 0x34b   : > { %v4082_v50 = vsel %vm1631_vm10, %v1561_v45, -1e+30 }
 0x34c   : > { %1685 = vmax.xlane.f32.xlu0 %v4082_v50 }
 0x352   : > { %v1563_v56 = vpop.f32.mrf.mxu1 }
 0x353   : > { %v4105_v60 = vsel %vm1632_vm12, %v1563_v56, -1e+30  ;;  %v4221_v56 = vld [vmem:[#allocation3 + $0x38] sm:$0xff] }
 0x354   : > { %1687 = vmax.xlane.f32.xlu1 %v4105_v60  ;;  %1695 = vmax.xlane.f32.xlu0 %v4097_v55 }
 0x35a   : > { %v1566_v2 = vpop.f32.mrf.mxu1 }
 0x35b   : > { %v4128_v7 = vsel %vm1633_vm14, %v1566_v2, -1e+30  ;;  %v3030_v2 = vld [vmem:[%s3705_s7 + $0xc18] sm:$0xff] }
 0x35c   : > { %1689 = vmax.xlane.f32.xlu2 %v4128_v7  ;;  %1697 = vmax.xlane.f32.xlu0 %v4120_v0 }
 0x362   : > { %v1568_v45 = vpop.f32.mrf.mxu1 }
 0x363   : > { %v4218_v54 = vsel %vm1634_vm1, %v1568_v45, -1e+30 }
 0x364   : > { %1693 = vmax.xlane.f32.xlu2 %v4137_v5 }
 0x38f   : > { %v1674_v47 = vpop.xlane.xlu0 %1673 }
 0x390   : > { %v4143_v48 = vmax.f32 %v4140_v4, %v1674_v47 }
 0x392   : > { %2275 = vst.msk [vmem:[#allocation3] sm:$0xff] %vm1993_vm0, %v4143_v48  ;;  %1771 = vperm.xlu0 %3173, %v4143_v48  }
 0x397   : > { %v1676_v16 = vpop.xlane.xlu0 %1675 }
 0x398   : > { %v4153_v17 = vmax.f32 %v4150_v15, %v1676_v16 }
 0x39a   : > { %2276 = vst.msk [vmem:[#allocation3 + $0x8] sm:$0xff] %vm1993_vm0, %v4153_v17  ;;  %1776 = vperm.xlu1 %3172, %v4153_v17  }
 0x39f   : > { %v1678_v59 = vpop.xlane.xlu1 %1677 }
 0x3a0   : > { %v4163_v33 = vmax.f32 %v4160_v1, %v1678_v59  ;;  %v3034_v59 = vld [vmem:[%s3705_s7 + $0xc38] sm:$0xff] }
 0x3a1   : > { %2194 = vmatpush.bf16.msra.mxu2 %v3034_v59  ;;  %3055 = vmatpush.bf16.msrb.mxu3 %v3034_v59 }
 0x3a2   : > { %2277 = vst.msk [vmem:[#allocation3 + $0x10] sm:$0xff] %vm1993_vm0, %v4163_v33  ;;  %1781 = vperm.xlu2 %3174, %v4163_v33   ;;  %v4782_v9 = vsub.f32 %v4160_v1, %v4163_v33 }
 0x3a7   : > { %v1680_v12 = vpop.xlane.xlu1 %1679 }
 0x3a8   : > { %v4173_v18 = vmax.f32 %v4170_v11, %v1680_v12  ;;  %v4240_v12 = vld [vmem:[#allocation3 + $0x58] sm:$0xff] }
 0x3aa   : > { %2278 = vst.msk [vmem:[#allocation3 + $0x18] sm:$0xff] %vm1993_vm0, %v4173_v18  ;;  %1786 = vperm.xlu2 %3174, %v4173_v18  }
 0x3af   : > { %v1682_v23 = vpop.xlane.xlu2 %1681 }
 0x3b0   : > { %v4183_v26 = vmax.f32 %v4180_v22, %v1682_v23 }
 0x3b2   : > { %2279 = vst.msk [vmem:[#allocation3 + $0x20] sm:$0xff] %vm1993_vm0, %v4183_v26  ;;  %1791 = vperm.xlu2 %3174, %v4183_v26  }
 0x3b7   : > { %v1684_v34 = vpop.xlane.xlu2 %1683 }
 0x3b8   : > { %v4193_v35 = vmax.f32 %v4190_v30, %v1684_v34 }
 0x3ba   : > { %2280 = vst.msk [vmem:[#allocation3 + $0x28] sm:$0xff] %vm1993_vm0, %v4193_v35  ;;  %1796 = vperm.xlu0 %3173, %v4193_v35   ;;  %v4783_v33 = vsub.f32 %v4190_v30, %v4193_v35 }
 0x3bf   : > { %v1686_v44 = vpop.xlane.xlu0 %1685 }
 0x3c0   : > { %v4209_v52 = vmax.f32 %v4204_v43, %v1686_v44  ;;  %v1602_v44 = vadd.s32 112, %v3985_v32 }
 0x3c2   : > { %2281 = vst.msk [vmem:[#allocation3 + $0x30] sm:$0xff] %vm1993_vm0, %v4209_v52 }
 0x3c4   : > { %1691 = vmax.xlane.f32.xlu1 %v4218_v54 }
 0x3c7   : > { %v1688_v62 = vpop.xlane.xlu1 %1687  ;;  %v1696_v23 = vpop.xlane.xlu0 %1695 }
 0x3c8   : > { %v4224_v63 = vmax.f32 %v4221_v56, %v1688_v62  ;;  %v4243_v34 = vmax.f32 %v4240_v12, %v1696_v23  ;;  %v1578_v62 = vpop.f32.mrf.mxu3  ;;  %v4257_v23 = vadd.s32 %v3989_v49, %v1602_v44 }
 0x3ca   : > { %2282 = vst.msk [vmem:[#allocation3 + $0x38] sm:$0xff] %vm1993_vm0, %v4224_v63  ;;  %1806 = vperm.xlu2 %3174, %v4224_v63   ;;  %vm4745_vm2 = vcmp.le.s32.totalorder %v3997_v10, %v4257_v23 }
 0x3cb   : > { %2286 = vst.msk [vmem:[#allocation3 + $0x58] sm:$0xff] %vm1993_vm0, %v4243_v34 }
 0x3cc   : > { %4773 = vst [vmem:[#allocation18_spill] sm:$0xff] %v4257_v23 }
 0x3cf   : > { %v1690_v47 = vpop.xlane.xlu2 %1689  ;;  %v1698_v8 = vpop.xlane.xlu0 %1697 }
 0x3d0   : > { %v4234_v16 = vmax.f32 %v4231_v6, %v1690_v47  ;;  %v4262_v53 = vmax.f32 %v4254_v39, %v1698_v8  ;;  %v1581_v44 = vpop.f32.mrf.mxu3  ;;  %v3032_v8 = vld [vmem:[%s3705_s7 + $0xc28] sm:$0xff] }
 0x3d1   : > { %v4273_v59 = vsel %vm4745_vm2, %v1581_v44, -1e+30  ;;  %v3029_v44 = vld [vmem:[%s3705_s7 + $0xc10] sm:$0xff] }
 0x3d2   : > { %2283 = vst.msk [vmem:[#allocation3 + $0x40] sm:$0xff] %vm1993_vm0, %v4234_v16 }
 0x3d3   : > { %2287 = vst.msk [vmem:[#allocation3 + $0x60] sm:$0xff] %vm1993_vm0, %v4262_v53 }
 0x3d7   : > { %v1694_v45 = vpop.xlane.xlu2 %1693 }
 0x3d8   : > { %v4251_v47 = vmax.f32 %v4245_v38, %v1694_v45  ;;  %v3033_v45 = vld [vmem:[%s3705_s7 + $0xc30] sm:$0xff]  ;;  %v1583_v27 = vpop.f32.mrf.mxu3 }
 0x3d9   : > { %2195 = vmatpush.bf16.msra.mxu2 %v3033_v45  ;;  %3056 = vmatpush.bf16.msrb.mxu3 %v3033_v45  ;;  %v4281_v45 = vadd.s32 %v3989_v49, %v1603_v31  ;;  %v3027_v31 = vld [vmem:[%s3705_s7 + $0xc00] sm:$0xff] }
 0x3da   : > { %2285 = vst.msk [vmem:[#allocation3 + $0x50] sm:$0xff] %vm1993_vm0, %v4251_v47 }
 0x3db   : > { %4774 = vst [vmem:[#allocation19_spill] sm:$0xff] %v4281_v45  ;;  %vm4754_vm2 = vcmp.le.s32.totalorder %v3997_v10, %v4281_v45 }
 0x3dd   : > { %1801 = vperm.xlu1 %3172, %v4209_v52   ;;  %2196 = vmatpush.bf16.msra.mxu2 %v3032_v8 }
 0x3de   : > { %3057 = vmatpush.bf16.msrb.mxu3 %v3032_v8  ;;  %v4289_v8 = vsel %vm4754_vm2, %v1583_v27, -1e+30  ;;  %vm2964_vm2 = vmpackc.low %vm1626_vm5, %vm1625_vm4 }
 0x3df   : > { %4775 = vst [vmem:[#allocation20_spill] sm:$0xff] %v4289_v8 }
 0x3e1   : > { %2197 = vmatpush.bf16.msra.mxu2 %v3031_v19 }
 0x3e2   : > { %3058 = vmatpush.bf16.msrb.mxu3 %v3031_v19  ;;  %v1601_v19 = vadd.s32 104, %v3985_v32 }
 0x3e4   : > { %1701 = vmax.xlane.f32.xlu0 %v4273_v59 }
 0x3e5   : > { %2198 = vmatpush.bf16.msra.mxu2 %v3030_v2 }
 0x3e6   : > { %3059 = vmatpush.bf16.msrb.mxu3 %v3030_v2  ;;  %v4297_v2 = vadd.s32 %v3989_v49, %v1601_v19 }
 0x3e8   : > { %vm1638_vm13 = vcmp.le.s32.totalorder %v3997_v10, %v4297_v2 }
 0x3e9   : > { %2199 = vmatpush.bf16.msra.mxu2 %v3029_v44 }
 0x3ea   : > { %3060 = vmatpush.bf16.msrb.mxu3 %v3029_v44  ;;  %v4304_v44 = vsel %vm1638_vm13, %v1578_v62, -1e+30 }
 0x3ed   : > { %2200 = vmatpush.bf16.msra.mxu2 %v3028_v58 }
 0x3ee   : > { %3061 = vmatpush.bf16.msrb.mxu3 %v3028_v58 }
 0x3f1   : > { %2201 = vmatpush.bf16.msra.mxu2 %v3027_v31 }
 0x3f2   : > { %3062 = vmatpush.bf16.msrb.mxu3 %v3027_v31 }
 0x3f3   : > { %1703 = vmax.xlane.f32.xlu2 %v4289_v8 }
 0x3f8   : > { %1811 = vperm.xlu0 %3173, %v4234_v16  }
 0x3fc   : > { %v1782_v45 = vpop.permute.xlu2 %1781 }
 0x404   : > { %v1772_v27 = vpop.permute.xlu0 %1771  ;;  %v1787_v19 = vpop.permute.xlu2 %1786 }
 0x405   : > { %v1849_v58 = vsub.f32 %v4005_v13, %v1772_v27  ;;  %v1852_v62 = vsub.f32 %v4041_v28, %v1787_v19  ;;  %v4776_v27 = vsub.f32 %v4150_v15, %v4153_v17 }
 0x407   : > { %1699 = vmax.xlane.f32.xlu1 %v4304_v44  ;;  %v1865_v31 = vmul.f32 1.442695, %v1849_v58  ;;  %v1739_v58 = vmul.f32 1.442695, %v4776_v27 }
 0x409   : > { %3175 = vpow2.f32 %v1865_v31 }
 0x40c   : > { %v1777_v8 = vpop.permute.xlu1 %1776  ;;  %v1792_v19 = vpop.permute.xlu2 %1791 }
 0x40d   : > { %v1850_v32 = vsub.f32 %v4017_v20, %v1777_v8  ;;  %v1851_v20 = vsub.f32 %v4029_v24, %v1782_v45  ;;  %v1871_v8 = vmul.f32 1.442695, %v1852_v62  ;;  %v1853_v15 = vsub.f32 %v4054_v36, %v1792_v19 }
 0x40e   : > { %v1731_v36 = vsub.f32 %v4245_v38, %v4251_v47 }
 0x40f   : > { %v1867_v49 = vmul.f32 1.442695, %v1850_v32  ;;  %v4309_v23 = vpop.eup %3175  ;;  %v1869_v31 = vmul.f32 1.442695, %v1851_v20  ;;  %v4777_v32 = vsub.f32 %v4180_v22, %v4183_v26  ;;  %v4778_v22 = vsub.f32 %v4221_v56, %v4224_v63  ;;  %v4357_v56 = vld [vmem:[#allocation3 + $0x48] sm:$0xff] }
 0x410   : > { %v1873_v62 = vmul.f32 1.442695, %v1853_v15 }
 0x411   : > { %3177 = vpow2.f32 %v1867_v49  ;;  %v1745_v49 = vmul.f32 1.442695, %v4777_v32  ;;  %v1751_v26 = vmul.f32 1.442695, %v4778_v22 }
 0x412   : > { %3179 = vpow2.f32 %v1871_v8 }
 0x413   : > { %3181 = vpow2.f32 %v1739_v58 }
 0x414   : > { %3183 = vpow2.f32 %v1869_v31  ;;  %v1757_v31 = vmul.f32 1.442695, %v1731_v36 }
 0x415   : > { %3185 = vpow2.f32 %v1745_v49 }
 0x416   : > { %3187 = vpow2.f32 %v1751_v26 }
 0x417   : > { %v4311_v57 = vpop.eup %3177  ;;  %3189 = vpow2.f32 %v1873_v62 }
 0x418   : > { %v2965_v13 = vpack.c.bf16 %v4311_v57, %v4309_v23  ;;  %v4327_v28 = vpop.eup %3179 }
 0x419   : > { %v4332_v24 = vpop.eup %3181 }
 0x41a   : > { %2966 = vmatmul.msk.bf16.vlgmr.msra.gmra.mxu2 %vm2964_vm2, %v2965_v13  ;;  %v4334_v45 = vpop.eup %3183  ;;  %vm2967_vm2 = vmpackc.low %vm1628_vm7, %vm1627_vm6 }
 0x41b   : > { %v2968_v17 = vpack.c.bf16 %v4327_v28, %v4334_v45  ;;  %v4350_v8 = vpop.eup %3185 }
 0x41c   : > { %v4355_v58 = vpop.eup %3187 }
 0x41d   : > { %v4359_v63 = vpop.eup %3189 }
 0x420   : > { %1826 = vperm.xlu1 %3172, %v4243_v34  }
 0x428   : > { %2033 = vperm.xlu1 %3172, %v4332_v24  }
 0x42a   : > { %2969 = vmatmul.msk.bf16.gmra.mxu2 %vm2967_vm2, %v2968_v17  ;;  %vm2970_vm2 = vmpackc.low %vm1630_vm9, %vm1629_vm8  ;;  %v1807_v17 = vpop.permute.xlu2 %1806 }
 0x42b   : > { %v1856_v22 = vsub.f32 %v4105_v60, %v1807_v17  ;;  %v4779_v17 = vsub.f32 %v4140_v4, %v4143_v48  ;;  %v4780_v4 = vsub.f32 %v4170_v11, %v4173_v18  ;;  %v4437_v60 = vld [vmem:[#allocation3 + $0x68] sm:$0xff]  ;;  %v1741_v11 = vmul.f32 1.442695, %v4782_v9 }
 0x42c   : > { %v1797_v13 = vpop.permute.xlu0 %1796  ;;  %v1733_v18 = vsub.f32 %v4254_v39, %v4262_v53  ;;  %v1747_v39 = vmul.f32 1.442695, %v4783_v33 }
 0x42d   : > { %v1854_v20 = vsub.f32 %v4066_v41, %v1797_v13  ;;  %v1879_v26 = vmul.f32 1.442695, %v1856_v22  ;;  %v1737_v22 = vmul.f32 1.442695, %v4779_v17  ;;  %v1743_v48 = vmul.f32 1.442695, %v4780_v4 }
 0x42f   : > { %v1875_v27 = vmul.f32 1.442695, %v1854_v20 }
 0x430   : > { %2048 = vperm.xlu1 %3172, %v4350_v8  }
 0x431   : > { %3191 = vpow2.f32 %v1875_v27  ;;  %v4387_v27 = vld [vmem:[#allocation3 + $0x70] sm:$0xff] }
 0x432   : > { %3193 = vpow2.f32 %v1757_v31 }
 0x433   : > { %3195 = vpow2.f32 %v1879_v26 }
 0x437   : > { %v4361_v32 = vpop.eup %3191  ;;  %v1692_v41 = vpop.xlane.xlu1 %1691 }
 0x438   : > { %v4370_v38 = vmax.f32 %v4357_v56, %v1692_v41  ;;  %2063 = vperm.xlu1 %3172, %v4355_v58   ;;  %v2971_v49 = vpack.c.bf16 %v4361_v32, %v4359_v63  ;;  %v4380_v15 = vpop.eup %3193 }
 0x439   : > { %v4392_v41 = vpop.eup %3195 }
 0x43a   : > { %v1730_v19 = vsub.f32 %v4357_v56, %v4370_v38  ;;  %2284 = vst.msk [vmem:[#allocation3 + $0x48] sm:$0xff] %vm1993_vm0, %v4370_v38  ;;  %2972 = vmatmul.msk.bf16.gmra.mxu2 %vm2970_vm2, %v2971_v49  ;;  %1816 = vperm.xlu0 %3173, %v4370_v38   ;;  %vm2973_vm2 = vmpackc.low %vm1632_vm12, %vm1631_vm10  ;;  %v4409_v49 = vld [vmem:[#allocation3 + $0x78] sm:$0xff]  ;;  %v1904_v29 = vsel %vm1632_vm12, %v4392_v41, 0.0 }
 0x43c   : > { %v1755_v4 = vmul.f32 1.442695, %v1730_v19 }
 0x440   : > { %2078 = vperm.xlu1 %3172, %v4380_v15  }
 0x442   : > { %1821 = vperm.xlu0 %3173, %v4251_v47  }
 0x44a   : > { %1831 = vperm.xlu0 %3173, %v4262_v53  }
 0x44f   : > { %v1802_v62 = vpop.permute.xlu1 %1801 }
 0x450   : > { %v1855_v13 = vsub.f32 %v4082_v50, %v1802_v62 }
 0x452   : > { %v1877_v20 = vmul.f32 1.442695, %v1855_v13 }
 0x454   : > { %3197 = vpow2.f32 %v1877_v20  ;;  %v1897_v20 = vsel %vm1625_vm4, %v4309_v23, 0.0  ;;  %vm2976_vm4 = vmpackc.low %vm1634_vm1, %vm1633_vm14 }
 0x455   : > { %3199 = vpow2.f32 %v1737_v22 }
 0x456   : > { %3201 = vpow2.f32 %v1743_v48 }
 0x457   : > { %v1702_v36 = vpop.xlane.xlu0 %1701 }
 0x458   : > { %v4390_v31 = vmax.f32 %v4387_v27, %v1702_v36 }
 0x45a   : > { %v4394_v47 = vpop.eup %3197  ;;  %2289 = vst.msk [vmem:[#allocation3 + $0x70] sm:$0xff] %vm1993_vm0, %v4390_v31  ;;  %1841 = vperm.xlu0 %3173, %v4390_v31  }
 0x45b   : > { %v2974_v50 = vpack.c.bf16 %v4392_v41, %v4394_v47  ;;  %v4429_v36 = vpop.eup %3199 }
 0x45d   : > { %2975 = vmatmul.msk.bf16.gmra.mxu2 %vm2973_vm2, %v2974_v50  ;;  %v4781_v50 = vsub.f32 %v4204_v43, %v4209_v52  ;;  %v1761_v52 = vmul.f32 1.442695, %v1733_v18 }
 0x45f   : > { %v1749_v17 = vmul.f32 1.442695, %v4781_v50 }
 0x461   : > { %3203 = vpow2.f32 %v1749_v17 }
 0x462   : > { %3205 = vpow2.f32 %v1741_v11 }
 0x463   : > { %3207 = vpow2.f32 %v1761_v52 }
 0x464   : > { %3209 = vpow2.f32 %v1747_v39 }
 0x465   : > { %3211 = vpow2.f32 %v1755_v4 }
 0x466   : > { %v1704_v26 = vpop.xlane.xlu2 %1703 }
 0x467   : > { %v4415_v62 = vmax.f32 %v4409_v49, %v1704_v26  ;;  %v4435_v26 = vpop.eup %3201 }
 0x468   : > { %v4453_v1 = vpop.eup %3203 }
 0x469   : > { %v1736_v13 = vsub.f32 %v4409_v49, %v4415_v62  ;;  %2290 = vst.msk [vmem:[#allocation3 + $0x78] sm:$0xff] %vm1993_vm0, %v4415_v62  ;;  %1846 = vperm.xlu0 %3173, %v4415_v62   ;;  %v4459_v53 = vpop.eup %3205 }
 0x46a   : > { %1945 = vadd.xlane.f32.xlu1 %v1897_v20  ;;  %v1732_v20 = vsub.f32 %v4240_v12, %v4243_v34  ;;  %v4467_v48 = vpop.eup %3207  ;;  %v4784_v12 = vsub.f32 %v4231_v6, %v4234_v16 }
 0x46b   : > { %v4470_v30 = vpop.eup %3209  ;;  %v1767_v51 = vmul.f32 1.442695, %v1736_v13 }
 0x46c   : > { %v1759_v50 = vmul.f32 1.442695, %v1732_v20  ;;  %v4473_v35 = vpop.eup %3211  ;;  %v1753_v34 = vmul.f32 1.442695, %v4784_v12  ;;  %v1900_v20 = vsel %vm1628_vm7, %v4327_v28, 0.0  ;;  %vm2979_vm7 = vmpackc.low %vm1636_vm11, %vm1635_vm15 }
 0x46e   : > { %3213 = vpow2.f32 %v1759_v50 }
 0x46f   : > { %3215 = vpow2.f32 %v1753_v34 }
 0x471   : > { %2028 = vperm.xlu0 %3173, %v4429_v36  }
 0x474   : > { %v4480_v19 = vpop.eup %3213 }
 0x475   : > { %v4483_v9 = vpop.eup %3215 }
 0x479   : > { %2043 = vperm.xlu0 %3173, %v4435_v26  }
 0x47a   : > { %v1700_v23 = vpop.xlane.xlu1 %1699 }
 0x47b   : > { %v4446_v22 = vmax.f32 %v4437_v60, %v1700_v23  ;;  %v1812_v23 = vpop.permute.xlu0 %1811 }
 0x47c   : > { %v1857_v4 = vsub.f32 %v4128_v7, %v1812_v23 }
 0x47d   : > { %v1734_v43 = vsub.f32 %v4437_v60, %v4446_v22  ;;  %2288 = vst.msk [vmem:[#allocation3 + $0x68] sm:$0xff] %vm1993_vm0, %v4446_v22  ;;  %1836 = vperm.xlu2 %3174, %v4446_v22  }
 0x47e   : > { %v1881_v50 = vmul.f32 1.442695, %v1857_v4 }
 0x481   : > { %2058 = vperm.xlu0 %3173, %v4453_v1  }
 0x485   : > { %2038 = vperm.xlu2 %3174, %v4459_v53  }
 0x489   : > { %2088 = vperm.xlu0 %3173, %v4467_v48  }
 0x48d   : > { %2053 = vperm.xlu2 %3174, %v4470_v30  }
 0x491   : > { %2073 = vperm.xlu0 %3173, %v4473_v35  }
 0x492   : > { %v1827_v56 = vpop.permute.xlu1 %1826 }
 0x493   : > { %v1860_v38 = vsub.f32 %v4097_v55, %v1827_v56  ;;  %v2011_v55 = vld [vmem:[#allocation5 + $0x8] sm:$0xff] }
 0x495   : > { %v1887_v17 = vmul.f32 1.442695, %v1860_v38  ;;  %2083 = vperm.xlu2 %3174, %v4480_v19  }
 0x497   : > { %3217 = vpow2.f32 %v1887_v17 }
 0x498   : > { %3219 = vpow2.f32 %v1881_v50 }
 0x49a   : > { %v2034_v16 = vpop.permute.xlu1 %2033 }
 0x49b   : > { %v2107_v52 = vmul.f32 %v2034_v16, %v2011_v55  ;;  %v2014_v16 = vld [vmem:[#allocation5 + $0x20] sm:$0xff] }
 0x49d   : > { %v3218_v11 = vpop.eup %3217  ;;  %v4485_v18 = vpop.f32.mrf.mxu2  ;;  %2068 = vperm.xlu2 %3174, %v4483_v9  }
 0x49e   : > { %v1908_v6 = vsel %vm1636_vm11, %v3218_v11, 0.0  ;;  %v4503_v25 = vpop.eup %3219 }
 0x49f   : > { %1967 = vadd.xlane.f32.xlu1 %v1908_v6 }
 0x4a2   : > { %v2049_v23 = vpop.permute.xlu1 %2048 }
 0x4a5   : > { %v2205_v33 = vpop.f32.mrf.mxu2 }
 0x4a6   : > { %v2244_v39 = vadd.f32 %v2205_v33, %v2107_v52 }
 0x4a7   : > { %1951 = vadd.xlane.f32.xlu1 %v1900_v20 }
 0x4a8   : > { %2260 = vst.msk [vmem:[#allocation5 + $0x8] sm:$0xff] %vm1287_vm3, %v2244_v39 }
 0x4ac   : > { %v1817_v12 = vpop.permute.xlu0 %1816 }
 0x4ad   : > { %v1858_v34 = vsub.f32 %v4218_v54, %v1817_v12  ;;  %v4498_v56 = vpop.f32.mrf.mxu2 }
 0x4af   : > { %v1883_v38 = vmul.f32 1.442695, %v1858_v34  ;;  %v1899_v34 = vsel %vm1627_vm6, %v4334_v45, 0.0 }
 0x4b1   : > { %3221 = vpow2.f32 %v1883_v38 }
 0x4b4   : > { %v1822_v17 = vpop.permute.xlu0 %1821 }
 0x4b5   : > { %v1859_v6 = vsub.f32 %v4137_v5, %v1822_v17  ;;  %v4501_v55 = vpop.f32.mrf.mxu2  ;;  %v2110_v5 = vmul.f32 %v2049_v23, %v2014_v16  ;;  %v4787_v23 = vld [vmem:[#allocation18_spill] sm:$0xff] }
 0x4b7   : > { %v4505_v28 = vpop.eup %3221  ;;  %v1885_v7 = vmul.f32 1.442695, %v1859_v6  ;;  %v2064_v6 = vpop.permute.xlu1 %2063 }
 0x4b8   : > { %v2977_v54 = vpack.c.bf16 %v4505_v28, %v4503_v25  ;;  %v2113_v2 = vmul.f32 %v2064_v6, %v2017_v37  ;;  %v2013_v6 = vld [vmem:[#allocation5 + $0x18] sm:$0xff]  ;;  %v1906_v42 = vsel %vm1634_vm1, %v4505_v28, 0.0  ;;  %v2018_v37 = vld [vmem:[#allocation5 + $0x40] sm:$0xff] }
 0x4b9   : > { %3223 = vpow2.f32 %v1885_v7  ;;  %v4785_v7 = vld [vmem:[#allocation17_spill] sm:$0xff] }
 0x4ba   : > { %2978 = vmatmul.msk.bf16.gmra.mxu2 %vm2976_vm4, %v2977_v54  ;;  %vm4786_vm6 = vcmp.le.s32.totalorder %v3997_v10, %v4785_v7 }
 0x4bb   : > { %vm4790_vm11 = vmmov %vm4786_vm6 }
 0x4bc   : > { %v1832_v52 = vpop.permute.xlu0 %1831 }
 0x4bd   : > { %v1861_v33 = vsub.f32 %v4120_v0, %v1832_v52  ;;  %v2213_v39 = vpop.f32.mrf.mxu2  ;;  %v1898_v0 = vsel %vm1626_vm5, %v4311_v57, 0.0  ;;  %vm4788_vm5 = vcmp.le.s32.totalorder %v3997_v10, %v4787_v23 }
 0x4be   : > { %v2247_v20 = vadd.f32 %v2213_v39, %v2110_v5  ;;  %v4789_v39 = vld [vmem:[#allocation20_spill] sm:$0xff] }
 0x4bf   : > { %v3224_v4 = vpop.eup %3223  ;;  %v1889_v50 = vmul.f32 1.442695, %v1861_v33  ;;  %v4538_v54 = vpop.permute.xlu1 %2078 }
 0x4c0   : > { %2263 = vst.msk [vmem:[#allocation5 + $0x20] sm:$0xff] %vm1287_vm3, %v2247_v20  ;;  %v1907_v12 = vsel %vm1635_vm15, %v3224_v4, 0.0  ;;  %v2980_v38 = vpack.c.bf16 %v3218_v11, %v3224_v4  ;;  %vm2982_vm15 = vmpackc.low %vm1638_vm13, %vm4790_vm11 }
 0x4c1   : > { %1965 = vadd.xlane.f32.xlu0 %v1907_v12  ;;  %3225 = vpow2.f32 %v1889_v50  ;;  %v2012_v12 = vld [vmem:[#allocation5 + $0x10] sm:$0xff] }
 0x4c5   : > { %v2215_v57 = vpop.f32.mrf.mxu2 }
 0x4c6   : > { %1949 = vadd.xlane.f32.xlu2 %v1899_v34 }
 0x4c7   : > { %v3226_v17 = vpop.eup %3225 }
 0x4c8   : > { %v1909_v3 = vsel %vm4786_vm6, %v3226_v17, 0.0 }
 0x4c9   : > { %1947 = vadd.xlane.f32.xlu0 %v1898_v0 }
 0x4ca   : > { %2981 = vmatmul.msk.bf16.gmra.mxu2 %vm2979_vm7, %v2980_v38 }
 0x4cc   : > { %v1842_v21 = vpop.permute.xlu0 %1841 }
 0x4cd   : > { %v1863_v45 = vsub.f32 %v4273_v59, %v1842_v21  ;;  %v1913_v59 = vld [vmem:[#allocation4] sm:$0xff] }
 0x4ce   : > { %1969 = vadd.xlane.f32.xlu2 %v1909_v3  ;;  %v1929_v4 = vmul.f32 %v4429_v36, %v1913_v59  ;;  %v2010_v3 = vld [vmem:[#allocation5] sm:$0xff] }
 0x4cf   : > { %v1893_v46 = vmul.f32 1.442695, %v1863_v45  ;;  %v1902_v45 = vsel %vm1630_vm9, %v4361_v32, 0.0  ;;  %vm4791_vm9 = vmmov %vm4788_vm5 }
 0x4d1   : > { %3227 = vpow2.f32 %v1893_v46 }
 0x4d7   : > { %v3228_v16 = vpop.eup %3227  ;;  %v1837_v14 = vpop.permute.xlu2 %1836 }
 0x4d8   : > { %v1862_v11 = vsub.f32 %v4304_v44, %v1837_v14  ;;  %v1911_v5 = vsel %vm4788_vm5, %v3228_v16, 0.0 }
 0x4d9   : > { %1973 = vadd.xlane.f32.xlu1 %v1911_v5 }
 0x4da   : > { %v1891_v52 = vmul.f32 1.442695, %v1862_v11 }
 0x4db   : > { %v1847_v33 = vpop.permute.xlu0 %1846 }
 0x4dc   : > { %3229 = vpow2.f32 %v1891_v52  ;;  %v1864_v20 = vsub.f32 %v4789_v39, %v1847_v33  ;;  %v4792_v52 = vld [vmem:[#allocation19_spill] sm:$0xff] }
 0x4dd   : > { %v1946_v50 = vpop.xlane.xlu1 %1945  ;;  %vm4793_vm2 = vcmp.le.s32.totalorder %v3997_v10, %v4792_v52  ;;  %v1924_v10 = vld [vmem:[#allocation4 + $0x58] sm:$0xff] }
 0x4de   : > { %v1895_v34 = vmul.f32 1.442695, %v1864_v20  ;;  %v1977_v0 = vadd.f32 %v1946_v50, %v1929_v4  ;;  %vm2985_vm4 = vmpackc.low %vm4793_vm2, %vm4791_vm9  ;;  %v1940_v49 = vmul.f32 %v4480_v19, %v1924_v10  ;;  %v1928_v10 = vld [vmem:[#allocation4 + $0x78] sm:$0xff] }
 0x4df   : > { %v2039_v38 = vpop.permute.xlu2 %2038 }
 0x4e0   : > { %3231 = vpow2.f32 %v1895_v34  ;;  %1994 = vst.msk [vmem:[#allocation4] sm:$0xff] %vm1993_vm0, %v1977_v0  ;;  %v2108_v44 = vmul.f32 %v2039_v38, %v2012_v12  ;;  %v2218_v21 = vpop.f32.mrf.mxu2 }
 0x4e1   : > { %1955 = vadd.xlane.f32.xlu1 %v1902_v45 }
 0x4e2   : > { %v3230_v46 = vpop.eup %3229  ;;  %v2245_v36 = vadd.f32 %v4498_v56, %v2108_v44  ;;  %v2015_v56 = vld [vmem:[#allocation5 + $0x28] sm:$0xff] }
 0x4e3   : > { %v2029_v14 = vpop.permute.xlu0 %2028  ;;  %v1910_v11 = vsel %vm1638_vm13, %v3230_v46, 0.0  ;;  %v2983_v5 = vpack.c.bf16 %v3230_v46, %v3226_v17  ;;  %vm4794_vm13 = vmmov %vm4793_vm2 }
 0x4e4   : > { %2261 = vst.msk [vmem:[#allocation5 + $0x10] sm:$0xff] %vm1287_vm3, %v2245_v36  ;;  %v2106_v32 = vmul.f32 %v2029_v14, %v2010_v3  ;;  %1971 = vadd.xlane.f32.xlu0 %v1910_v11  ;;  %v1923_v3 = vld [vmem:[#allocation4 + $0x50] sm:$0xff] }
 0x4e5   : > { %2984 = vmatmul.msk.bf16.gmra.mxu2 %vm2982_vm15, %v2983_v5  ;;  %v1939_v36 = vmul.f32 %v4380_v15, %v1923_v3  ;;  %v1915_v11 = vld [vmem:[#allocation4 + $0x10] sm:$0xff]  ;;  %v1925_v15 = vld [vmem:[#allocation4 + $0x60] sm:$0xff] }
 0x4e6   : > { %v3232_v59 = vpop.eup %3231  ;;  %v2243_v7 = vadd.f32 %v4485_v18, %v2106_v32  ;;  %v1905_v18 = vsel %vm1633_vm14, %v4503_v25, 0.0  ;;  %v1903_v25 = vsel %vm1631_vm10, %v4394_v47, 0.0  ;;  %v4795_v47 = vsub.f32 %v4387_v27, %v4390_v31 }
 0x4e7   : > { %v2054_v33 = vpop.permute.xlu2 %2053  ;;  %v1912_v17 = vsel %vm4794_vm13, %v3232_v59, 0.0  ;;  %v2986_v39 = vpack.c.bf16 %v3232_v59, %v3228_v16  ;;  %v1901_v16 = vsel %vm1629_vm8, %v4359_v63, 0.0  ;;  %v1931_v5 = vmul.f32 %v4459_v53, %v1915_v11 }
 0x4e8   : > { %2259 = vst.msk [vmem:[#allocation5] sm:$0xff] %vm1287_vm3, %v2243_v7  ;;  %v2111_v20 = vmul.f32 %v2054_v33, %v2015_v56  ;;  %v2220_v4 = vpop.f32.mrf.mxu2  ;;  %1975 = vadd.xlane.f32.xlu2 %v1912_v17  ;;  %v1765_v60 = vmul.f32 1.442695, %v4795_v47  ;;  %v1941_v53 = vmul.f32 %v4467_v48, %v1925_v15  ;;  %v1918_v48 = vld [vmem:[#allocation4 + $0x28] sm:$0xff] }
 0x4e9   : > { %v2250_v23 = vadd.f32 %v2220_v4, %v2113_v2  ;;  %2987 = vmatmul.msk.bf16.vlgmr.msrb.gmra.mxu3 %vm2985_vm4, %v2986_v39  ;;  %1961 = vadd.xlane.f32.xlu1 %v1905_v18  ;;  %v2019_v39 = vld [vmem:[#allocation5 + $0x48] sm:$0xff] }
 0x4ea   : > { %v2248_v50 = vadd.f32 %v2215_v57, %v2111_v20  ;;  %v2016_v57 = vld [vmem:[#allocation5 + $0x30] sm:$0xff] }
 0x4eb   : > { %2266 = vst.msk [vmem:[#allocation5 + $0x38] sm:$0xff] %vm1287_vm3, %v2250_v23  ;;  %v2044_v12 = vpop.permute.xlu0 %2043 }
 0x4ec   : > { %2264 = vst.msk [vmem:[#allocation5 + $0x28] sm:$0xff] %vm1287_vm3, %v2248_v50  ;;  %v2109_v34 = vmul.f32 %v2044_v12, %v2013_v6  ;;  %1953 = vadd.xlane.f32.xlu0 %v1901_v16  ;;  %v1927_v6 = vld [vmem:[#allocation4 + $0x70] sm:$0xff] }
 0x4ed   : > { %v2020_v50 = vld [vmem:[#allocation5 + $0x50] sm:$0xff] }
 0x4ee   : > { %v2246_v61 = vadd.f32 %v4501_v55, %v2109_v34  ;;  %v1763_v55 = vmul.f32 1.442695, %v1734_v43  ;;  %v1916_v43 = vld [vmem:[#allocation4 + $0x18] sm:$0xff]  ;;  %v2116_v16 = vmul.f32 %v4538_v54, %v2020_v50 }
 0x4ef   : > { %v1932_v28 = vmul.f32 %v4435_v26, %v1916_v43  ;;  %v1914_v26 = vld [vmem:[#allocation4 + $0x8] sm:$0xff]  ;;  %v1917_v43 = vld [vmem:[#allocation4 + $0x20] sm:$0xff] }
 0x4f0   : > { %2262 = vst.msk [vmem:[#allocation5 + $0x18] sm:$0xff] %vm1287_vm3, %v2246_v61  ;;  %1957 = vadd.xlane.f32.xlu2 %v1903_v25  ;;  %3233 = vpow2.f32 %v1763_v55  ;;  %v1930_v59 = vmul.f32 %v4332_v24, %v1914_v26 }
 0x4f1   : > { %3235 = vpow2.f32 %v1767_v51 }
 0x4f2   : > { %3237 = vpow2.f32 %v1765_v60 }
 0x4f3   : > { %v2059_v0 = vpop.permute.xlu0 %2058 }
 0x4f4   : > { %v2112_v63 = vmul.f32 %v2059_v0, %v2016_v57  ;;  %1959 = vadd.xlane.f32.xlu0 %v1904_v29  ;;  %v2021_v0 = vld [vmem:[#allocation5 + $0x58] sm:$0xff]  ;;  %v1934_v29 = vmul.f32 %v4470_v30, %v1918_v48 }
 0x4f6   : > { %v2249_v38 = vadd.f32 %v2218_v21, %v2112_v63  ;;  %v4604_v41 = vpop.eup %3233  ;;  %v2084_v21 = vpop.permute.xlu2 %2083  ;;  %v1926_v63 = vld [vmem:[#allocation4 + $0x68] sm:$0xff] }
 0x4f7   : > { %v4610_v22 = vpop.eup %3235  ;;  %v1942_v54 = vmul.f32 %v4604_v41, %v1926_v63 }
 0x4f8   : > { %2265 = vst.msk [vmem:[#allocation5 + $0x30] sm:$0xff] %vm1287_vm3, %v2249_v38  ;;  %1963 = vadd.xlane.f32.xlu2 %v1906_v42  ;;  %v3238_v40 = vpop.eup %3237  ;;  %v2117_v38 = vmul.f32 %v2084_v21, %v2021_v0  ;;  %v1944_v30 = vmul.f32 %v4610_v22, %v1928_v10 }
 0x4f9   : > { %v1943_v12 = vmul.f32 %v3238_v40, %v1927_v6 }
 0x4fb   : > { %v4617_v31 = vpop.permute.xlu0 %2088 }
 0x4fe   : > { %v2069_v46 = vpop.permute.xlu2 %2068 }
 0x4ff   : > { %v2114_v7 = vmul.f32 %v2069_v46, %v2018_v37 }
 0x502   : > { %2093 = vperm.xlu1 %3172, %v4604_v41   ;;  %v1933_v41 = vmul.f32 %v4350_v8, %v1917_v43 }
 0x503   : > { %v2074_v45 = vpop.permute.xlu0 %2073 }
 0x504   : > { %v2115_v18 = vmul.f32 %v2074_v45, %v2019_v39  ;;  %v1919_v45 = vld [vmem:[#allocation4 + $0x30] sm:$0xff] }
 0x508   : > { %2103 = vperm.xlu0 %3173, %v4610_v22   ;;  %v1935_v22 = vmul.f32 %v4453_v1, %v1919_v45 }
 0x510   : > { %2098 = vperm.xlu2 %3174, %v3238_v40  }
 0x512   : > { %v1968_v62 = vpop.xlane.xlu1 %1967 }
 0x513   : > { %v1988_v13 = vadd.f32 %v1968_v62, %v1940_v49  ;;  %v1921_v49 = vld [vmem:[#allocation4 + $0x40] sm:$0xff] }
 0x515   : > { %2005 = vst.msk [vmem:[#allocation4 + $0x58] sm:$0xff] %vm1993_vm0, %v1988_v13  ;;  %v1937_v13 = vmul.f32 %v4483_v9, %v1921_v49  ;;  %v2022_v9 = vld [vmem:[#allocation5 + $0x60] sm:$0xff] }
 0x516   : > { %v2118_v11 = vmul.f32 %v4617_v31, %v2022_v9 }
 0x51a   : > { %v1952_v44 = vpop.xlane.xlu1 %1951 }
 0x51b   : > { %v1980_v27 = vadd.f32 %v1952_v44, %v1932_v28 }
 0x51d   : > { %1997 = vst.msk [vmem:[#allocation4 + $0x18] sm:$0xff] %vm1993_vm0, %v1980_v27 }
 0x534   : > { %v1966_v19 = vpop.xlane.xlu0 %1965 }
 0x535   : > { %v1987_v14 = vadd.f32 %v1966_v19, %v1939_v36  ;;  %v1920_v36 = vld [vmem:[#allocation4 + $0x38] sm:$0xff] }
 0x537   : > { %2004 = vst.msk [vmem:[#allocation4 + $0x50] sm:$0xff] %vm1993_vm0, %v1987_v14  ;;  %v1936_v14 = vmul.f32 %v4355_v58, %v1920_v36  ;;  %v2023_v58 = vld [vmem:[#allocation5 + $0x68] sm:$0xff] }
 0x539   : > { %v1950_v32 = vpop.xlane.xlu2 %1949 }
 0x53a   : > { %v1979_v56 = vadd.f32 %v1950_v32, %v1931_v5  ;;  %v1922_v5 = vld [vmem:[#allocation4 + $0x48] sm:$0xff] }
 0x53c   : > { %1996 = vst.msk [vmem:[#allocation4 + $0x10] sm:$0xff] %vm1993_vm0, %v1979_v56  ;;  %v1948_v52 = vpop.xlane.xlu0 %1947  ;;  %v1938_v56 = vmul.f32 %v4473_v35, %v1922_v5 }
 0x53d   : > { %v1978_v2 = vadd.f32 %v1948_v52, %v1930_v59  ;;  %v2223_v33 = vpop.f32.mrf.mxu2 }
 0x53e   : > { %v2251_v17 = vadd.f32 %v2223_v33, %v2114_v7  ;;  %v2024_v7 = vld [vmem:[#allocation5 + $0x70] sm:$0xff] }
 0x53f   : > { %1995 = vst.msk [vmem:[#allocation4 + $0x8] sm:$0xff] %vm1993_vm0, %v1978_v2 }
 0x540   : > { %2267 = vst.msk [vmem:[#allocation5 + $0x40] sm:$0xff] %vm1287_vm3, %v2251_v17 }
 0x541   : > { %v1970_v20 = vpop.xlane.xlu2 %1969 }
 0x542   : > { %v1989_v4 = vadd.f32 %v1970_v20, %v1941_v53  ;;  %v2025_v20 = vld [vmem:[#allocation5 + $0x78] sm:$0xff] }
 0x544   : > { %2006 = vst.msk [vmem:[#allocation4 + $0x60] sm:$0xff] %vm1993_vm0, %v1989_v4 }
 0x545   : > { %v2225_v24 = vpop.f32.mrf.mxu2 }
 0x546   : > { %v2252_v23 = vadd.f32 %v2225_v24, %v2115_v18 }
 0x548   : > { %2268 = vst.msk [vmem:[#allocation5 + $0x48] sm:$0xff] %vm1287_vm3, %v2252_v23 }
 0x54c   : > { %v1974_v34 = vpop.xlane.xlu1 %1973 }
 0x54d   : > { %v1991_v61 = vadd.f32 %v1974_v34, %v1943_v12  ;;  %v2228_v25 = vpop.f32.mrf.mxu2 }
 0x54e   : > { %v2253_v57 = vadd.f32 %v2228_v25, %v2116_v16 }
 0x54f   : > { %2008 = vst.msk [vmem:[#allocation4 + $0x70] sm:$0xff] %vm1993_vm0, %v1991_v61 }
 0x550   : > { %2269 = vst.msk [vmem:[#allocation5 + $0x50] sm:$0xff] %vm1287_vm3, %v2253_v57 }
 0x554   : > { %v1956_v55 = vpop.xlane.xlu1 %1955 }
 0x555   : > { %v1982_v42 = vadd.f32 %v1956_v55, %v1934_v29  ;;  %v2230_v51 = vpop.f32.mrf.mxu2 }
 0x556   : > { %v2254_v47 = vadd.f32 %v2230_v51, %v2117_v38 }
 0x557   : > { %1999 = vst.msk [vmem:[#allocation4 + $0x28] sm:$0xff] %vm1993_vm0, %v1982_v42  ;;  %v1972_v60 = vpop.xlane.xlu0 %1971 }
 0x558   : > { %2270 = vst.msk [vmem:[#allocation5 + $0x58] sm:$0xff] %vm1287_vm3, %v2254_v47  ;;  %v1990_v40 = vadd.f32 %v1972_v60, %v1942_v54 }
 0x55a   : > { %2007 = vst.msk [vmem:[#allocation4 + $0x68] sm:$0xff] %vm1993_vm0, %v1990_v40 }
 0x55b   : > { %v1976_v62 = vpop.xlane.xlu2 %1975 }
 0x55c   : > { %v1992_v28 = vadd.f32 %v1976_v62, %v1944_v30  ;;  %v1962_v44 = vpop.xlane.xlu1 %1961 }
 0x55d   : > { %v1985_v27 = vadd.f32 %v1962_v44, %v1937_v13 }
 0x55e   : > { %2009 = vst.msk [vmem:[#allocation4 + $0x78] sm:$0xff] %vm1993_vm0, %v1992_v28 }
 0x55f   : > { %2002 = vst.msk [vmem:[#allocation4 + $0x40] sm:$0xff] %vm1993_vm0, %v1985_v27  ;;  %v1954_v21 = vpop.xlane.xlu0 %1953 }
 0x560   : > { %v1981_v3 = vadd.f32 %v1954_v21, %v1933_v41 }
 0x562   : > { %1998 = vst.msk [vmem:[#allocation4 + $0x20] sm:$0xff] %vm1993_vm0, %v1981_v3 }
 0x563   : > { %v1958_v46 = vpop.xlane.xlu2 %1957 }
 0x564   : > { %v1983_v19 = vadd.f32 %v1958_v46, %v1935_v22 }
 0x566   : > { %2000 = vst.msk [vmem:[#allocation4 + $0x30] sm:$0xff] %vm1993_vm0, %v1983_v19 }
 0x567   : > { %v1960_v8 = vpop.xlane.xlu0 %1959 }
 0x568   : > { %v1984_v26 = vadd.f32 %v1960_v8, %v1936_v14  ;;  %v2233_v37 = vpop.f32.mrf.mxu2 }
 0x569   : > { %v2255_v32 = vadd.f32 %v2233_v37, %v2118_v11 }
 0x56a   : > { %2001 = vst.msk [vmem:[#allocation4 + $0x38] sm:$0xff] %vm1993_vm0, %v1984_v26 }
 0x56b   : > { %2271 = vst.msk [vmem:[#allocation5 + $0x60] sm:$0xff] %vm1287_vm3, %v2255_v32  ;;  %v1964_v1 = vpop.xlane.xlu2 %1963 }
 0x56c   : > { %v1986_v59 = vadd.f32 %v1964_v1, %v1938_v56  ;;  %v2238_v52 = vpop.f32.mrf.mxu3 }
 0x56e   : > { %2003 = vst.msk [vmem:[#allocation4 + $0x48] sm:$0xff] %vm1993_vm0, %v1986_v59 }
 0x570   : > { %v2235_v17 = vpop.f32.mrf.mxu2 }
 0x573   : > { %v2099_v2 = vpop.permute.xlu2 %2098 }
 0x574   : > { %v2120_v31 = vmul.f32 %v2099_v2, %v2024_v7  ;;  %v2094_v33 = vpop.permute.xlu1 %2093  ;;  %v2240_v18 = vpop.f32.mrf.mxu3 }
 0x575   : > { %v2119_v15 = vmul.f32 %v2094_v33, %v2023_v58 }
 0x576   : > { %v2257_v53 = vadd.f32 %v2238_v52, %v2120_v31 }
 0x577   : > { %v2256_v39 = vadd.f32 %v2235_v17, %v2119_v15 }
 0x578   : > { %2273 = vst.msk [vmem:[#allocation5 + $0x70] sm:$0xff] %vm1287_vm3, %v2257_v53 }
 0x579   : > { %2272 = vst.msk [vmem:[#allocation5 + $0x68] sm:$0xff] %vm1287_vm3, %v2256_v39 }
 0x57a   : > { %v2104_v35 = vpop.permute.xlu0 %2103 }
 0x57b   : > { %v2121_v4 = vmul.f32 %v2104_v35, %v2025_v20 }
 0x57d   : > { %v2258_v24 = vadd.f32 %v2240_v18, %v2121_v4 }
 0x57f   : > { %2274 = vst.msk [vmem:[#allocation5 + $0x78] sm:$0xff] %vm1287_vm3, %v2258_v24 }
 0x580 PF: > { %p2988_p7 = scmp.ne.s32.totalorder %s3344_s25, 1 }
 0x582   : > { %2294 = sbr.rel (%p2988_p7) target bundleno = 1585 (0x631), region = 132 }
 0x587   : > { %v2315_v23 = vld [vmem:[#allocation4 + $0x20] sm:$0xff]  ;;  %v2313_v6 = vld [vmem:[#allocation4 + $0x10] sm:$0xff]  ;;  %v3381_v12 = vmov 0   ;;  %v2316_v16 = vld [vmem:[#allocation4 + $0x28] sm:$0xff]  ;;  %vm2455_vm3 = vcmask 519168  }
 0x588   : > { %v2311_v50 = vld [vmem:[#allocation4] sm:$0xff]  ;;  %3241 = vset.pattern.permute.xlu2 %v3381_v12  ;;  %3240 = vset.pattern.permute.xlu1 %v3381_v12  ;;  %3242 = vrcp.f32 %v2315_v23  ;;  %v2314_v34 = vld [vmem:[#allocation4 + $0x18] sm:$0xff]  ;;  %v2312_v61 = vld [vmem:[#allocation4 + $0x8] sm:$0xff] }
 0x589   : > { %3239 = vset.pattern.permute.xlu0 %v3381_v12  ;;  %3244 = vrcp.f32 %v2313_v6  ;;  %v2319_v0 = vld [vmem:[#allocation4 + $0x40] sm:$0xff]  ;;  %v2318_v63 = vld [vmem:[#allocation4 + $0x38] sm:$0xff]  ;;  %v2317_v55 = vld [vmem:[#allocation4 + $0x30] sm:$0xff] }
 0x58a   : > { %3246 = vrcp.f32 %v2311_v50  ;;  %v2322_v51 = vld [vmem:[#allocation4 + $0x58] sm:$0xff]  ;;  %v2321_v54 = vld [vmem:[#allocation4 + $0x50] sm:$0xff]  ;;  %v2320_v10 = vld [vmem:[#allocation4 + $0x48] sm:$0xff] }
 0x58b   : > { %3248 = vrcp.f32 %v2316_v16  ;;  %v2325_v49 = vld [vmem:[#allocation4 + $0x70] sm:$0xff]  ;;  %v2324_v62 = vld [vmem:[#allocation4 + $0x68] sm:$0xff]  ;;  %v2323_v43 = vld [vmem:[#allocation4 + $0x60] sm:$0xff] }
 0x58c   : > { %3250 = vrcp.f32 %v2314_v34  ;;  %v2326_v41 = vld [vmem:[#allocation4 + $0x78] sm:$0xff]  ;;  %v2299_v3 = vld [vmem:[#allocation5 + $0x20] sm:$0xff]  ;;  %v2300_v9 = vld [vmem:[#allocation5 + $0x28] sm:$0xff] }
 0x58d   : > { %3252 = vrcp.f32 %v2312_v61  ;;  %v2303_v8 = vld [vmem:[#allocation5 + $0x40] sm:$0xff]  ;;  %v2306_v32 = vld [vmem:[#allocation5 + $0x58] sm:$0xff]  ;;  %v2297_v56 = vld [vmem:[#allocation5 + $0x10] sm:$0xff] }
 0x58e   : > { %v3243_v25 = vpop.eup %3242  ;;  %3254 = vrcp.f32 %v2319_v0  ;;  %v2295_v59 = vld [vmem:[#allocation5] sm:$0xff]  ;;  %v2309_v53 = vld [vmem:[#allocation5 + $0x70] sm:$0xff]  ;;  %v2298_v39 = vld [vmem:[#allocation5 + $0x18] sm:$0xff] }
 0x58f   : > { %v3245_v57 = vpop.eup %3244  ;;  %2365 = vperm.xlu2 %3241, %v3243_v25   ;;  %3256 = vrcp.f32 %v2318_v63  ;;  %v2296_v35 = vld [vmem:[#allocation5 + $0x8] sm:$0xff]  ;;  %v2302_v34 = vld [vmem:[#allocation5 + $0x38] sm:$0xff]  ;;  %v2301_v61 = vld [vmem:[#allocation5 + $0x30] sm:$0xff] }
 0x590   : > { %v3247_v48 = vpop.eup %3246  ;;  %2355 = vperm.xlu1 %3240, %v3245_v57   ;;  %3258 = vrcp.f32 %v2317_v55  ;;  %v2304_v55 = vld [vmem:[#allocation5 + $0x48] sm:$0xff] }
 0x591   : > { %2345 = vperm.xlu0 %3239, %v3247_v48   ;;  %v3249_v29 = vpop.eup %3248  ;;  %3260 = vrcp.f32 %v2322_v51 }
 0x592   : > { %v3251_v38 = vpop.eup %3250  ;;  %3262 = vrcp.f32 %v2321_v54 }
 0x593   : > { %v3253_v42 = vpop.eup %3252  ;;  %3264 = vrcp.f32 %v2320_v10 }
 0x594   : > { %v3255_v47 = vpop.eup %3254  ;;  %3266 = vrcp.f32 %v2325_v49  ;;  %v2307_v49 = vld [vmem:[#allocation5 + $0x60] sm:$0xff] }
 0x595   : > { %v3257_v60 = vpop.eup %3256  ;;  %3268 = vrcp.f32 %v2324_v62 }
 0x596   : > { %v3259_v40 = vpop.eup %3258  ;;  %3270 = vrcp.f32 %v2323_v43 }
 0x597   : > { %2370 = vperm.xlu2 %3241, %v3249_v29   ;;  %v3261_v30 = vpop.eup %3260  ;;  %3272 = vrcp.f32 %v2326_v41 }
 0x598   : > { %2360 = vperm.xlu1 %3240, %v3251_v38   ;;  %v3263_v13 = vpop.eup %3262  ;;  %v2305_v38 = vld [vmem:[#allocation5 + $0x50] sm:$0xff] }
 0x599   : > { %2350 = vperm.xlu0 %3239, %v3253_v42   ;;  %v3265_v28 = vpop.eup %3264 }
 0x59a   : > { %v3267_v44 = vpop.eup %3266 }
 0x59b   : > { %v3269_v27 = vpop.eup %3268 }
 0x59c   : > { %v3271_v21 = vpop.eup %3270 }
 0x59d   : > { %v3273_v45 = vpop.eup %3272 }
 0x59f   : > { %2385 = vperm.xlu2 %3241, %v3255_v47  }
 0x5a0   : > { %2380 = vperm.xlu1 %3240, %v3257_v60  }
 0x5a1   : > { %2375 = vperm.xlu0 %3239, %v3259_v40   ;;  %v2308_v40 = vld [vmem:[#allocation5 + $0x68] sm:$0xff] }
 0x5a7   : > { %2400 = vperm.xlu2 %3241, %v3261_v30  }
 0x5a8   : > { %2395 = vperm.xlu1 %3240, %v3263_v13  }
 0x5a9   : > { %2390 = vperm.xlu0 %3239, %v3265_v28  }
 0x5af   : > { %2415 = vperm.xlu2 %3241, %v3267_v44  }
 0x5b0   : > { %2410 = vperm.xlu1 %3240, %v3269_v27   ;;  %v2310_v27 = vld [vmem:[#allocation5 + $0x78] sm:$0xff] }
 0x5b1   : > { %2405 = vperm.xlu0 %3239, %v3271_v21  }
 0x5b9   : > { %2420 = vperm.xlu0 %3239, %v3273_v45  }
 0x5e9   : > { %v2366_v22 = vpop.permute.xlu2 %2365 }
 0x5ea   : > { %v2427_v46 = vmul.f32 %v2366_v22, %v2299_v3 }
 0x5ec   : > { %v2443_v36 = vpack.c.bf16 %v2427_v46, %v2427_v46 }
 0x5ee   : > { %2460 = vst.msk [vmem:[%s3695_s15 + $0x10] sm:$0xf] %vm2455_vm3, %v2443_v36 }
 0x5f1   : > { %v2371_v19 = vpop.permute.xlu2 %2370 }
 0x5f2   : > { %v2428_v14 = vmul.f32 %v2371_v19, %v2300_v9 }
 0x5f4   : > { %v2444_v11 = vpack.c.bf16 %v2428_v14, %v2428_v14 }
 0x5f6   : > { %2461 = vst.msk [vmem:[%s3695_s15 + $0x14] sm:$0xf] %vm2455_vm3, %v2444_v11 }
 0x5f9   : > { %v2386_v5 = vpop.permute.xlu2 %2385 }
 0x5fa   : > { %v2431_v26 = vmul.f32 %v2386_v5, %v2303_v8 }
 0x5fc   : > { %v2447_v37 = vpack.c.bf16 %v2431_v26, %v2431_v26 }
 0x5fe   : > { %2464 = vst.msk [vmem:[%s3695_s15 + $0x20] sm:$0xf] %vm2455_vm3, %v2447_v37 }
 0x601   : > { %v2401_v1 = vpop.permute.xlu2 %2400 }
 0x602   : > { %v2434_v7 = vmul.f32 %v2401_v1, %v2306_v32  ;;  %v2356_v52 = vpop.permute.xlu1 %2355 }
 0x603   : > { %v2425_v58 = vmul.f32 %v2356_v52, %v2297_v56  ;;  %v2346_v2 = vpop.permute.xlu0 %2345 }
 0x604   : > { %v2450_v31 = vpack.c.bf16 %v2434_v7, %v2434_v7  ;;  %v2423_v33 = vmul.f32 %v2346_v2, %v2295_v59 }
 0x605   : > { %v2441_v15 = vpack.c.bf16 %v2425_v58, %v2425_v58 }
 0x606   : > { %2467 = vst.msk [vmem:[%s3695_s15 + $0x2c] sm:$0xf] %vm2455_vm3, %v2450_v31  ;;  %v2439_v17 = vpack.c.bf16 %v2423_v33, %v2423_v33 }
 0x607   : > { %2458 = vst.msk [vmem:[%s3695_s15 + $0x8] sm:$0xf] %vm2455_vm3, %v2441_v15 }
 0x608   : > { %2456 = vst.msk [vmem:[%s3695_s15] sm:$0xf] %vm2455_vm3, %v2439_v17 }
 0x609   : > { %v2416_v20 = vpop.permute.xlu2 %2415 }
 0x60a   : > { %v2437_v4 = vmul.f32 %v2416_v20, %v2309_v53  ;;  %v2361_v18 = vpop.permute.xlu1 %2360 }
 0x60b   : > { %v2426_v24 = vmul.f32 %v2361_v18, %v2298_v39  ;;  %v2351_v23 = vpop.permute.xlu0 %2350 }
 0x60c   : > { %v2453_v6 = vpack.c.bf16 %v2437_v4, %v2437_v4  ;;  %v2424_v50 = vmul.f32 %v2351_v23, %v2296_v35 }
 0x60d   : > { %v2442_v12 = vpack.c.bf16 %v2426_v24, %v2426_v24 }
 0x60e   : > { %2470 = vst.msk [vmem:[%s3695_s15 + $0x38] sm:$0xf] %vm2455_vm3, %v2453_v6  ;;  %v2440_v16 = vpack.c.bf16 %v2424_v50, %v2424_v50 }
 0x60f   : > { %2459 = vst.msk [vmem:[%s3695_s15 + $0xc] sm:$0xf] %vm2455_vm3, %v2442_v12 }
 0x610   : > { %2457 = vst.msk [vmem:[%s3695_s15 + $0x4] sm:$0xf] %vm2455_vm3, %v2440_v16 }
 0x612   : > { %v2381_v25 = vpop.permute.xlu1 %2380 }
 0x613   : > { %v2430_v57 = vmul.f32 %v2381_v25, %v2302_v34  ;;  %v2376_v48 = vpop.permute.xlu0 %2375 }
 0x614   : > { %v2429_v0 = vmul.f32 %v2376_v48, %v2301_v61 }
 0x615   : > { %v2446_v29 = vpack.c.bf16 %v2430_v57, %v2430_v57 }
 0x616   : > { %v2445_v63 = vpack.c.bf16 %v2429_v0, %v2429_v0 }
 0x617   : > { %2463 = vst.msk [vmem:[%s3695_s15 + $0x1c] sm:$0xf] %vm2455_vm3, %v2446_v29 }
 0x618   : > { %2462 = vst.msk [vmem:[%s3695_s15 + $0x18] sm:$0xf] %vm2455_vm3, %v2445_v63 }
 0x61a   : > { %v2396_v42 = vpop.permute.xlu1 %2395 }
 0x61b   : > { %v2433_v51 = vmul.f32 %v2396_v42, %v2305_v38  ;;  %v2391_v47 = vpop.permute.xlu0 %2390 }
 0x61c   : > { %v2432_v54 = vmul.f32 %v2391_v47, %v2304_v55 }
 0x61d   : > { %v2449_v60 = vpack.c.bf16 %v2433_v51, %v2433_v51 }
 0x61e   : > { %v2448_v10 = vpack.c.bf16 %v2432_v54, %v2432_v54 }
 0x61f   : > { %2466 = vst.msk [vmem:[%s3695_s15 + $0x28] sm:$0xf] %vm2455_vm3, %v2449_v60 }
 0x620   : > { %2465 = vst.msk [vmem:[%s3695_s15 + $0x24] sm:$0xf] %vm2455_vm3, %v2448_v10 }
 0x622   : > { %v2411_v30 = vpop.permute.xlu1 %2410 }
 0x623   : > { %v2436_v62 = vmul.f32 %v2411_v30, %v2308_v40  ;;  %v2406_v13 = vpop.permute.xlu0 %2405 }
 0x624   : > { %v2435_v43 = vmul.f32 %v2406_v13, %v2307_v49 }
 0x625   : > { %v2452_v28 = vpack.c.bf16 %v2436_v62, %v2436_v62 }
 0x626   : > { %v2451_v44 = vpack.c.bf16 %v2435_v43, %v2435_v43 }
 0x627   : > { %2469 = vst.msk [vmem:[%s3695_s15 + $0x34] sm:$0xf] %vm2455_vm3, %v2452_v28 }
 0x628   : > { %2468 = vst.msk [vmem:[%s3695_s15 + $0x30] sm:$0xf] %vm2455_vm3, %v2451_v44 }
 0x62b   : > { %v2421_v41 = vpop.permute.xlu0 %2420 }
 0x62c   : > { %v2438_v21 = vmul.f32 %v2421_v41, %v2310_v27 }
 0x62e   : > { %v2454_v45 = vpack.c.bf16 %v2438_v21, %v2438_v21 }
 0x630   : > { %2471 = vst.msk [vmem:[%s3695_s15 + $0x3c] sm:$0xf] %vm2455_vm3, %v2454_v45 }
 0x631 PF: > { %s16_s9 = sadd.s32 1, %s3376_s9   ;;  %s4797_s25 = sld [smem:[#allocation15_spill]] }
 0x632   : > { %p4688_p8 = scmp.ge.s32.totalorder %s16_s9, 50   ;;  %s4798_s26 = sld [smem:[#allocation8_spill]] }
 0x633   : > { %s4799_s18 = sld [smem:[#allocation9_spill]]  ;;  %s4806_s21 = smov %s3332_s22 }
 0x634   : > { %s4800_s27 = sld [smem:[#allocation10_spill]]  ;;  %s4807_s22 = smov %s3508_s19 }
 0x635   : > { %s4801_s28 = sld [smem:[#allocation11_spill]]  ;;  %s4808_s23 = smov %s3340_s24 }
 0x636   : > { %s4802_s29 = sld [smem:[#allocation12_spill]]  ;;  %15 = sbr.rel (!%p4688_p8) target bundleno = 11 (0xb), region = 186 }
 0x637   : > { %s4803_s30 = sld [smem:[#allocation13_spill]]  ;;  %s4809_s24 = smov %s4797_s25 }
 0x638   : > { %s4804_s7 = sld [smem:[#allocation14_spill]]  ;;  %s4810_s25 = smov %s4798_s26 }
 0x639   : > { %s4805_s8 = sld [smem:[#allocation16_spill]]  ;;  %s4811_s26 = smov %s4799_s18 }

// kernel: forward.5
= control target key start
LH: loop header
LB: loop body
LE: loop exit
PB: predicated region body
PF: predicated region fallthrough
CT: control target
= control target key end

     0   :  { %s2044_s0 = inlined_call_operand.vmem [shape: bf16[512,384], index: 0, kind: input, shape index: {}]   ;;  %s2045_s1 = inlined_call_operand.vmem [shape: bf16[384,384], index: 1, kind: input, shape index: {}]   ;;  %s2046_s2 = inlined_call_operand.vmem [shape: f32[1,384], index: 2, kind: input, shape index: {}]   ;;  %s2047_s3 = inlined_call_operand.hbm [shape: f32[512,384], index: 3, kind: output, shape index: {}]  }
   0x1   :  { %2052 = sst [smem:[#allocation13_spill]] %s2044_s0 }
   0x2   :  { %2053 = sst [smem:[#allocation14_spill]] %s2045_s1 }
   0x3   :  { %2054 = sst [smem:[#allocation15_spill]] %s2046_s2 }
   0x4   :  { %2055 = sst [smem:[#allocation16_spill]] %s2047_s3 }
   0x5   :  { %8 = vsyncpa [#allocation6], 0 }
   0x6   :  { %10 = vsyncpa [#allocation6 + $0x1], 0  ;;  %s1623_s12 = smov 0   ;;  %s1625_s13 = smov 0  }
   0x7   :  { %s1627_s14 = smov 0   ;;  %s1629_s15 = smov 0  }
   0x8   :  { %s1631_s16 = smov 0   ;;  %s1633_s17 = smov 0  }
   0x9   :  { %s1635_s18 = smov 0   ;;  %s1637_s19 = smov 0  }
   0xa   :  { %s1639_s20 = smov 0   ;;  %s1641_s21 = smov 0  }
   0xb   :  { %s1643_s22 = smov 0   ;;  %s1645_s23 = smov 0  }
   0xc   :  { %s1647_s24 = smov 0   ;;  %s1649_s25 = smov 0  }
   0xd LB: > { %2056 = sst [smem:[#allocation8_spill]] %s1573_s19  ;;  %s28_s28 = sadd.s32 1, %s1585_s22  ;;  %s1597_s25 = sphi %s1649_s25, %s16_s25   ;;  %s1593_s24 = sphi %s1647_s24, %s2091_s24   ;;  %s1589_s23 = sphi %s1645_s23, %s2090_s23   ;;  %s1585_s22 = sphi %s1643_s22, %s2089_s22   ;;  %s1581_s21 = sphi %s1641_s21, %s2088_s21   ;;  %s1577_s20 = sphi %s1639_s20, %s2087_s20   ;;  %s1573_s19 = sphi %s1637_s19, %s2086_s19   ;;  %s1569_s18 = sphi %s1635_s18, %s2085_s18   ;;  %s1565_s17 = sphi %s1633_s17, %s2084_s17   ;;  %s1561_s16 = sphi %s1631_s16, %s2083_s16   ;;  %s1557_s15 = sphi %s1629_s15, %s2082_s15   ;;  %s1553_s14 = sphi %s1627_s14, %s2081_s14   ;;  %s1549_s13 = sphi %s1625_s13, %s2080_s13   ;;  %s1545_s12 = sphi %s1623_s12, %s2079_s12  }
   0xe   : > { %2057 = sst [smem:[#allocation9_spill]] %s1581_s21  ;;  %s31_s29 = sadd.s32 1, %s1589_s23 }
   0xf   : > { %p29_p0 = scmp.ge.s32.totalorder %s28_s28, 3  ;;  %s35_s30 = sadd.s32 1, %s1593_s24 }
  0x10   : > { %s44_s4 = sadd.s32 1, %s1569_s18  ;;  %p51_p1 = scmp.ne.s32.totalorder %s1569_s18, %s1565_s17 }
  0x11   : > { %s2093_s28 = smov (%p29_p0, %s28_s28), 0  ;;  %s2095_s29 = smov (!%p29_p0, %s31_s29), %s1589_s23 }
  0x12   : > { %2058 = sst [smem:[#allocation10_spill]] %s2093_s28  ;;  %s40_s5 = ssub.s32 %s1585_s22, %s2093_s28 }
  0x13   : > { %p52_p2 = scmp.eq.s32.totalorder %s1597_s25, 0  ;;  %p33_p3 = scmp.ge.s32.totalorder %s2095_s29, 3 }
  0x14   : > { %s72_s6 = sadd.s32 1, %s1561_s16  ;;  %p79_p5 = scmp.ne.s32.totalorder %s1561_s16, %s1557_s15 }
  0x15   : > { %p1708_p4 = por %p52_p2, %p51_p1  ;;  %s2097_s29 = smov (%p33_p3, %s2095_s29), 0 }
  0x16   : > { %2060 = sst [smem:[#allocation11_spill]] %s2097_s29  ;;  %s2099_s30 = smov (!%p33_p3, %s35_s30), %s1593_s24 }
  0x17   : > { %s68_s8 = ssub.s32 %s1589_s23, %s2097_s29  ;;  %p1719_p6 = por %p79_p5, %p52_p2 }
  0x18   : > { %p37_p7 = scmp.ge.s32.totalorder %s2099_s30, 2  ;;  %s69_s10 = sor.u32 %s68_s8, %s40_s5 }
  0x19   : > { %p70_p8 = scmp.eq.s32.totalorder %s69_s10, 0  ;;  %s126_s11 = sadd.s32 1, %s1553_s14 }
  0x1a   : > { %s2101_s30 = smov (%p37_p7, %s2099_s30), 0  ;;  %p136_p9 = scmp.ne.s32.totalorder %s1553_s14, %s1549_s13 }
  0x1b   : > { %2062 = sst [smem:[#allocation12_spill]] %s2101_s30  ;;  %s39_s26 = ssub.s32 %s1593_s24, %s2101_s30 }
  0x1c   : > { %s1727_s27 = scalar_select %p70_p8, %s1561_s16, %s72_s6  }
  0x1d   : > { %s41_s28 = sor.u32 %s40_s5, %s39_s26  ;;  %s123_s29 = sor.u32 %s68_s8, %s39_s26 }
  0x1e   : > { %p42_p10 = scmp.eq.s32.totalorder %s41_s28, 0  ;;  %p124_p11 = scmp.eq.s32.totalorder %s123_s29, 0 }
  0x1f   : > { %s2063_s3 = sadd.s32 4294967295, %s1597_s25   ;;  %p142_p13 = scmp.ne.s32.totalorder %s1549_s13, %s1545_s12 }
  0x20   : > { %p137_p12 = scmp.eq.s32.totalorder %s2063_s3, 17  ;;  %s2065_s2 = sadd.s32 4294967294, %s1597_s25  }
  0x21   : > { %s1738_s21 = scalar_select %p42_p10, %s1569_s18, %s44_s4  }
  0x22   : > { %s1741_s19 = scalar_select %p124_p11, %s1553_s14, %s126_s11  }
  0x23   : > { %p1743_p0 = por %p137_p12, %p136_p9  ;;  %p143_p1 = scmp.eq.s32.totalorder %s2065_s2, 17 }
  0x24   : > { %p1163_p3 = scmp.ge.s32.totalorder %s1597_s25, 18 }
  0x25   : > { %p1749_p2 = por %p143_p1, %p142_p13 }
  0x26   : > { %159 = sbr.rel (%p1163_p3) target bundleno = 111 (0x6f), region = 16 }
  0x2b   : > { %162 = sbr.rel (!%p1708_p4) target bundleno = 85 (0x55), region = 20  ;;  %s164_s3 = sand.u32 (%p1708_p4), 1, %s1569_s18  }
  0x2c   : > { %s1328_s26 = smul.u32 (%p1708_p4), 96, %s1593_s24  ;;  %s1164_s28 = sshll.u32 (%p1708_p4), %s164_s3, 7 }
  0x2d   : > { %s2067_s0 = sld [smem:[#allocation13_spill]] (%p1708_p4)  ;;  %s1767_s7 = scalar_lea.vmem (%p1708_p4), [#allocation3], %s1164_s28 }
  0x2e   : > { %s169_s29 = sadd.s32 (%p1708_p4), %s1585_s22, %s1328_s26 }
  0x2f   : > { %s1167_s4 = sshll.u32 (%p1708_p4), %s169_s29, 2 }
  0x33   : > { %s1762_s8 = scalar_lea.vmem %s2067_s0, %s1167_s4 }
  0x34   : > { %v188_v0 = vld [vmem:[%s1762_s8] sm:$0xf]  ;;  %v190_v1 = vld [vmem:[%s1762_s8 + $0xc] sm:$0xf]  ;;  %v192_v2 = vld [vmem:[%s1762_s8 + $0x18] sm:$0xf] }
  0x35   : > { %189 = vst [vmem:[%s1767_s7] sm:$0xf] %v188_v0  ;;  %v194_v3 = vld [vmem:[%s1762_s8 + $0x24] sm:$0xf]  ;;  %v196_v4 = vld [vmem:[%s1762_s8 + $0x30] sm:$0xf] }
  0x36   : > { %191 = vst [vmem:[%s1767_s7 + $0x4] sm:$0xf] %v190_v1  ;;  %v198_v5 = vld [vmem:[%s1762_s8 + $0x3c] sm:$0xf]  ;;  %v200_v6 = vld [vmem:[%s1762_s8 + $0x48] sm:$0xf] }
  0x37   : > { %193 = vst [vmem:[%s1767_s7 + $0x8] sm:$0xf] %v192_v2  ;;  %v202_v7 = vld [vmem:[%s1762_s8 + $0x54] sm:$0xf]  ;;  %v204_v8 = vld [vmem:[%s1762_s8 + $0x60] sm:$0xf] }
  0x38   : > { %195 = vst [vmem:[%s1767_s7 + $0xc] sm:$0xf] %v194_v3  ;;  %v206_v9 = vld [vmem:[%s1762_s8 + $0x6c] sm:$0xf]  ;;  %v208_v10 = vld [vmem:[%s1762_s8 + $0x78] sm:$0xf] }
  0x39   : > { %197 = vst [vmem:[%s1767_s7 + $0x10] sm:$0xf] %v196_v4  ;;  %v210_v11 = vld [vmem:[%s1762_s8 + $0x84] sm:$0xf]  ;;  %v212_v12 = vld [vmem:[%s1762_s8 + $0x90] sm:$0xf] }
  0x3a   : > { %199 = vst [vmem:[%s1767_s7 + $0x14] sm:$0xf] %v198_v5  ;;  %v214_v13 = vld [vmem:[%s1762_s8 + $0x9c] sm:$0xf]  ;;  %v216_v14 = vld [vmem:[%s1762_s8 + $0xa8] sm:$0xf] }
  0x3b   : > { %201 = vst [vmem:[%s1767_s7 + $0x18] sm:$0xf] %v200_v6  ;;  %v218_v15 = vld [vmem:[%s1762_s8 + $0xb4] sm:$0xf]  ;;  %v220_v16 = vld [vmem:[%s1762_s8 + $0xc0] sm:$0xf] }
  0x3c   : > { %203 = vst [vmem:[%s1767_s7 + $0x1c] sm:$0xf] %v202_v7  ;;  %v222_v17 = vld [vmem:[%s1762_s8 + $0xcc] sm:$0xf]  ;;  %v224_v18 = vld [vmem:[%s1762_s8 + $0xd8] sm:$0xf] }
  0x3d   : > { %205 = vst [vmem:[%s1767_s7 + $0x20] sm:$0xf] %v204_v8  ;;  %v226_v19 = vld [vmem:[%s1762_s8 + $0xe4] sm:$0xf]  ;;  %v228_v20 = vld [vmem:[%s1762_s8 + $0xf0] sm:$0xf] }
  0x3e   : > { %207 = vst [vmem:[%s1767_s7 + $0x24] sm:$0xf] %v206_v9  ;;  %v230_v21 = vld [vmem:[%s1762_s8 + $0xfc] sm:$0xf]  ;;  %v232_v22 = vld [vmem:[%s1762_s8 + $0x108] sm:$0xf] }
  0x3f   : > { %209 = vst [vmem:[%s1767_s7 + $0x28] sm:$0xf] %v208_v10  ;;  %v234_v23 = vld [vmem:[%s1762_s8 + $0x114] sm:$0xf]  ;;  %v236_v24 = vld [vmem:[%s1762_s8 + $0x120] sm:$0xf] }
  0x40   : > { %211 = vst [vmem:[%s1767_s7 + $0x2c] sm:$0xf] %v210_v11  ;;  %v238_v25 = vld [vmem:[%s1762_s8 + $0x12c] sm:$0xf]  ;;  %v240_v26 = vld [vmem:[%s1762_s8 + $0x138] sm:$0xf] }
  0x41   : > { %213 = vst [vmem:[%s1767_s7 + $0x30] sm:$0xf] %v212_v12  ;;  %v242_v27 = vld [vmem:[%s1762_s8 + $0x144] sm:$0xf]  ;;  %v244_v28 = vld [vmem:[%s1762_s8 + $0x150] sm:$0xf] }
  0x42   : > { %215 = vst [vmem:[%s1767_s7 + $0x34] sm:$0xf] %v214_v13  ;;  %v246_v29 = vld [vmem:[%s1762_s8 + $0x15c] sm:$0xf]  ;;  %v248_v30 = vld [vmem:[%s1762_s8 + $0x168] sm:$0xf] }
  0x43   : > { %217 = vst [vmem:[%s1767_s7 + $0x38] sm:$0xf] %v216_v14  ;;  %v250_v31 = vld [vmem:[%s1762_s8 + $0x174] sm:$0xf] }
  0x44   : > { %219 = vst [vmem:[%s1767_s7 + $0x3c] sm:$0xf] %v218_v15 }
  0x45   : > { %221 = vst [vmem:[%s1767_s7 + $0x40] sm:$0xf] %v220_v16 }
  0x46   : > { %223 = vst [vmem:[%s1767_s7 + $0x44] sm:$0xf] %v222_v17 }
  0x47   : > { %225 = vst [vmem:[%s1767_s7 + $0x48] sm:$0xf] %v224_v18 }
  0x48   : > { %227 = vst [vmem:[%s1767_s7 + $0x4c] sm:$0xf] %v226_v19 }
  0x49   : > { %229 = vst [vmem:[%s1767_s7 + $0x50] sm:$0xf] %v228_v20 }
  0x4a   : > { %231 = vst [vmem:[%s1767_s7 + $0x54] sm:$0xf] %v230_v21 }
  0x4b   : > { %233 = vst [vmem:[%s1767_s7 + $0x58] sm:$0xf] %v232_v22 }
  0x4c   : > { %235 = vst [vmem:[%s1767_s7 + $0x5c] sm:$0xf] %v234_v23 }
  0x4d   : > { %237 = vst [vmem:[%s1767_s7 + $0x60] sm:$0xf] %v236_v24 }
  0x4e   : > { %239 = vst [vmem:[%s1767_s7 + $0x64] sm:$0xf] %v238_v25 }
  0x4f   : > { %241 = vst [vmem:[%s1767_s7 + $0x68] sm:$0xf] %v240_v26 }
  0x50   : > { %243 = vst [vmem:[%s1767_s7 + $0x6c] sm:$0xf] %v242_v27 }
  0x51   : > { %245 = vst [vmem:[%s1767_s7 + $0x70] sm:$0xf] %v244_v28 }
  0x52   : > { %247 = vst [vmem:[%s1767_s7 + $0x74] sm:$0xf] %v246_v29 }
  0x53   : > { %249 = vst [vmem:[%s1767_s7 + $0x78] sm:$0xf] %v248_v30 }
  0x54   : > { %251 = vst [vmem:[%s1767_s7 + $0x7c] sm:$0xf] %v250_v31 }
  0x55 PF: > { %339 = sbr.rel (!%p1719_p6) target bundleno = 111 (0x6f), region = 61  ;;  %s341_s11 = sand.u32 (%p1719_p6), 1, %s1561_s16  }
  0x56   : > { %s1329_s3 = smul.u32 (%p1719_p6), 48, %s1585_s22  ;;  %s1168_s26 = sshll.u32 (%p1719_p6), %s341_s11, 6 }
  0x57   : > { %s2068_s1 = sld [smem:[#allocation14_spill]] (%p1719_p6)  ;;  %s343_s9 = scalar_lea.vmem (%p1719_p6), [#allocation4], %s1168_s26 }
  0x58   : > { %s346_s28 = sadd.s32 (%p1719_p6), %s1589_s23, %s1329_s3 }
  0x59   : > { %s1171_s29 = sshll.u32 (%p1719_p6), %s346_s28, 2 }
  0x5d   : > { %s1838_s2 = scalar_lea.vmem %s2068_s1, %s1171_s29 }
  0x5e   : > { %v365_v32 = vld [vmem:[%s1838_s2] sm:$0xf]  ;;  %v367_v33 = vld [vmem:[%s1838_s2 + $0xc] sm:$0xf]  ;;  %v369_v34 = vld [vmem:[%s1838_s2 + $0x18] sm:$0xf] }
  0x5f   : > { %366 = vst [vmem:[%s343_s9] sm:$0xf] %v365_v32  ;;  %v371_v35 = vld [vmem:[%s1838_s2 + $0x24] sm:$0xf]  ;;  %v373_v36 = vld [vmem:[%s1838_s2 + $0x30] sm:$0xf] }
  0x60   : > { %368 = vst [vmem:[%s343_s9 + $0x4] sm:$0xf] %v367_v33  ;;  %v375_v37 = vld [vmem:[%s1838_s2 + $0x3c] sm:$0xf]  ;;  %v377_v38 = vld [vmem:[%s1838_s2 + $0x48] sm:$0xf] }
  0x61   : > { %370 = vst [vmem:[%s343_s9 + $0x8] sm:$0xf] %v369_v34  ;;  %v379_v39 = vld [vmem:[%s1838_s2 + $0x54] sm:$0xf]  ;;  %v381_v40 = vld [vmem:[%s1838_s2 + $0x60] sm:$0xf] }
  0x62   : > { %372 = vst [vmem:[%s343_s9 + $0xc] sm:$0xf] %v371_v35  ;;  %v383_v41 = vld [vmem:[%s1838_s2 + $0x6c] sm:$0xf]  ;;  %v385_v42 = vld [vmem:[%s1838_s2 + $0x78] sm:$0xf] }
  0x63   : > { %374 = vst [vmem:[%s343_s9 + $0x10] sm:$0xf] %v373_v36  ;;  %v387_v43 = vld [vmem:[%s1838_s2 + $0x84] sm:$0xf]  ;;  %v389_v44 = vld [vmem:[%s1838_s2 + $0x90] sm:$0xf] }
  0x64   : > { %376 = vst [vmem:[%s343_s9 + $0x14] sm:$0xf] %v375_v37  ;;  %v391_v45 = vld [vmem:[%s1838_s2 + $0x9c] sm:$0xf]  ;;  %v393_v46 = vld [vmem:[%s1838_s2 + $0xa8] sm:$0xf] }
  0x65   : > { %378 = vst [vmem:[%s343_s9 + $0x18] sm:$0xf] %v377_v38  ;;  %v395_v47 = vld [vmem:[%s1838_s2 + $0xb4] sm:$0xf] }
  0x66   : > { %380 = vst [vmem:[%s343_s9 + $0x1c] sm:$0xf] %v379_v39 }
  0x67   : > { %382 = vst [vmem:[%s343_s9 + $0x20] sm:$0xf] %v381_v40 }
  0x68   : > { %384 = vst [vmem:[%s343_s9 + $0x24] sm:$0xf] %v383_v41 }
  0x69   : > { %386 = vst [vmem:[%s343_s9 + $0x28] sm:$0xf] %v385_v42 }
  0x6a   : > { %388 = vst [vmem:[%s343_s9 + $0x2c] sm:$0xf] %v387_v43 }
  0x6b   : > { %390 = vst [vmem:[%s343_s9 + $0x30] sm:$0xf] %v389_v44 }
  0x6c   : > { %392 = vst [vmem:[%s343_s9 + $0x34] sm:$0xf] %v391_v45 }
  0x6d   : > { %394 = vst [vmem:[%s343_s9 + $0x38] sm:$0xf] %v393_v46 }
  0x6e   : > { %396 = vst [vmem:[%s343_s9 + $0x3c] sm:$0xf] %v395_v47 }
  0x6f PF: > { %p1172_p4 = scmp.ge.s32.totalorder %s1597_s25, 1  ;;  %p457_p5 = scmp.lt.s32.totalorder %s1597_s25, 19 }
  0x71   : > { %p458_p6 = pnand %p1172_p4, %p457_p5 }
  0x72   : > { %s464_s8 = sand.u32 (!%p458_p6), 1, %s1565_s17   ;;  %s471_s7 = sand.u32 (!%p458_p6), 1, %s1557_s15  }
  0x73   : > { %461 = sbr.rel (%p458_p6) target bundleno = 453 (0x1c5), region = 106  ;;  %s1173_s11 = sshll.u32 (!%p458_p6), %s464_s8, 7 }
  0x74   : > { %s1174_s3 = sshll.u32 (!%p458_p6), %s471_s7, 6  ;;  %s498_s26 = sand.u32 (!%p458_p6), 1, %s1549_s13  }
  0x75   : > { %p503_p7 = scmp.lt.s32.totalorder (!%p458_p6), %s1577_s20, 2  ;;  %s1175_s28 = sshll.u32 (!%p458_p6), %s498_s26, 8 }
  0x76   : > { %s2069_s2 = sld [smem:[#allocation15_spill]] (!%p458_p6)  ;;  %s1871_s0 = scalar_lea.vmem (!%p458_p6), [#allocation3], %s1173_s11 }
  0x77   : > { %s1873_s1 = scalar_lea.vmem (!%p458_p6), [#allocation4], %s1174_s3  ;;  %s1875_s30 = scalar_lea.vmem (!%p458_p6), [#allocation5], %s1175_s28 }
  0x78   : > { %s1865_s29 = scalar_select %p503_p7, %s1577_s20, 2 }
  0x79   : > { %s2070_s15 = sld [smem:[#allocation8_spill]] }
  0x7c   : > { %s505_s9 = scalar_lea.vmem %s2069_s2, %s1865_s29 }
  0x7f   : > { %p1176_p8 = scmp.ne.s32.totalorder %s2070_s15, 0 }
  0x81   : > { %510 = sbr.rel (%p1176_p8) target bundleno = 167 (0xa7), region = 118 }
  0x86   : > { %v1599_v48 = vmov 0.0  }
  0x87   : > { %511 = vst [vmem:[#allocation2 + $0xb0] sm:$0xff] %v1599_v48 }
  0x88   : > { %512 = vst [vmem:[#allocation2] sm:$0xff] %v1599_v48 }
  0x89   : > { %513 = vst [vmem:[#allocation2 + $0xd8] sm:$0xff] %v1599_v48 }
  0x8a   : > { %514 = vst [vmem:[#allocation2 + $0x18] sm:$0xff] %v1599_v48 }
  0x8b   : > { %515 = vst [vmem:[#allocation2 + $0x50] sm:$0xff] %v1599_v48 }
  0x8c   : > { %516 = vst [vmem:[#allocation2 + $0x68] sm:$0xff] %v1599_v48 }
  0x8d   : > { %517 = vst [vmem:[#allocation2 + $0x30] sm:$0xff] %v1599_v48 }
  0x8e   : > { %518 = vst [vmem:[#allocation2 + $0x48] sm:$0xff] %v1599_v48 }
  0x8f   : > { %519 = vst [vmem:[#allocation2 + $0x80] sm:$0xff] %v1599_v48 }
  0x90   : > { %520 = vst [vmem:[#allocation2 + $0x88] sm:$0xff] %v1599_v48 }
  0x91   : > { %521 = vst [vmem:[#allocation2 + $0xe8] sm:$0xff] %v1599_v48 }
  0x92   : > { %522 = vst [vmem:[#allocation2 + $0xb8] sm:$0xff] %v1599_v48 }
  0x93   : > { %523 = vst [vmem:[#allocation2 + $0x60] sm:$0xff] %v1599_v48 }
  0x94   : > { %524 = vst [vmem:[#allocation2 + $0xf0] sm:$0xff] %v1599_v48 }
  0x95   : > { %525 = vst [vmem:[#allocation2 + $0x8] sm:$0xff] %v1599_v48 }
  0x96   : > { %526 = vst [vmem:[#allocation2 + $0x78] sm:$0xff] %v1599_v48 }
  0x97   : > { %527 = vst [vmem:[#allocation2 + $0x38] sm:$0xff] %v1599_v48 }
  0x98   : > { %528 = vst [vmem:[#allocation2 + $0x58] sm:$0xff] %v1599_v48 }
  0x99   : > { %529 = vst [vmem:[#allocation2 + $0x40] sm:$0xff] %v1599_v48 }
  0x9a   : > { %530 = vst [vmem:[#allocation2 + $0xc8] sm:$0xff] %v1599_v48 }
  0x9b   : > { %531 = vst [vmem:[#allocation2 + $0xe0] sm:$0xff] %v1599_v48 }
  0x9c   : > { %532 = vst [vmem:[#allocation2 + $0x90] sm:$0xff] %v1599_v48 }
  0x9d   : > { %533 = vst [vmem:[#allocation2 + $0x70] sm:$0xff] %v1599_v48 }
  0x9e   : > { %534 = vst [vmem:[#allocation2 + $0xc0] sm:$0xff] %v1599_v48 }
  0x9f   : > { %535 = vst [vmem:[#allocation2 + $0xa8] sm:$0xff] %v1599_v48 }
  0xa0   : > { %536 = vst [vmem:[#allocation2 + $0xd0] sm:$0xff] %v1599_v48 }
  0xa1   : > { %537 = vst [vmem:[#allocation2 + $0x10] sm:$0xff] %v1599_v48 }
  0xa2   : > { %538 = vst [vmem:[#allocation2 + $0x28] sm:$0xff] %v1599_v48 }
  0xa3   : > { %539 = vst [vmem:[#allocation2 + $0xa0] sm:$0xff] %v1599_v48 }
  0xa4   : > { %540 = vst [vmem:[#allocation2 + $0xf8] sm:$0xff] %v1599_v48 }
  0xa5   : > { %541 = vst [vmem:[#allocation2 + $0x20] sm:$0xff] %v1599_v48 }
  0xa6   : > { %542 = vst [vmem:[#allocation2 + $0x98] sm:$0xff] %v1599_v48 }
  0xa7 PF: > { %v1303_v49 = vld [vmem:[%s1873_s1 + $0x38] sm:$0xff]  ;;  %v1302_v50 = vld [vmem:[%s1873_s1 + $0x30] sm:$0xff]  ;;  %v1301_v51 = vld [vmem:[%s1873_s1 + $0x28] sm:$0xff] }
  0xa8   : > { %767 = vmatpush.bf16.msra.mxu0 %v1303_v49  ;;  %1304 = vmatpush.bf16.msra.mxu1 %v1303_v49  ;;  %v1300_v52 = vld [vmem:[%s1873_s1 + $0x20] sm:$0xff]  ;;  %v1299_v53 = vld [vmem:[%s1873_s1 + $0x18] sm:$0xff]  ;;  %v1298_v54 = vld [vmem:[%s1873_s1 + $0x10] sm:$0xff] }
  0xa9   : > { %1305 = vmatpush.bf16.msra.mxu2 %v1303_v49  ;;  %1306 = vmatpush.bf16.msra.mxu3 %v1303_v49  ;;  %v1297_v55 = vld [vmem:[%s1873_s1 + $0x8] sm:$0xff]  ;;  %v1296_v56 = vld [vmem:[%s1873_s1] sm:$0xff]  ;;  %v1282_v1 = vld [vmem:[%s1871_s0 + $0x10] sm:$0xff] }
  0xaa   : > { %v1280_v57 = vld [vmem:[%s1871_s0] sm:$0xff]  ;;  %v1281_v61 = vld [vmem:[%s1871_s0 + $0x8] sm:$0xff]  ;;  %v1286_v2 = vld [vmem:[%s1871_s0 + $0x30] sm:$0xff] }
  0xab   : > { %v1284_v58 = vld [vmem:[%s1871_s0 + $0x20] sm:$0xff]  ;;  %v1285_v62 = vld [vmem:[%s1871_s0 + $0x28] sm:$0xff]  ;;  %v1290_v3 = vld [vmem:[%s1871_s0 + $0x50] sm:$0xff] }
  0xac   : > { %768 = vmatpush.bf16.msra.mxu0 %v1302_v50  ;;  %1307 = vmatpush.bf16.msra.mxu1 %v1302_v50  ;;  %v1288_v59 = vld [vmem:[%s1871_s0 + $0x40] sm:$0xff]  ;;  %v1289_v63 = vld [vmem:[%s1871_s0 + $0x48] sm:$0xff]  ;;  %v1294_v4 = vld [vmem:[%s1871_s0 + $0x70] sm:$0xff] }
  0xad   : > { %1308 = vmatpush.bf16.msra.mxu2 %v1302_v50  ;;  %1309 = vmatpush.bf16.msra.mxu3 %v1302_v50  ;;  %v1292_v60 = vld [vmem:[%s1871_s0 + $0x60] sm:$0xff]  ;;  %v1293_v0 = vld [vmem:[%s1871_s0 + $0x68] sm:$0xff]  ;;  %v1283_v5 = vld [vmem:[%s1871_s0 + $0x18] sm:$0xff] }
  0xae   : > { %v1287_v6 = vld [vmem:[%s1871_s0 + $0x38] sm:$0xff]  ;;  %v543_v9 = vld [vmem:[#allocation2 + $0xb0] sm:$0xff]  ;;  %v551_v10 = vld [vmem:[#allocation2 + $0x80] sm:$0xff] }
  0xaf   : > { %v1291_v7 = vld [vmem:[%s1871_s0 + $0x58] sm:$0xff]  ;;  %v567_v16 = vld [vmem:[#allocation2 + $0xa8] sm:$0xff]  ;;  %v544_v17 = vld [vmem:[#allocation2] sm:$0xff] }
  0xb0   : > { %769 = vmatpush.bf16.msra.mxu0 %v1301_v51  ;;  %1310 = vmatpush.bf16.msra.mxu1 %v1301_v51  ;;  %v1295_v8 = vld [vmem:[%s1871_s0 + $0x78] sm:$0xff]  ;;  %v552_v18 = vld [vmem:[#allocation2 + $0x88] sm:$0xff]  ;;  %v568_v28 = vld [vmem:[#allocation2 + $0xd0] sm:$0xff]  ;;  %s2071_s0 = sld [smem:[#allocation8_spill]] }
  0xb1   : > { %1311 = vmatpush.bf16.msra.mxu2 %v1301_v51  ;;  %1312 = vmatpush.bf16.msra.mxu3 %v1301_v51  ;;  %v559_v15 = vld [vmem:[#allocation2 + $0x38] sm:$0xff]  ;;  %v553_v30 = vld [vmem:[#allocation2 + $0xe8] sm:$0xff]  ;;  %v561_v39 = vld [vmem:[#allocation2 + $0x40] sm:$0xff] }
  0xb2   : > { %v560_v27 = vld [vmem:[#allocation2 + $0x58] sm:$0xff]  ;;  %v569_v40 = vld [vmem:[#allocation2 + $0x10] sm:$0xff]  ;;  %v562_v51 = vld [vmem:[#allocation2 + $0xc8] sm:$0xff] }
  0xb3   : > { %v545_v29 = vld [vmem:[#allocation2 + $0xd8] sm:$0xff] }
  0xb4   : > { %770 = vmatpush.bf16.msra.mxu0 %v1300_v52  ;;  %1313 = vmatpush.bf16.msra.mxu1 %v1300_v52  ;;  %v546_v41 = vld [vmem:[#allocation2 + $0x18] sm:$0xff] }
  0xb5   : > { %1314 = vmatpush.bf16.msra.mxu2 %v1300_v52  ;;  %1315 = vmatpush.bf16.msra.mxu3 %v1300_v52  ;;  %v554_v42 = vld [vmem:[#allocation2 + $0xb8] sm:$0xff]  ;;  %v570_v52 = vld [vmem:[#allocation2 + $0x28] sm:$0xff] }
  0xb6   : > { %p1273_p9 = scmp.ne.s32.totalorder %s2071_s0, 2 }
  0xb8   : > { %771 = vmatpush.bf16.msra.mxu0 %v1299_v53  ;;  %1316 = vmatpush.bf16.msra.mxu1 %v1299_v53 }
  0xb9   : > { %1317 = vmatpush.bf16.msra.mxu2 %v1299_v53  ;;  %1318 = vmatpush.bf16.msra.mxu3 %v1299_v53  ;;  %v547_v53 = vld [vmem:[#allocation2 + $0x50] sm:$0xff] }
  0xbc   : > { %772 = vmatpush.bf16.msra.mxu0 %v1298_v54  ;;  %1319 = vmatpush.bf16.msra.mxu1 %v1298_v54 }
  0xbd   : > { %1320 = vmatpush.bf16.msra.mxu2 %v1298_v54  ;;  %1321 = vmatpush.bf16.msra.mxu3 %v1298_v54  ;;  %v555_v54 = vld [vmem:[#allocation2 + $0x60] sm:$0xff] }
  0xc0   : > { %773 = vmatpush.bf16.msra.mxu0 %v1297_v55  ;;  %1322 = vmatpush.bf16.msra.mxu1 %v1297_v55 }
  0xc1   : > { %1323 = vmatpush.bf16.msra.mxu2 %v1297_v55  ;;  %1324 = vmatpush.bf16.msra.mxu3 %v1297_v55 }
  0xc4   : > { %774 = vmatpush.bf16.msra.mxu0 %v1296_v56  ;;  %1325 = vmatpush.bf16.msra.mxu1 %v1296_v56 }
  0xc5   : > { %1326 = vmatpush.bf16.msra.mxu2 %v1296_v56  ;;  %1327 = vmatpush.bf16.msra.mxu3 %v1296_v56 }
  0xc7   : > { %775 = vmatmul.bf16.vlgmr.msra.gmra.mxu0 %v1280_v57  ;;  %795 = vmatmul.bf16.vlgmr.msra.gmra.mxu1 %v1284_v58 }
  0xc8   : > { %815 = vmatmul.bf16.vlgmr.msra.gmra.mxu2 %v1288_v59  ;;  %835 = vmatmul.bf16.vlgmr.msra.gmra.mxu3 %v1292_v60 }
  0xd7   : > { %780 = vmatmul.bf16.gmra.mxu0 %v1281_v61  ;;  %800 = vmatmul.bf16.gmra.mxu1 %v1285_v62 }
  0xd8   : > { %820 = vmatmul.bf16.gmra.mxu2 %v1289_v63  ;;  %840 = vmatmul.bf16.gmra.mxu3 %v1293_v0  ;;  %v563_v63 = vld [vmem:[#allocation2 + $0xe0] sm:$0xff] }
  0xd9   : > { %v571_v0 = vld [vmem:[#allocation2 + $0xa0] sm:$0xff] }
  0xe7   : > { %785 = vmatmul.bf16.gmra.mxu0 %v1282_v1  ;;  %805 = vmatmul.bf16.gmra.mxu1 %v1286_v2  ;;  %v548_v1 = vld [vmem:[#allocation2 + $0x68] sm:$0xff]  ;;  %v556_v2 = vld [vmem:[#allocation2 + $0xf0] sm:$0xff] }
  0xe8   : > { %825 = vmatmul.bf16.gmra.mxu2 %v1290_v3  ;;  %845 = vmatmul.bf16.gmra.mxu3 %v1294_v4 }
  0xf7   : > { %790 = vmatmul.bf16.gmra.mxu0 %v1283_v5  ;;  %810 = vmatmul.bf16.gmra.mxu1 %v1287_v6 }
  0xf8   : > { %830 = vmatmul.bf16.gmra.mxu2 %v1291_v7  ;;  %850 = vmatmul.bf16.gmra.mxu3 %v1295_v8 }
 0x144   : > { %v776_v11 = vpop.f32.mrf.mxu0  ;;  %v796_v12 = vpop.f32.mrf.mxu1 }
 0x145   : > { %v856_v13 = vadd.f32 %v776_v11, %v543_v9  ;;  %v864_v14 = vadd.f32 %v796_v12, %v551_v10  ;;  %v564_v11 = vld [vmem:[#allocation2 + $0x90] sm:$0xff]  ;;  %v572_v12 = vld [vmem:[#allocation2 + $0xf8] sm:$0xff] }
 0x147   : > { %888 = vst [vmem:[#allocation2 + $0xb0] sm:$0xff] %v856_v13  ;;  %v549_v13 = vld [vmem:[#allocation2 + $0x30] sm:$0xff] }
 0x148   : > { %896 = vst [vmem:[#allocation2 + $0x80] sm:$0xff] %v864_v14  ;;  %v557_v14 = vld [vmem:[#allocation2 + $0x8] sm:$0xff] }
 0x14b   : > { %v816_v19 = vpop.f32.mrf.mxu2  ;;  %v836_v20 = vpop.f32.mrf.mxu3 }
 0x14c   : > { %v872_v21 = vadd.f32 %v816_v19, %v559_v15  ;;  %v880_v22 = vadd.f32 %v836_v20, %v567_v16  ;;  %v778_v23 = vpop.f32.mrf.mxu0  ;;  %v798_v24 = vpop.f32.mrf.mxu1 }
 0x14d   : > { %v857_v25 = vadd.f32 %v778_v23, %v544_v17  ;;  %v865_v26 = vadd.f32 %v798_v24, %v552_v18  ;;  %v565_v23 = vld [vmem:[#allocation2 + $0x70] sm:$0xff]  ;;  %v573_v24 = vld [vmem:[#allocation2 + $0x20] sm:$0xff] }
 0x14e   : > { %904 = vst [vmem:[#allocation2 + $0x38] sm:$0xff] %v872_v21 }
 0x14f   : > { %912 = vst [vmem:[#allocation2 + $0xa8] sm:$0xff] %v880_v22 }
 0x150   : > { %889 = vst [vmem:[#allocation2] sm:$0xff] %v857_v25  ;;  %v550_v25 = vld [vmem:[#allocation2 + $0x48] sm:$0xff] }
 0x151   : > { %897 = vst [vmem:[#allocation2 + $0x88] sm:$0xff] %v865_v26  ;;  %v558_v26 = vld [vmem:[#allocation2 + $0x78] sm:$0xff] }
 0x153   : > { %v818_v31 = vpop.f32.mrf.mxu2  ;;  %v838_v32 = vpop.f32.mrf.mxu3 }
 0x154   : > { %v873_v33 = vadd.f32 %v818_v31, %v560_v27  ;;  %v881_v34 = vadd.f32 %v838_v32, %v568_v28  ;;  %v781_v35 = vpop.f32.mrf.mxu0  ;;  %v801_v36 = vpop.f32.mrf.mxu1 }
 0x155   : > { %v858_v37 = vadd.f32 %v781_v35, %v545_v29  ;;  %v866_v38 = vadd.f32 %v801_v36, %v553_v30  ;;  %v566_v35 = vld [vmem:[#allocation2 + $0xc0] sm:$0xff]  ;;  %v574_v36 = vld [vmem:[#allocation2 + $0x98] sm:$0xff] }
 0x156   : > { %905 = vst [vmem:[#allocation2 + $0x58] sm:$0xff] %v873_v33 }
 0x157   : > { %913 = vst [vmem:[#allocation2 + $0xd0] sm:$0xff] %v881_v34 }
 0x158   : > { %890 = vst [vmem:[#allocation2 + $0xd8] sm:$0xff] %v858_v37 }
 0x159   : > { %898 = vst [vmem:[#allocation2 + $0xe8] sm:$0xff] %v866_v38 }
 0x15b   : > { %v821_v43 = vpop.f32.mrf.mxu2  ;;  %v841_v44 = vpop.f32.mrf.mxu3 }
 0x15c   : > { %v874_v45 = vadd.f32 %v821_v43, %v561_v39  ;;  %v882_v46 = vadd.f32 %v841_v44, %v569_v40  ;;  %v783_v47 = vpop.f32.mrf.mxu0  ;;  %v803_v48 = vpop.f32.mrf.mxu1 }
 0x15d   : > { %v859_v49 = vadd.f32 %v783_v47, %v546_v41  ;;  %v867_v50 = vadd.f32 %v803_v48, %v554_v42 }
 0x15e   : > { %906 = vst [vmem:[#allocation2 + $0x40] sm:$0xff] %v874_v45 }
 0x15f   : > { %914 = vst [vmem:[#allocation2 + $0x10] sm:$0xff] %v882_v46 }
 0x160   : > { %891 = vst [vmem:[#allocation2 + $0x18] sm:$0xff] %v859_v49 }
 0x161   : > { %899 = vst [vmem:[#allocation2 + $0xb8] sm:$0xff] %v867_v50 }
 0x163   : > { %v823_v55 = vpop.f32.mrf.mxu2  ;;  %v843_v56 = vpop.f32.mrf.mxu3 }
 0x164   : > { %v875_v57 = vadd.f32 %v823_v55, %v562_v51  ;;  %v883_v58 = vadd.f32 %v843_v56, %v570_v52  ;;  %v786_v59 = vpop.f32.mrf.mxu0  ;;  %v806_v60 = vpop.f32.mrf.mxu1 }
 0x165   : > { %v860_v61 = vadd.f32 %v786_v59, %v547_v53  ;;  %v868_v62 = vadd.f32 %v806_v60, %v555_v54 }
 0x166   : > { %907 = vst [vmem:[#allocation2 + $0xc8] sm:$0xff] %v875_v57 }
 0x167   : > { %915 = vst [vmem:[#allocation2 + $0x28] sm:$0xff] %v883_v58 }
 0x168   : > { %892 = vst [vmem:[#allocation2 + $0x50] sm:$0xff] %v860_v61 }
 0x169   : > { %900 = vst [vmem:[#allocation2 + $0x60] sm:$0xff] %v868_v62 }
 0x16b   : > { %v826_v3 = vpop.f32.mrf.mxu2  ;;  %v846_v4 = vpop.f32.mrf.mxu3 }
 0x16c   : > { %v876_v5 = vadd.f32 %v826_v3, %v563_v63  ;;  %v884_v6 = vadd.f32 %v846_v4, %v571_v0  ;;  %v788_v7 = vpop.f32.mrf.mxu0  ;;  %v808_v8 = vpop.f32.mrf.mxu1 }
 0x16d   : > { %v861_v9 = vadd.f32 %v788_v7, %v548_v1  ;;  %v869_v10 = vadd.f32 %v808_v8, %v556_v2 }
 0x16e   : > { %908 = vst [vmem:[#allocation2 + $0xe0] sm:$0xff] %v876_v5 }
 0x16f   : > { %916 = vst [vmem:[#allocation2 + $0xa0] sm:$0xff] %v884_v6 }
 0x170   : > { %893 = vst [vmem:[#allocation2 + $0x68] sm:$0xff] %v861_v9 }
 0x171   : > { %901 = vst [vmem:[#allocation2 + $0xf0] sm:$0xff] %v869_v10 }
 0x173   : > { %v828_v15 = vpop.f32.mrf.mxu2  ;;  %v848_v16 = vpop.f32.mrf.mxu3 }
 0x174   : > { %v877_v17 = vadd.f32 %v828_v15, %v564_v11  ;;  %v885_v18 = vadd.f32 %v848_v16, %v572_v12  ;;  %v791_v19 = vpop.f32.mrf.mxu0  ;;  %v811_v20 = vpop.f32.mrf.mxu1 }
 0x175   : > { %v862_v21 = vadd.f32 %v791_v19, %v549_v13  ;;  %v870_v22 = vadd.f32 %v811_v20, %v557_v14 }
 0x176   : > { %909 = vst [vmem:[#allocation2 + $0x90] sm:$0xff] %v877_v17 }
 0x177   : > { %917 = vst [vmem:[#allocation2 + $0xf8] sm:$0xff] %v885_v18 }
 0x178   : > { %894 = vst [vmem:[#allocation2 + $0x30] sm:$0xff] %v862_v21 }
 0x179   : > { %902 = vst [vmem:[#allocation2 + $0x8] sm:$0xff] %v870_v22 }
 0x17b   : > { %v831_v27 = vpop.f32.mrf.mxu2  ;;  %v851_v28 = vpop.f32.mrf.mxu3 }
 0x17c   : > { %v878_v29 = vadd.f32 %v831_v27, %v565_v23  ;;  %v886_v30 = vadd.f32 %v851_v28, %v573_v24  ;;  %v793_v31 = vpop.f32.mrf.mxu0  ;;  %v813_v32 = vpop.f32.mrf.mxu1 }
 0x17d   : > { %v863_v33 = vadd.f32 %v793_v31, %v550_v25  ;;  %v871_v34 = vadd.f32 %v813_v32, %v558_v26 }
 0x17e   : > { %910 = vst [vmem:[#allocation2 + $0x70] sm:$0xff] %v878_v29 }
 0x17f   : > { %918 = vst [vmem:[#allocation2 + $0x20] sm:$0xff] %v886_v30 }
 0x180   : > { %895 = vst [vmem:[#allocation2 + $0x48] sm:$0xff] %v863_v33 }
 0x181   : > { %903 = vst [vmem:[#allocation2 + $0x78] sm:$0xff] %v871_v34 }
 0x183   : > { %v833_v37 = vpop.f32.mrf.mxu2  ;;  %v853_v38 = vpop.f32.mrf.mxu3  ;;  %923 = sbr.rel (%p1273_p9) target bundleno = 427 (0x1ab), region = 122 }
 0x184   : > { %v879_v39 = vadd.f32 %v833_v37, %v566_v35  ;;  %v887_v40 = vadd.f32 %v853_v38, %v574_v36 }
 0x186   : > { %911 = vst [vmem:[#allocation2 + $0xc0] sm:$0xff] %v879_v39 }
 0x187   : > { %919 = vst [vmem:[#allocation2 + $0x98] sm:$0xff] %v887_v40 }
 0x188   : > { %v924_v41 = vld [vmem:[#allocation2 + $0xb0] sm:$0xff]  ;;  %v1908_v42 = vld [vmem:[%s505_s9] ss:$0 sm:$0xff]  ;;  %v926_v44 = vld [vmem:[#allocation2 + $0xd8] sm:$0xff] }
 0x189   : > { %v925_v43 = vld [vmem:[#allocation2] sm:$0xff]  ;;  %v927_v45 = vld [vmem:[#allocation2 + $0x18] sm:$0xff]  ;;  %v960_v46 = vadd.f32 %v1908_v42, %v924_v41  ;;  %v962_v48 = vadd.f32 %v1908_v42, %v926_v44  ;;  %v928_v49 = vld [vmem:[#allocation2 + $0x50] sm:$0xff] }
 0x18a   : > { %v961_v47 = vadd.f32 %v1908_v42, %v925_v43  ;;  %v929_v50 = vld [vmem:[#allocation2 + $0x68] sm:$0xff]  ;;  %v963_v51 = vadd.f32 %v1908_v42, %v927_v45  ;;  %v930_v52 = vld [vmem:[#allocation2 + $0x30] sm:$0xff]  ;;  %v964_v53 = vadd.f32 %v1908_v42, %v928_v49  ;;  %v932_v56 = vld [vmem:[#allocation2 + $0x80] sm:$0xff] }
 0x18b   : > { %992 = vst [vmem:[%s1875_s30] sm:$0xff] %v960_v46  ;;  %v931_v54 = vld [vmem:[#allocation2 + $0x48] sm:$0xff]  ;;  %v965_v55 = vadd.f32 %v1908_v42, %v929_v50  ;;  %v966_v57 = vadd.f32 %v1908_v42, %v930_v52  ;;  %v968_v61 = vadd.f32 %v1908_v42, %v932_v56  ;;  %v935_v62 = vld [vmem:[#allocation2 + $0xb8] sm:$0xff]  ;;  %v936_v0 = vld [vmem:[#allocation2 + $0x60] sm:$0xff] }
 0x18c   : > { %993 = vst [vmem:[%s1875_s30 + $0x8] sm:$0xff] %v961_v47  ;;  %v933_v58 = vld [vmem:[#allocation2 + $0x88] sm:$0xff]  ;;  %v967_v59 = vadd.f32 %v1908_v42, %v931_v54  ;;  %v937_v2 = vld [vmem:[#allocation2 + $0xf0] sm:$0xff]  ;;  %v971_v3 = vadd.f32 %v1908_v42, %v935_v62  ;;  %v972_v5 = vadd.f32 %v1908_v42, %v936_v0  ;;  %v939_v6 = vld [vmem:[#allocation2 + $0x78] sm:$0xff] }
 0x18d   : > { %994 = vst [vmem:[%s1875_s30 + $0x10] sm:$0xff] %v962_v48  ;;  %v934_v60 = vld [vmem:[#allocation2 + $0xe8] sm:$0xff]  ;;  %v969_v63 = vadd.f32 %v1908_v42, %v933_v58  ;;  %v973_v7 = vadd.f32 %v1908_v42, %v937_v2  ;;  %v940_v8 = vld [vmem:[#allocation2 + $0x38] sm:$0xff]  ;;  %v975_v11 = vadd.f32 %v1908_v42, %v939_v6  ;;  %v942_v12 = vld [vmem:[#allocation2 + $0x40] sm:$0xff] }
 0x18e   : > { %995 = vst [vmem:[%s1875_s30 + $0x18] sm:$0xff] %v963_v51  ;;  %v970_v1 = vadd.f32 %v1908_v42, %v934_v60  ;;  %v938_v4 = vld [vmem:[#allocation2 + $0x8] sm:$0xff]  ;;  %v941_v10 = vld [vmem:[#allocation2 + $0x58] sm:$0xff]  ;;  %v976_v13 = vadd.f32 %v1908_v42, %v940_v8  ;;  %v944_v16 = vld [vmem:[#allocation2 + $0xe0] sm:$0xff]  ;;  %v978_v17 = vadd.f32 %v1908_v42, %v942_v12 }
 0x18f   : > { %996 = vst [vmem:[%s1875_s30 + $0x20] sm:$0xff] %v964_v53  ;;  %v974_v9 = vadd.f32 %v1908_v42, %v938_v4  ;;  %v943_v14 = vld [vmem:[#allocation2 + $0xc8] sm:$0xff]  ;;  %v977_v15 = vadd.f32 %v1908_v42, %v941_v10  ;;  %v945_v18 = vld [vmem:[#allocation2 + $0x90] sm:$0xff]  ;;  %v980_v21 = vadd.f32 %v1908_v42, %v944_v16  ;;  %v947_v22 = vld [vmem:[#allocation2 + $0xc0] sm:$0xff] }
 0x190   : > { %997 = vst [vmem:[%s1875_s30 + $0x28] sm:$0xff] %v965_v55  ;;  %v979_v19 = vadd.f32 %v1908_v42, %v943_v14  ;;  %v946_v20 = vld [vmem:[#allocation2 + $0x70] sm:$0xff]  ;;  %v981_v23 = vadd.f32 %v1908_v42, %v945_v18  ;;  %v948_v24 = vld [vmem:[#allocation2 + $0xa8] sm:$0xff]  ;;  %v983_v27 = vadd.f32 %v1908_v42, %v947_v22  ;;  %v952_v32 = vld [vmem:[#allocation2 + $0xa0] sm:$0xff] }
 0x191   : > { %998 = vst [vmem:[%s1875_s30 + $0x30] sm:$0xff] %v966_v57  ;;  %v982_v25 = vadd.f32 %v1908_v42, %v946_v20  ;;  %v949_v26 = vld [vmem:[#allocation2 + $0xd0] sm:$0xff]  ;;  %v984_v29 = vadd.f32 %v1908_v42, %v948_v24  ;;  %v951_v30 = vld [vmem:[#allocation2 + $0x28] sm:$0xff]  ;;  %v953_v34 = vld [vmem:[#allocation2 + $0xf8] sm:$0xff]  ;;  %v988_v37 = vadd.f32 %v1908_v42, %v952_v32 }
 0x192   : > { %999 = vst [vmem:[%s1875_s30 + $0x38] sm:$0xff] %v967_v59  ;;  %v950_v28 = vld [vmem:[#allocation2 + $0x10] sm:$0xff]  ;;  %v985_v31 = vadd.f32 %v1908_v42, %v949_v26  ;;  %v987_v35 = vadd.f32 %v1908_v42, %v951_v30  ;;  %v954_v36 = vld [vmem:[#allocation2 + $0x20] sm:$0xff]  ;;  %v955_v38 = vld [vmem:[#allocation2 + $0x98] sm:$0xff]  ;;  %v989_v39 = vadd.f32 %v1908_v42, %v953_v34 }
 0x193   : > { %1000 = vst [vmem:[%s1875_s30 + $0x40] sm:$0xff] %v968_v61  ;;  %v986_v33 = vadd.f32 %v1908_v42, %v950_v28  ;;  %v990_v40 = vadd.f32 %v1908_v42, %v954_v36  ;;  %v991_v41 = vadd.f32 %v1908_v42, %v955_v38 }
 0x194   : > { %1001 = vst [vmem:[%s1875_s30 + $0x48] sm:$0xff] %v969_v63 }
 0x195   : > { %1002 = vst [vmem:[%s1875_s30 + $0x50] sm:$0xff] %v970_v1 }
 0x196   : > { %1003 = vst [vmem:[%s1875_s30 + $0x58] sm:$0xff] %v971_v3 }
 0x197   : > { %1004 = vst [vmem:[%s1875_s30 + $0x60] sm:$0xff] %v972_v5 }
 0x198   : > { %1005 = vst [vmem:[%s1875_s30 + $0x68] sm:$0xff] %v973_v7 }
 0x199   : > { %1006 = vst [vmem:[%s1875_s30 + $0x70] sm:$0xff] %v974_v9 }
 0x19a   : > { %1007 = vst [vmem:[%s1875_s30 + $0x78] sm:$0xff] %v975_v11 }
 0x19b   : > { %1008 = vst [vmem:[%s1875_s30 + $0x80] sm:$0xff] %v976_v13 }
 0x19c   : > { %1009 = vst [vmem:[%s1875_s30 + $0x88] sm:$0xff] %v977_v15 }
 0x19d   : > { %1010 = vst [vmem:[%s1875_s30 + $0x90] sm:$0xff] %v978_v17 }
 0x19e   : > { %1011 = vst [vmem:[%s1875_s30 + $0x98] sm:$0xff] %v979_v19 }
 0x19f   : > { %1012 = vst [vmem:[%s1875_s30 + $0xa0] sm:$0xff] %v980_v21 }
 0x1a0   : > { %1013 = vst [vmem:[%s1875_s30 + $0xa8] sm:$0xff] %v981_v23 }
 0x1a1   : > { %1014 = vst [vmem:[%s1875_s30 + $0xb0] sm:$0xff] %v982_v25 }
 0x1a2   : > { %1015 = vst [vmem:[%s1875_s30 + $0xb8] sm:$0xff] %v983_v27 }
 0x1a3   : > { %1016 = vst [vmem:[%s1875_s30 + $0xc0] sm:$0xff] %v984_v29 }
 0x1a4   : > { %1017 = vst [vmem:[%s1875_s30 + $0xc8] sm:$0xff] %v985_v31 }
 0x1a5   : > { %1018 = vst [vmem:[%s1875_s30 + $0xd0] sm:$0xff] %v986_v33 }
 0x1a6   : > { %1019 = vst [vmem:[%s1875_s30 + $0xd8] sm:$0xff] %v987_v35 }
 0x1a7   : > { %1020 = vst [vmem:[%s1875_s30 + $0xe0] sm:$0xff] %v988_v37 }
 0x1a8   : > { %1021 = vst [vmem:[%s1875_s30 + $0xe8] sm:$0xff] %v989_v39 }
 0x1a9   : > { %1022 = vst [vmem:[%s1875_s30 + $0xf0] sm:$0xff] %v990_v40 }
 0x1aa   : > { %1023 = vst [vmem:[%s1875_s30 + $0xf8] sm:$0xff] %v991_v41 }
 0x1ab PF: > { %s2073_s7 = sld [smem:[#allocation9_spill]]  ;;  %s1039_s3 = sshll.u32 %s1875_s30, 4  ;;  %s1040_s3 = int_to_ptr.vmem [resolvable:$true] %s1039_s3 }
 0x1ac   : > { %s2074_s2 = sld [smem:[#allocation16_spill]]  ;;  %s1025_s0 = scalar_lea.sflag [#allocation6], %s498_s26 }
 0x1b1   : > { %s1330_s11 = smul.u32 96, %s2073_s7 }
 0x1b3   : > { %s1036_s28 = sadd.s32 %s1577_s20, %s1330_s11  ;;  %s1475_s20 = scalar_lea.hbm %s2074_s2, 1536 }
 0x1b4   : > { %s1277_s29 = sshll.u32 %s1036_s28, 3 }
 0x1b5   : > { %s1038_s9 = scalar_lea.hbm %s2074_s2, %s1277_s29 }
 0x1b6   : > { %s1041_s15 = sshll.u32 %s1038_s9, 4  ;;  %s1042_s15 = int_to_ptr.hbm [resolvable:$true] %s1041_s15 }
 0x1b7   : > { %s1469_s1 = sshra.s32 %s1042_s15, 4  ;;  %s1470_s1 = int_to_ptr.hbm [resolvable:$true] %s1469_s1 }
 0x1b8   : > { %s1471_s17 = scalar_lea.hbm %s1470_s1, 256  ;;  %p1476_p13 = scmp.lt.s32.totalorder %s1470_s1, %s2074_s2 }
 0x1b9   : > { %p1472_p10 = scmp.ne.s32.totalorder %s1470_s1, %s1471_s17  ;;  %p1477_p1 = scmp.lt.s32.totalorder %s1475_s20, %s1471_s17 }
 0x1bb   : > { %p1473_p11 = pnand %p1472_p10, %p1743_p0  ;;  %p1478_p3 = por %p1477_p1, %p1476_p13 }
 0x1bd   : > { %p1474_p12 = pneg %p1473_p11 }
 0x1bf   : > { %p1479_p4 = pnand %p1478_p3, %p1474_p12 }
 0x1c1   : > { %1482 = shalt.err (!%p1479_p4)
}
 0x1c2   : > { %s1600_s26 = smov 128   ;;  %s1601_s28 = smov 384  }
 0x1c3   : > { %s1602_s29 = smov 8  }
 0x1c4   : > { %1331 = dma.vmem_to_hbm [thread:$0]  (%p1743_p0), %s1040_s3, 4096, %s1042_s15, %s1025_s0, %s1600_s26, %s1601_s28, %s1602_s29  }
 0x1c5 PF: > { %p1337_p5 = scmp.ge.s32.totalorder %s1597_s25, 2  ;;  %s1056_s4 = sand.u32 1, %s1545_s12  }
 0x1c6   : > { %s1057_s5 = scalar_lea.sflag [#allocation6], %s1056_s4 }
 0x1c7   : > { %p1334_p6 = pnand %p1337_p5, %p1749_p2 }
 0x1c9   : > { %p1335_p7 = pneg %p1334_p6 }
 0x1cb   : > { %1540 = dma.done.wait (%p1335_p7), %s1057_s5, 4096  }
 0x1cc   : > { %1542 = vsyncadd (%p1335_p7), %s1057_s5, 4294963200  ;;  %s16_s25 = sadd.s32 1, %s1597_s25   ;;  %s2076_s10 = sld [smem:[#allocation10_spill]] }
 0x1cd   : > { %p1997_p8 = scmp.ge.s32.totalorder %s16_s25, 20   ;;  %s2077_s6 = sld [smem:[#allocation11_spill]] }
 0x1ce   : > { %s2078_s3 = sld [smem:[#allocation12_spill]]  ;;  %s2079_s12 = smov %s1549_s13 }
 0x1cf   : > { %s2080_s13 = smov %s1553_s14  ;;  %s2081_s14 = smov %s1741_s19 }
 0x1d0   : > { %s2082_s15 = smov %s1561_s16  ;;  %s2083_s16 = smov %s1727_s27 }
 0x1d1   : > { %s2084_s17 = smov %s1569_s18  ;;  %s2085_s18 = smov %s1738_s21 }
 0x1d2   : > { %s2086_s19 = smov %s1585_s22  ;;  %s2087_s20 = smov %s1589_s23 }
 0x1d3   : > { %s2088_s21 = smov %s1593_s24  ;;  %s2089_s22 = smov %s2076_s10 }
 0x1d4   : > { %s2090_s23 = smov %s2077_s6  ;;  %s2091_s24 = smov %s2078_s3 }
 0x1d5   :  { %15 = sbr.rel (!%p1997_p8) target bundleno = 13 (0xd), region = 173 }
 0x1da   :  { %1063 = vsyncpa [#allocation6], 1 }
 0x1db   :  { %1065 = vsyncpa [#allocation6 + $0x1], 1 }

</bundles_post_ra>
